<compile_context>
chip_gen: v6e
topology: v6e:2x2x1
jax: 0.10.0
libtpu: 0.0.40
codegen_flags: <defaults>
</compile_context>

<pallas_src>
import numpy as np
import jax
import jax.numpy as jnp
from jax.experimental import pallas as pl
from jax.experimental.pallas import tpu as pltpu

# (out_channels, kernel_size, stride, padding, groups) for conv1..conv7
CONV_CFGS = [
    (135, 6, 2, 1, 9),
    (94, 5, 2, 3, 1),
    (95, 7, 2, 2, 1),
    (86, 7, 1, 2, 1),
    (111, 7, 1, 1, 1),
    (112, 2, 1, 3, 1),
    (18, 7, 1, 1, 1),
]
FC8_OUT = 216
FC9_OUT = 17
BN_EPS = 1e-5
N_LAYERS = len(CONV_CFGS) + 2          # 7 convs + fc8 + fc9, all expressed uniformly
MXU_DTYPE = jnp.bfloat16               # MXU operand dtype (accumulation is always f32)


def _round_up(v, m):
    return ((v + m - 1) // m) * m


# ------------------------------ Pallas kernel --------------------------------
def _simple_cnn_kernel(x_ref, *refs):
    """Entire SimpleCNN forward for one batch element (one grid step).

    refs = [G_1..G_9, W_1..W_9, ST_1..ST_9, out]
      G_i : (K_i*Lout_pad_i, Lin_pad_i)  stacked 0/1 gather matrices (stride + zero
                                         padding baked in); row t*Lout_pad+l selects
                                         input position l*stride + t - padding.
      W_i : (K_i*Cin_pad_i, Cout_pad_i)  per-tap dense weights stacked along rows
                                         (block-diagonal over groups).
      ST_i: (2, Cout_pad_i)              row 0 = scale, row 1 = offset (conv bias + BN).
    All channel dims are padded to x128 (lanes), all length dims to x8 (sublanes).
    """
    g_refs = refs[0:N_LAYERS]
    w_refs = refs[N_LAYERS:2 * N_LAYERS]
    st_refs = refs[2 * N_LAYERS:3 * N_LAYERS]
    o_ref = refs[3 * N_LAYERS]

    a = x_ref[0]                                  # (L0_pad, C0_pad), channels-last
    y = None
    for li in range(N_LAYERS):
        g_ref, w_ref, st_ref = g_refs[li], w_refs[li], st_refs[li]
        # Static per-layer geometry, recovered from ref shapes (layer li's padded output
        # length equals layer li+1's padded input length; the last layer writes o_ref).
        lout_pad = g_refs[li + 1].shape[1] if li + 1 < N_LAYERS else o_ref.shape[1]
        k = g_ref.shape[0] // lout_pad

        # (1) All K im2col taps in a single MXU matmul (stride + zero padding encoded
        #     in the 0/1 gather matrix; padded rows are all-zero and never selected).
        xg = jnp.dot(g_ref[...], a, preferred_element_type=jnp.float32)
        # (2) Lane-concatenate the tap blocks (sublane offsets are multiples of 8,
        #     lane widths multiples of 128 -> cheap vreg placement, no XLU transpose).
        if k > 1:
            x_im2col = jnp.concatenate(
                [xg[t * lout_pad:(t + 1) * lout_pad, :] for t in range(k)], axis=1)
        else:
            x_im2col = xg
        # (3) Whole conv/FC layer as ONE matmul over the stacked (tap, channel) dim.
        acc = jnp.dot(x_im2col.astype(MXU_DTYPE), w_ref[...],
                      preferred_element_type=jnp.float32)

        st = st_ref[...]
        y = acc * st[0:1, :] + st[1:2, :]         # conv bias + eval-mode BN, pre-folded
        if li < N_LAYERS - 1:                     # ReLU on every layer except fc9
            y = jnp.maximum(y, 0.0)
        a = y.astype(MXU_DTYPE)
    o_ref[...] = y.reshape(o_ref.shape)           # (1, Lout_pad, Cout_pad), f32


# ------------------------------ Forward wrapper -------------------------------
def _full_spec(arr):
    zeros = (0,) * arr.ndim
    return pl.BlockSpec(arr.shape, lambda b, _z=zeros: _z)


@jax.jit
def simple_cnn_forward(x, params):
    """x: (B, C_in, L_in) float32 in PyTorch NCL layout. Returns (B, 17) logits."""
    B, C, L = x.shape
    g_list, w_list, st_list = params["g"], params["w"], params["st"]
    c0_pad = _round_up(C, 128)
    l0_pad = g_list[0].shape[1]
    lN_pad = g_list[-1].shape[0]                  # fc9 has a single tap (K=1)
    cN_pad = w_list[-1].shape[1]

    # NCL -> channels-last (B, L, C), zero-padded to (x8, x128) tiles, MXU dtype.
    xcl = jnp.transpose(x, (0, 2, 1)).astype(MXU_DTYPE)
    x_pad = jnp.pad(xcl, ((0, 0), (0, l0_pad - L), (0, c0_pad - C)))

    inputs = [x_pad] + list(g_list) + list(w_list) + list(st_list)
    in_specs = [pl.BlockSpec((1, l0_pad, c0_pad), lambda b: (b, 0, 0))]
    in_specs += [_full_spec(a) for a in inputs[1:]]

    out = pl.pallas_call(
        _simple_cnn_kernel,
        out_shape=jax.ShapeDtypeStruct((B, lN_pad, cN_pad), jnp.float32),
        grid=(B,),
        in_specs=in_specs,
        out_specs=pl.BlockSpec((1, lN_pad, cN_pad), lambda b: (b, 0, 0)),
        compiler_params=pltpu.CompilerParams(dimension_semantics=("parallel",)),
    )(*inputs)
    return out[:, 0, :FC9_OUT]


# ------------------------- One-time weight preparation ------------------------
def prepare_params(convs, fcs, c_in, l_in):
    """Fold BN into scale/offset, densify grouped conv weights (block-diagonal),
    build stacked per-tap 0/1 gather matrices and stacked per-tap weights, fold
    fc8/fc9 into 1-output-position conv layers, and zero-pad everything to TPU
    tile multiples.  Runs once at init (outside jit)."""
    fc8_w, fc8_b, fc9_w, fc9_b = fcs

    # Logical (C, L) after the conv stack (for the flatten-order-preserving fc8 reshape).
    c, L = c_in, l_in
    for (c_out, k, s, p, _g) in CONV_CFGS:
        c, L = c_out, (L + 2 * p - k) // s + 1

    # Per-layer: (weight in PyTorch conv layout (C_out, C_in/groups, K), scale, offset,
    #             kernel, stride, padding, groups)
    layers = []
    for (w, b, gamma, beta, mean, var), (_c_out, k, s, p, groups) in zip(convs, CONV_CFGS):
        scale = np.asarray(gamma) / np.sqrt(np.asarray(var) + BN_EPS)
        offset = (np.asarray(b) - np.asarray(mean)) * scale + np.asarray(beta)
        layers.append((np.asarray(w), scale, offset, k, s, p, groups))
    # fc8: flatten + Linear == conv whose kernel covers all L positions; reordering the
    # (C-major) PyTorch flatten rows into per-position taps preserves feature order.
    w8 = np.transpose(np.asarray(fc8_w).reshape(c, L, FC8_OUT), (2, 0, 1))    # (216, C7, L7)
    layers.append((w8, np.ones(FC8_OUT, np.float32), np.asarray(fc8_b), L, 1, 0, 1))
    # fc9: 1x1 conv on the single remaining position, no ReLU (handled in kernel).
    w9 = np.transpose(np.asarray(fc9_w))[:, :, None]                          # (17, 216, 1)
    layers.append((w9, np.ones(FC9_OUT, np.float32), np.asarray(fc9_b), 1, 1, 0, 1))

    g_list, w_list, st_list = [], [], []
    c, L = c_in, l_in
    c_pad, l_pad = _round_up(c, 128), _round_up(L, 8)
    for (w, scale, offset, k, s, p, groups) in layers:
        c_out = w.shape[0]
        c_in_g, c_out_g = c // groups, c_out // groups
        l_out = (L + 2 * p - k) // s + 1
        c_out_pad, l_out_pad = _round_up(c_out, 128), _round_up(l_out, 8)

        # Stacked per-tap dense weight (K*C_in_pad, C_out_pad): rows [t*c_pad:(t+1)*c_pad]
        # hold tap t, block-diagonal over groups.  Matches the kernel's lane-concat order.
        wt = np.zeros((k * c_pad, c_out_pad), np.float32)
        for t in range(k):
            for g in range(groups):
                blk = np.transpose(w[g * c_out_g:(g + 1) * c_out_g, :, t])    # (cin_g, cout_g)
                wt[t * c_pad + g * c_in_g: t * c_pad + (g + 1) * c_in_g,
                   g * c_out_g:(g + 1) * c_out_g] = blk

        # Stacked 0/1 gather matrix: row (t*l_out_pad + lo) selects source l = lo*s + t - p.
        # Out-of-range sources stay zero == conv zero padding.  Rows lo >= l_out are
        # all-zero padding rows; their outputs are never selected by later layers.
        gm = np.zeros((k * l_out_pad, l_pad), np.float32)
        for t in range(k):
            for lo in range(l_out):
                src = lo * s + t - p
                if 0 <= src < L:
                    gm[t * l_out_pad + lo, src] = 1.0

        st = np.zeros((2, c_out_pad), np.float32)   # padded channels get scale=offset=0
        st[0, :c_out] = scale
        st[1, :c_out] = offset

        g_list.append(jnp.asarray(gm, dtype=MXU_DTYPE))
        w_list.append(jnp.asarray(wt, dtype=MXU_DTYPE))
        st_list.append(jnp.asarray(st, dtype=jnp.float32))
        c, L, c_pad, l_pad = c_out, l_out, c_out_pad, l_out_pad

    return {"g": g_list, "w": w_list, "st": st_list}


# --------------------------- Deterministic init -------------------------------
def init_params(key, c_in, l_in):
    """Deterministic stand-in for the (lazily-initialized) PyTorch parameters."""
    convs = []
    c, L = c_in, l_in
    for (c_out, k, s, p, g) in CONV_CFGS:
        key, k1, k2, k3, k4, k5, k6 = jax.random.split(key, 7)
        fan_in = (c // g) * k
        bound = 1.0 / float(fan_in) ** 0.5
        w = jax.random.uniform(k1, (c_out, c // g, k), jnp.float32, -bound, bound)
        b = jax.random.uniform(k2, (c_out,), jnp.float32, -bound, bound)
        gamma = jax.random.uniform(k3, (c_out,), jnp.float32, 0.5, 1.5)
        beta = 0.1 * jax.random.normal(k4, (c_out,), jnp.float32)
        mean = 0.1 * jax.random.normal(k5, (c_out,), jnp.float32)
        var = jax.random.uniform(k6, (c_out,), jnp.float32, 0.5, 1.5)
        convs.append((w, b, gamma, beta, mean, var))
        c, L = c_out, (L + 2 * p - k) // s + 1
    feat = c * L                                     # 18 * 3 = 54 for L_in = 64
    key, k1, k2, k3, k4 = jax.random.split(key, 5)
    bound = 1.0 / float(feat) ** 0.5
    fc8_w = jax.random.uniform(k1, (feat, FC8_OUT), jnp.float32, -bound, bound)
    fc8_b = jax.random.uniform(k2, (FC8_OUT,), jnp.float32, -bound, bound)
    bound = 1.0 / float(FC8_OUT) ** 0.5
    fc9_w = jax.random.uniform(k3, (FC8_OUT, FC9_OUT), jnp.float32, -bound, bound)
    fc9_b = jax.random.uniform(k4, (FC9_OUT,), jnp.float32, -bound, bound)
    return convs, (fc8_w, fc8_b, fc9_w, fc9_b)


if __name__ == "__main__":
    key = jax.random.PRNGKey(0)
    kx, kp = jax.random.split(key)
    B, C_IN, L_IN = 2, 9, 64                          # groups=9 => C_in divisible by 9
    x = jax.random.normal(kx, (B, C_IN, L_IN), jnp.float32)
    convs, fcs = init_params(kp, C_IN, L_IN)
    params = prepare_params(convs, fcs, C_IN, L_IN)   # one-time weight prep (outside jit)
    out = simple_cnn_forward(x, params)               # jitted, single fused pallas_call
    out = jax.block_until_ready(out)
    assert out.shape == (B, FC9_OUT), out.shape
    assert bool(jnp.all(jnp.isfinite(out)))
    print("KERNEL_OK")
</pallas_src>

<mosaic_0001>
module attributes {stable_mosaic.version = 11 : i64} {
  func.func @_simple_cnn_kernel(%arg0: i32, %arg1: memref<1x64x128xbf16, #tpu.memory_space<vmem>>, %arg2: memref<192x64xbf16, #tpu.memory_space<vmem>>, %arg3: memref<120x32xbf16, #tpu.memory_space<vmem>>, %arg4: memref<56x24xbf16, #tpu.memory_space<vmem>>, %arg5: memref<56x8xbf16, #tpu.memory_space<vmem>>, %arg6: memref<56x8xbf16, #tpu.memory_space<vmem>>, %arg7: memref<16x8xbf16, #tpu.memory_space<vmem>>, %arg8: memref<56x8xbf16, #tpu.memory_space<vmem>>, %arg9: memref<24x8xbf16, #tpu.memory_space<vmem>>, %arg10: memref<8x8xbf16, #tpu.memory_space<vmem>>, %arg11: memref<768x256xbf16, #tpu.memory_space<vmem>>, %arg12: memref<1280x128xbf16, #tpu.memory_space<vmem>>, %arg13: memref<896x128xbf16, #tpu.memory_space<vmem>>, %arg14: memref<896x128xbf16, #tpu.memory_space<vmem>>, %arg15: memref<896x128xbf16, #tpu.memory_space<vmem>>, %arg16: memref<256x128xbf16, #tpu.memory_space<vmem>>, %arg17: memref<896x128xbf16, #tpu.memory_space<vmem>>, %arg18: memref<384x256xbf16, #tpu.memory_space<vmem>>, %arg19: memref<256x128xbf16, #tpu.memory_space<vmem>>, %arg20: memref<2x256xf32, #tpu.memory_space<vmem>>, %arg21: memref<2x128xf32, #tpu.memory_space<vmem>>, %arg22: memref<2x128xf32, #tpu.memory_space<vmem>>, %arg23: memref<2x128xf32, #tpu.memory_space<vmem>>, %arg24: memref<2x128xf32, #tpu.memory_space<vmem>>, %arg25: memref<2x128xf32, #tpu.memory_space<vmem>>, %arg26: memref<2x128xf32, #tpu.memory_space<vmem>>, %arg27: memref<2x256xf32, #tpu.memory_space<vmem>>, %arg28: memref<2x128xf32, #tpu.memory_space<vmem>>, %arg29: memref<1x8x128xf32, #tpu.memory_space<vmem>>) attributes {dimension_semantics = [#tpu.dimension_semantics<parallel>], iteration_bounds = array<i64: 2>, scalar_prefetch = 0 : i64, scratch_operands = 0 : i64, tpu.core_type = #tpu.core_type<tc>, window_params = [{transform_indices = @transform_0, window_bounds = array<i64: 1, 64, 128>}, {pipeline_mode = #tpu.pipeline_mode<synchronous>, transform_indices = @transform_1, window_bounds = array<i64: 192, 64>}, {pipeline_mode = #tpu.pipeline_mode<synchronous>, transform_indices = @transform_2, window_bounds = array<i64: 120, 32>}, {pipeline_mode = #tpu.pipeline_mode<synchronous>, transform_indices = @transform_3, window_bounds = array<i64: 56, 24>}, {pipeline_mode = #tpu.pipeline_mode<synchronous>, transform_indices = @transform_4, window_bounds = array<i64: 56, 8>}, {pipeline_mode = #tpu.pipeline_mode<synchronous>, transform_indices = @transform_5, window_bounds = array<i64: 56, 8>}, {pipeline_mode = #tpu.pipeline_mode<synchronous>, transform_indices = @transform_6, window_bounds = array<i64: 16, 8>}, {pipeline_mode = #tpu.pipeline_mode<synchronous>, transform_indices = @transform_7, window_bounds = array<i64: 56, 8>}, {pipeline_mode = #tpu.pipeline_mode<synchronous>, transform_indices = @transform_8, window_bounds = array<i64: 24, 8>}, {pipeline_mode = #tpu.pipeline_mode<synchronous>, transform_indices = @transform_9, window_bounds = array<i64: 8, 8>}, {pipeline_mode = #tpu.pipeline_mode<synchronous>, transform_indices = @transform_10, window_bounds = array<i64: 768, 256>}, {pipeline_mode = #tpu.pipeline_mode<synchronous>, transform_indices = @transform_11, window_bounds = array<i64: 1280, 128>}, {pipeline_mode = #tpu.pipeline_mode<synchronous>, transform_indices = @transform_12, window_bounds = array<i64: 896, 128>}, {pipeline_mode = #tpu.pipeline_mode<synchronous>, transform_indices = @transform_13, window_bounds = array<i64: 896, 128>}, {pipeline_mode = #tpu.pipeline_mode<synchronous>, transform_indices = @transform_14, window_bounds = array<i64: 896, 128>}, {pipeline_mode = #tpu.pipeline_mode<synchronous>, transform_indices = @transform_15, window_bounds = array<i64: 256, 128>}, {pipeline_mode = #tpu.pipeline_mode<synchronous>, transform_indices = @transform_16, window_bounds = array<i64: 896, 128>}, {pipeline_mode = #tpu.pipeline_mode<synchronous>, transform_indices = @transform_17, window_bounds = array<i64: 384, 256>}, {pipeline_mode = #tpu.pipeline_mode<synchronous>, transform_indices = @transform_18, window_bounds = array<i64: 256, 128>}, {pipeline_mode = #tpu.pipeline_mode<synchronous>, transform_indices = @transform_19, window_bounds = array<i64: 2, 256>}, {pipeline_mode = #tpu.pipeline_mode<synchronous>, transform_indices = @transform_20, window_bounds = array<i64: 2, 128>}, {pipeline_mode = #tpu.pipeline_mode<synchronous>, transform_indices = @transform_21, window_bounds = array<i64: 2, 128>}, {pipeline_mode = #tpu.pipeline_mode<synchronous>, transform_indices = @transform_22, window_bounds = array<i64: 2, 128>}, {pipeline_mode = #tpu.pipeline_mode<synchronous>, transform_indices = @transform_23, window_bounds = array<i64: 2, 128>}, {pipeline_mode = #tpu.pipeline_mode<synchronous>, transform_indices = @transform_24, window_bounds = array<i64: 2, 128>}, {pipeline_mode = #tpu.pipeline_mode<synchronous>, transform_indices = @transform_25, window_bounds = array<i64: 2, 128>}, {pipeline_mode = #tpu.pipeline_mode<synchronous>, transform_indices = @transform_26, window_bounds = array<i64: 2, 256>}, {pipeline_mode = #tpu.pipeline_mode<synchronous>, transform_indices = @transform_27, window_bounds = array<i64: 2, 128>}, {transform_indices = @transform_28, window_bounds = array<i64: 1, 8, 128>}]} {
    %c0 = arith.constant 0 : index
    %c0_0 = arith.constant 0 : index
    %c0_1 = arith.constant 0 : index
    %0 = vector.load %arg1[%c0, %c0_0, %c0_1] : memref<1x64x128xbf16, #tpu.memory_space<vmem>>, vector<1x64x128xbf16>
    %1 = vector.shape_cast %0 : vector<1x64x128xbf16> to vector<64x128xbf16>
    %c0_2 = arith.constant 0 : index
    %c0_3 = arith.constant 0 : index
    %2 = vector.load %arg2[%c0_2, %c0_3] : memref<192x64xbf16, #tpu.memory_space<vmem>>, vector<192x64xbf16>
    %cst = arith.constant dense<0.000000e+00> : vector<192x128xf32>
    %3 = tpu.matmul %2, %1, %cst {dimension_numbers = #tpu.dot_dimension_numbers<[1], [0], [0], [1], [0, 0, 1, 1], [], []>} : vector<192x64xbf16>, vector<64x128xbf16>, vector<192x128xf32> -> vector<192x128xf32>
    %4 = vector.extract_strided_slice %3 {offsets = [0, 0], sizes = [32, 128], strides = [1, 1]} : vector<192x128xf32> to vector<32x128xf32>
    %5 = vector.extract_strided_slice %3 {offsets = [32, 0], sizes = [32, 128], strides = [1, 1]} : vector<192x128xf32> to vector<32x128xf32>
    %6 = vector.extract_strided_slice %3 {offsets = [64, 0], sizes = [32, 128], strides = [1, 1]} : vector<192x128xf32> to vector<32x128xf32>
    %7 = vector.extract_strided_slice %3 {offsets = [96, 0], sizes = [32, 128], strides = [1, 1]} : vector<192x128xf32> to vector<32x128xf32>
    %8 = vector.extract_strided_slice %3 {offsets = [128, 0], sizes = [32, 128], strides = [1, 1]} : vector<192x128xf32> to vector<32x128xf32>
    %9 = vector.extract_strided_slice %3 {offsets = [160, 0], sizes = [32, 128], strides = [1, 1]} : vector<192x128xf32> to vector<32x128xf32>
    %10 = tpu.concatenate %4, %5, %6, %7, %8, %9 in 1 : vector<32x128xf32>, vector<32x128xf32>, vector<32x128xf32>, vector<32x128xf32>, vector<32x128xf32>, vector<32x128xf32> -> vector<32x768xf32>
    %11 = arith.truncf %10 : vector<32x768xf32> to vector<32x768xbf16>
    %c0_4 = arith.constant 0 : index
    %c0_5 = arith.constant 0 : index
    %12 = vector.load %arg11[%c0_4, %c0_5] : memref<768x256xbf16, #tpu.memory_space<vmem>>, vector<768x256xbf16>
    %cst_6 = arith.constant dense<0.000000e+00> : vector<32x256xf32>
    %13 = tpu.matmul %11, %12, %cst_6 {dimension_numbers = #tpu.dot_dimension_numbers<[1], [0], [0], [1], [0, 0, 1, 1], [], []>} : vector<32x768xbf16>, vector<768x256xbf16>, vector<32x256xf32> -> vector<32x256xf32>
    %c0_7 = arith.constant 0 : index
    %c0_8 = arith.constant 0 : index
    %14 = vector.load %arg20[%c0_7, %c0_8] : memref<2x256xf32, #tpu.memory_space<vmem>>, vector<2x256xf32>
    %15 = vector.extract_strided_slice %14 {offsets = [0, 0], sizes = [1, 256], strides = [1, 1]} : vector<2x256xf32> to vector<1x256xf32>
    %16 = vector.broadcast %15 : vector<1x256xf32> to vector<32x256xf32>
    %17 = arith.mulf %13, %16 : vector<32x256xf32>
    %18 = vector.extract_strided_slice %14 {offsets = [1, 0], sizes = [1, 256], strides = [1, 1]} : vector<2x256xf32> to vector<1x256xf32>
    %19 = vector.broadcast %18 : vector<1x256xf32> to vector<32x256xf32>
    %20 = arith.addf %17, %19 : vector<32x256xf32>
    %cst_9 = arith.constant 0.000000e+00 : f32
    %21 = vector.broadcast %cst_9 : f32 to vector<32x256xf32>
    %22 = arith.maximumf %20, %21 : vector<32x256xf32>
    %23 = arith.truncf %22 : vector<32x256xf32> to vector<32x256xbf16>
    %c0_10 = arith.constant 0 : index
    %c0_11 = arith.constant 0 : index
    %24 = vector.load %arg3[%c0_10, %c0_11] : memref<120x32xbf16, #tpu.memory_space<vmem>>, vector<120x32xbf16>
    %cst_12 = arith.constant dense<0.000000e+00> : vector<120x256xf32>
    %25 = tpu.matmul %24, %23, %cst_12 {dimension_numbers = #tpu.dot_dimension_numbers<[1], [0], [0], [1], [0, 0, 1, 1], [], []>} : vector<120x32xbf16>, vector<32x256xbf16>, vector<120x256xf32> -> vector<120x256xf32>
    %26 = vector.extract_strided_slice %25 {offsets = [0, 0], sizes = [24, 256], strides = [1, 1]} : vector<120x256xf32> to vector<24x256xf32>
    %27 = vector.extract_strided_slice %25 {offsets = [24, 0], sizes = [24, 256], strides = [1, 1]} : vector<120x256xf32> to vector<24x256xf32>
    %28 = vector.extract_strided_slice %25 {offsets = [48, 0], sizes = [24, 256], strides = [1, 1]} : vector<120x256xf32> to vector<24x256xf32>
    %29 = vector.extract_strided_slice %25 {offsets = [72, 0], sizes = [24, 256], strides = [1, 1]} : vector<120x256xf32> to vector<24x256xf32>
    %30 = vector.extract_strided_slice %25 {offsets = [96, 0], sizes = [24, 256], strides = [1, 1]} : vector<120x256xf32> to vector<24x256xf32>
    %31 = tpu.concatenate %26, %27, %28, %29, %30 in 1 : vector<24x256xf32>, vector<24x256xf32>, vector<24x256xf32>, vector<24x256xf32>, vector<24x256xf32> -> vector<24x1280xf32>
    %32 = arith.truncf %31 : vector<24x1280xf32> to vector<24x1280xbf16>
    %c0_13 = arith.constant 0 : index
    %c0_14 = arith.constant 0 : index
    %33 = vector.load %arg12[%c0_13, %c0_14] : memref<1280x128xbf16, #tpu.memory_space<vmem>>, vector<1280x128xbf16>
    %cst_15 = arith.constant dense<0.000000e+00> : vector<24x128xf32>
    %34 = tpu.matmul %32, %33, %cst_15 {dimension_numbers = #tpu.dot_dimension_numbers<[1], [0], [0], [1], [0, 0, 1, 1], [], []>} : vector<24x1280xbf16>, vector<1280x128xbf16>, vector<24x128xf32> -> vector<24x128xf32>
    %c0_16 = arith.constant 0 : index
    %c0_17 = arith.constant 0 : index
    %35 = vector.load %arg21[%c0_16, %c0_17] : memref<2x128xf32, #tpu.memory_space<vmem>>, vector<2x128xf32>
    %36 = vector.extract_strided_slice %35 {offsets = [0, 0], sizes = [1, 128], strides = [1, 1]} : vector<2x128xf32> to vector<1x128xf32>
    %37 = vector.broadcast %36 : vector<1x128xf32> to vector<24x128xf32>
    %38 = arith.mulf %34, %37 : vector<24x128xf32>
    %39 = vector.extract_strided_slice %35 {offsets = [1, 0], sizes = [1, 128], strides = [1, 1]} : vector<2x128xf32> to vector<1x128xf32>
    %40 = vector.broadcast %39 : vector<1x128xf32> to vector<24x128xf32>
    %41 = arith.addf %38, %40 : vector<24x128xf32>
    %cst_18 = arith.constant 0.000000e+00 : f32
    %42 = vector.broadcast %cst_18 : f32 to vector<24x128xf32>
    %43 = arith.maximumf %41, %42 : vector<24x128xf32>
    %44 = arith.truncf %43 : vector<24x128xf32> to vector<24x128xbf16>
    %c0_19 = arith.constant 0 : index
    %c0_20 = arith.constant 0 : index
    %45 = vector.load %arg4[%c0_19, %c0_20] : memref<56x24xbf16, #tpu.memory_space<vmem>>, vector<56x24xbf16>
    %cst_21 = arith.constant dense<0.000000e+00> : vector<56x128xf32>
    %46 = tpu.matmul %45, %44, %cst_21 {dimension_numbers = #tpu.dot_dimension_numbers<[1], [0], [0], [1], [0, 0, 1, 1], [], []>} : vector<56x24xbf16>, vector<24x128xbf16>, vector<56x128xf32> -> vector<56x128xf32>
    %47 = vector.extract_strided_slice %46 {offsets = [0, 0], sizes = [8, 128], strides = [1, 1]} : vector<56x128xf32> to vector<8x128xf32>
    %48 = vector.extract_strided_slice %46 {offsets = [8, 0], sizes = [8, 128], strides = [1, 1]} : vector<56x128xf32> to vector<8x128xf32>
    %49 = vector.extract_strided_slice %46 {offsets = [16, 0], sizes = [8, 128], strides = [1, 1]} : vector<56x128xf32> to vector<8x128xf32>
    %50 = vector.extract_strided_slice %46 {offsets = [24, 0], sizes = [8, 128], strides = [1, 1]} : vector<56x128xf32> to vector<8x128xf32>
    %51 = vector.extract_strided_slice %46 {offsets = [32, 0], sizes = [8, 128], strides = [1, 1]} : vector<56x128xf32> to vector<8x128xf32>
    %52 = vector.extract_strided_slice %46 {offsets = [40, 0], sizes = [8, 128], strides = [1, 1]} : vector<56x128xf32> to vector<8x128xf32>
    %53 = vector.extract_strided_slice %46 {offsets = [48, 0], sizes = [8, 128], strides = [1, 1]} : vector<56x128xf32> to vector<8x128xf32>
    %54 = tpu.concatenate %47, %48, %49, %50, %51, %52, %53 in 1 : vector<8x128xf32>, vector<8x128xf32>, vector<8x128xf32>, vector<8x128xf32>, vector<8x128xf32>, vector<8x128xf32>, vector<8x128xf32> -> vector<8x896xf32>
    %55 = arith.truncf %54 : vector<8x896xf32> to vector<8x896xbf16>
    %c0_22 = arith.constant 0 : index
    %c0_23 = arith.constant 0 : index
    %56 = vector.load %arg13[%c0_22, %c0_23] : memref<896x128xbf16, #tpu.memory_space<vmem>>, vector<896x128xbf16>
    %cst_24 = arith.constant dense<0.000000e+00> : vector<8x128xf32>
    %57 = tpu.matmul %55, %56, %cst_24 {dimension_numbers = #tpu.dot_dimension_numbers<[1], [0], [0], [1], [0, 0, 1, 1], [], []>} : vector<8x896xbf16>, vector<896x128xbf16>, vector<8x128xf32> -> vector<8x128xf32>
    %c0_25 = arith.constant 0 : index
    %c0_26 = arith.constant 0 : index
    %58 = vector.load %arg22[%c0_25, %c0_26] : memref<2x128xf32, #tpu.memory_space<vmem>>, vector<2x128xf32>
    %59 = vector.extract_strided_slice %58 {offsets = [0, 0], sizes = [1, 128], strides = [1, 1]} : vector<2x128xf32> to vector<1x128xf32>
    %60 = vector.broadcast %59 : vector<1x128xf32> to vector<8x128xf32>
    %61 = arith.mulf %57, %60 : vector<8x128xf32>
    %62 = vector.extract_strided_slice %58 {offsets = [1, 0], sizes = [1, 128], strides = [1, 1]} : vector<2x128xf32> to vector<1x128xf32>
    %63 = vector.broadcast %62 : vector<1x128xf32> to vector<8x128xf32>
    %64 = arith.addf %61, %63 : vector<8x128xf32>
    %cst_27 = arith.constant 0.000000e+00 : f32
    %65 = vector.broadcast %cst_27 : f32 to vector<8x128xf32>
    %66 = arith.maximumf %64, %65 : vector<8x128xf32>
    %67 = arith.truncf %66 : vector<8x128xf32> to vector<8x128xbf16>
    %c0_28 = arith.constant 0 : index
    %c0_29 = arith.constant 0 : index
    %68 = vector.load %arg5[%c0_28, %c0_29] : memref<56x8xbf16, #tpu.memory_space<vmem>>, vector<56x8xbf16>
    %cst_30 = arith.constant dense<0.000000e+00> : vector<56x128xf32>
    %69 = tpu.matmul %68, %67, %cst_30 {dimension_numbers = #tpu.dot_dimension_numbers<[1], [0], [0], [1], [0, 0, 1, 1], [], []>} : vector<56x8xbf16>, vector<8x128xbf16>, vector<56x128xf32> -> vector<56x128xf32>
    %70 = vector.extract_strided_slice %69 {offsets = [0, 0], sizes = [8, 128], strides = [1, 1]} : vector<56x128xf32> to vector<8x128xf32>
    %71 = vector.extract_strided_slice %69 {offsets = [8, 0], sizes = [8, 128], strides = [1, 1]} : vector<56x128xf32> to vector<8x128xf32>
    %72 = vector.extract_strided_slice %69 {offsets = [16, 0], sizes = [8, 128], strides = [1, 1]} : vector<56x128xf32> to vector<8x128xf32>
    %73 = vector.extract_strided_slice %69 {offsets = [24, 0], sizes = [8, 128], strides = [1, 1]} : vector<56x128xf32> to vector<8x128xf32>
    %74 = vector.extract_strided_slice %69 {offsets = [32, 0], sizes = [8, 128], strides = [1, 1]} : vector<56x128xf32> to vector<8x128xf32>
    %75 = vector.extract_strided_slice %69 {offsets = [40, 0], sizes = [8, 128], strides = [1, 1]} : vector<56x128xf32> to vector<8x128xf32>
    %76 = vector.extract_strided_slice %69 {offsets = [48, 0], sizes = [8, 128], strides = [1, 1]} : vector<56x128xf32> to vector<8x128xf32>
    %77 = tpu.concatenate %70, %71, %72, %73, %74, %75, %76 in 1 : vector<8x128xf32>, vector<8x128xf32>, vector<8x128xf32>, vector<8x128xf32>, vector<8x128xf32>, vector<8x128xf32>, vector<8x128xf32> -> vector<8x896xf32>
    %78 = arith.truncf %77 : vector<8x896xf32> to vector<8x896xbf16>
    %c0_31 = arith.constant 0 : index
    %c0_32 = arith.constant 0 : index
    %79 = vector.load %arg14[%c0_31, %c0_32] : memref<896x128xbf16, #tpu.memory_space<vmem>>, vector<896x128xbf16>
    %cst_33 = arith.constant dense<0.000000e+00> : vector<8x128xf32>
    %80 = tpu.matmul %78, %79, %cst_33 {dimension_numbers = #tpu.dot_dimension_numbers<[1], [0], [0], [1], [0, 0, 1, 1], [], []>} : vector<8x896xbf16>, vector<896x128xbf16>, vector<8x128xf32> -> vector<8x128xf32>
    %c0_34 = arith.constant 0 : index
    %c0_35 = arith.constant 0 : index
    %81 = vector.load %arg23[%c0_34, %c0_35] : memref<2x128xf32, #tpu.memory_space<vmem>>, vector<2x128xf32>
    %82 = vector.extract_strided_slice %81 {offsets = [0, 0], sizes = [1, 128], strides = [1, 1]} : vector<2x128xf32> to vector<1x128xf32>
    %83 = vector.broadcast %82 : vector<1x128xf32> to vector<8x128xf32>
    %84 = arith.mulf %80, %83 : vector<8x128xf32>
    %85 = vector.extract_strided_slice %81 {offsets = [1, 0], sizes = [1, 128], strides = [1, 1]} : vector<2x128xf32> to vector<1x128xf32>
    %86 = vector.broadcast %85 : vector<1x128xf32> to vector<8x128xf32>
    %87 = arith.addf %84, %86 : vector<8x128xf32>
    %cst_36 = arith.constant 0.000000e+00 : f32
    %88 = vector.broadcast %cst_36 : f32 to vector<8x128xf32>
    %89 = arith.maximumf %87, %88 : vector<8x128xf32>
    %90 = arith.truncf %89 : vector<8x128xf32> to vector<8x128xbf16>
    %c0_37 = arith.constant 0 : index
    %c0_38 = arith.constant 0 : index
    %91 = vector.load %arg6[%c0_37, %c0_38] : memref<56x8xbf16, #tpu.memory_space<vmem>>, vector<56x8xbf16>
    %cst_39 = arith.constant dense<0.000000e+00> : vector<56x128xf32>
    %92 = tpu.matmul %91, %90, %cst_39 {dimension_numbers = #tpu.dot_dimension_numbers<[1], [0], [0], [1], [0, 0, 1, 1], [], []>} : vector<56x8xbf16>, vector<8x128xbf16>, vector<56x128xf32> -> vector<56x128xf32>
    %93 = vector.extract_strided_slice %92 {offsets = [0, 0], sizes = [8, 128], strides = [1, 1]} : vector<56x128xf32> to vector<8x128xf32>
    %94 = vector.extract_strided_slice %92 {offsets = [8, 0], sizes = [8, 128], strides = [1, 1]} : vector<56x128xf32> to vector<8x128xf32>
    %95 = vector.extract_strided_slice %92 {offsets = [16, 0], sizes = [8, 128], strides = [1, 1]} : vector<56x128xf32> to vector<8x128xf32>
    %96 = vector.extract_strided_slice %92 {offsets = [24, 0], sizes = [8, 128], strides = [1, 1]} : vector<56x128xf32> to vector<8x128xf32>
    %97 = vector.extract_strided_slice %92 {offsets = [32, 0], sizes = [8, 128], strides = [1, 1]} : vector<56x128xf32> to vector<8x128xf32>
    %98 = vector.extract_strided_slice %92 {offsets = [40, 0], sizes = [8, 128], strides = [1, 1]} : vector<56x128xf32> to vector<8x128xf32>
    %99 = vector.extract_strided_slice %92 {offsets = [48, 0], sizes = [8, 128], strides = [1, 1]} : vector<56x128xf32> to vector<8x128xf32>
    %100 = tpu.concatenate %93, %94, %95, %96, %97, %98, %99 in 1 : vector<8x128xf32>, vector<8x128xf32>, vector<8x128xf32>, vector<8x128xf32>, vector<8x128xf32>, vector<8x128xf32>, vector<8x128xf32> -> vector<8x896xf32>
    %101 = arith.truncf %100 : vector<8x896xf32> to vector<8x896xbf16>
    %c0_40 = arith.constant 0 : index
    %c0_41 = arith.constant 0 : index
    %102 = vector.load %arg15[%c0_40, %c0_41] : memref<896x128xbf16, #tpu.memory_space<vmem>>, vector<896x128xbf16>
    %cst_42 = arith.constant dense<0.000000e+00> : vector<8x128xf32>
    %103 = tpu.matmul %101, %102, %cst_42 {dimension_numbers = #tpu.dot_dimension_numbers<[1], [0], [0], [1], [0, 0, 1, 1], [], []>} : vector<8x896xbf16>, vector<896x128xbf16>, vector<8x128xf32> -> vector<8x128xf32>
    %c0_43 = arith.constant 0 : index
    %c0_44 = arith.constant 0 : index
    %104 = vector.load %arg24[%c0_43, %c0_44] : memref<2x128xf32, #tpu.memory_space<vmem>>, vector<2x128xf32>
    %105 = vector.extract_strided_slice %104 {offsets = [0, 0], sizes = [1, 128], strides = [1, 1]} : vector<2x128xf32> to vector<1x128xf32>
    %106 = vector.broadcast %105 : vector<1x128xf32> to vector<8x128xf32>
    %107 = arith.mulf %103, %106 : vector<8x128xf32>
    %108 = vector.extract_strided_slice %104 {offsets = [1, 0], sizes = [1, 128], strides = [1, 1]} : vector<2x128xf32> to vector<1x128xf32>
    %109 = vector.broadcast %108 : vector<1x128xf32> to vector<8x128xf32>
    %110 = arith.addf %107, %109 : vector<8x128xf32>
    %cst_45 = arith.constant 0.000000e+00 : f32
    %111 = vector.broadcast %cst_45 : f32 to vector<8x128xf32>
    %112 = arith.maximumf %110, %111 : vector<8x128xf32>
    %113 = arith.truncf %112 : vector<8x128xf32> to vector<8x128xbf16>
    %c0_46 = arith.constant 0 : index
    %c0_47 = arith.constant 0 : index
    %114 = vector.load %arg7[%c0_46, %c0_47] : memref<16x8xbf16, #tpu.memory_space<vmem>>, vector<16x8xbf16>
    %cst_48 = arith.constant dense<0.000000e+00> : vector<16x128xf32>
    %115 = tpu.matmul %114, %113, %cst_48 {dimension_numbers = #tpu.dot_dimension_numbers<[1], [0], [0], [1], [0, 0, 1, 1], [], []>} : vector<16x8xbf16>, vector<8x128xbf16>, vector<16x128xf32> -> vector<16x128xf32>
    %116 = vector.extract_strided_slice %115 {offsets = [0, 0], sizes = [8, 128], strides = [1, 1]} : vector<16x128xf32> to vector<8x128xf32>
    %117 = vector.extract_strided_slice %115 {offsets = [8, 0], sizes = [8, 128], strides = [1, 1]} : vector<16x128xf32> to vector<8x128xf32>
    %118 = tpu.concatenate %116, %117 in 1 : vector<8x128xf32>, vector<8x128xf32> -> vector<8x256xf32>
    %119 = arith.truncf %118 : vector<8x256xf32> to vector<8x256xbf16>
    %c0_49 = arith.constant 0 : index
    %c0_50 = arith.constant 0 : index
    %120 = vector.load %arg16[%c0_49, %c0_50] : memref<256x128xbf16, #tpu.memory_space<vmem>>, vector<256x128xbf16>
    %cst_51 = arith.constant dense<0.000000e+00> : vector<8x128xf32>
    %121 = tpu.matmul %119, %120, %cst_51 {dimension_numbers = #tpu.dot_dimension_numbers<[1], [0], [0], [1], [0, 0, 1, 1], [], []>} : vector<8x256xbf16>, vector<256x128xbf16>, vector<8x128xf32> -> vector<8x128xf32>
    %c0_52 = arith.constant 0 : index
    %c0_53 = arith.constant 0 : index
    %122 = vector.load %arg25[%c0_52, %c0_53] : memref<2x128xf32, #tpu.memory_space<vmem>>, vector<2x128xf32>
    %123 = vector.extract_strided_slice %122 {offsets = [0, 0], sizes = [1, 128], strides = [1, 1]} : vector<2x128xf32> to vector<1x128xf32>
    %124 = vector.broadcast %123 : vector<1x128xf32> to vector<8x128xf32>
    %125 = arith.mulf %121, %124 : vector<8x128xf32>
    %126 = vector.extract_strided_slice %122 {offsets = [1, 0], sizes = [1, 128], strides = [1, 1]} : vector<2x128xf32> to vector<1x128xf32>
    %127 = vector.broadcast %126 : vector<1x128xf32> to vector<8x128xf32>
    %128 = arith.addf %125, %127 : vector<8x128xf32>
    %cst_54 = arith.constant 0.000000e+00 : f32
    %129 = vector.broadcast %cst_54 : f32 to vector<8x128xf32>
    %130 = arith.maximumf %128, %129 : vector<8x128xf32>
    %131 = arith.truncf %130 : vector<8x128xf32> to vector<8x128xbf16>
    %c0_55 = arith.constant 0 : index
    %c0_56 = arith.constant 0 : index
    %132 = vector.load %arg8[%c0_55, %c0_56] : memref<56x8xbf16, #tpu.memory_space<vmem>>, vector<56x8xbf16>
    %cst_57 = arith.constant dense<0.000000e+00> : vector<56x128xf32>
    %133 = tpu.matmul %132, %131, %cst_57 {dimension_numbers = #tpu.dot_dimension_numbers<[1], [0], [0], [1], [0, 0, 1, 1], [], []>} : vector<56x8xbf16>, vector<8x128xbf16>, vector<56x128xf32> -> vector<56x128xf32>
    %134 = vector.extract_strided_slice %133 {offsets = [0, 0], sizes = [8, 128], strides = [1, 1]} : vector<56x128xf32> to vector<8x128xf32>
    %135 = vector.extract_strided_slice %133 {offsets = [8, 0], sizes = [8, 128], strides = [1, 1]} : vector<56x128xf32> to vector<8x128xf32>
    %136 = vector.extract_strided_slice %133 {offsets = [16, 0], sizes = [8, 128], strides = [1, 1]} : vector<56x128xf32> to vector<8x128xf32>
    %137 = vector.extract_strided_slice %133 {offsets = [24, 0], sizes = [8, 128], strides = [1, 1]} : vector<56x128xf32> to vector<8x128xf32>
    %138 = vector.extract_strided_slice %133 {offsets = [32, 0], sizes = [8, 128], strides = [1, 1]} : vector<56x128xf32> to vector<8x128xf32>
    %139 = vector.extract_strided_slice %133 {offsets = [40, 0], sizes = [8, 128], strides = [1, 1]} : vector<56x128xf32> to vector<8x128xf32>
    %140 = vector.extract_strided_slice %133 {offsets = [48, 0], sizes = [8, 128], strides = [1, 1]} : vector<56x128xf32> to vector<8x128xf32>
    %141 = tpu.concatenate %134, %135, %136, %137, %138, %139, %140 in 1 : vector<8x128xf32>, vector<8x128xf32>, vector<8x128xf32>, vector<8x128xf32>, vector<8x128xf32>, vector<8x128xf32>, vector<8x128xf32> -> vector<8x896xf32>
    %142 = arith.truncf %141 : vector<8x896xf32> to vector<8x896xbf16>
    %c0_58 = arith.constant 0 : index
    %c0_59 = arith.constant 0 : index
    %143 = vector.load %arg17[%c0_58, %c0_59] : memref<896x128xbf16, #tpu.memory_space<vmem>>, vector<896x128xbf16>
    %cst_60 = arith.constant dense<0.000000e+00> : vector<8x128xf32>
    %144 = tpu.matmul %142, %143, %cst_60 {dimension_numbers = #tpu.dot_dimension_numbers<[1], [0], [0], [1], [0, 0, 1, 1], [], []>} : vector<8x896xbf16>, vector<896x128xbf16>, vector<8x128xf32> -> vector<8x128xf32>
    %c0_61 = arith.constant 0 : index
    %c0_62 = arith.constant 0 : index
    %145 = vector.load %arg26[%c0_61, %c0_62] : memref<2x128xf32, #tpu.memory_space<vmem>>, vector<2x128xf32>
    %146 = vector.extract_strided_slice %145 {offsets = [0, 0], sizes = [1, 128], strides = [1, 1]} : vector<2x128xf32> to vector<1x128xf32>
    %147 = vector.broadcast %146 : vector<1x128xf32> to vector<8x128xf32>
    %148 = arith.mulf %144, %147 : vector<8x128xf32>
    %149 = vector.extract_strided_slice %145 {offsets = [1, 0], sizes = [1, 128], strides = [1, 1]} : vector<2x128xf32> to vector<1x128xf32>
    %150 = vector.broadcast %149 : vector<1x128xf32> to vector<8x128xf32>
    %151 = arith.addf %148, %150 : vector<8x128xf32>
    %cst_63 = arith.constant 0.000000e+00 : f32
    %152 = vector.broadcast %cst_63 : f32 to vector<8x128xf32>
    %153 = arith.maximumf %151, %152 : vector<8x128xf32>
    %154 = arith.truncf %153 : vector<8x128xf32> to vector<8x128xbf16>
    %c0_64 = arith.constant 0 : index
    %c0_65 = arith.constant 0 : index
    %155 = vector.load %arg9[%c0_64, %c0_65] : memref<24x8xbf16, #tpu.memory_space<vmem>>, vector<24x8xbf16>
    %cst_66 = arith.constant dense<0.000000e+00> : vector<24x128xf32>
    %156 = tpu.matmul %155, %154, %cst_66 {dimension_numbers = #tpu.dot_dimension_numbers<[1], [0], [0], [1], [0, 0, 1, 1], [], []>} : vector<24x8xbf16>, vector<8x128xbf16>, vector<24x128xf32> -> vector<24x128xf32>
    %157 = vector.extract_strided_slice %156 {offsets = [0, 0], sizes = [8, 128], strides = [1, 1]} : vector<24x128xf32> to vector<8x128xf32>
    %158 = vector.extract_strided_slice %156 {offsets = [8, 0], sizes = [8, 128], strides = [1, 1]} : vector<24x128xf32> to vector<8x128xf32>
    %159 = vector.extract_strided_slice %156 {offsets = [16, 0], sizes = [8, 128], strides = [1, 1]} : vector<24x128xf32> to vector<8x128xf32>
    %160 = tpu.concatenate %157, %158, %159 in 1 : vector<8x128xf32>, vector<8x128xf32>, vector<8x128xf32> -> vector<8x384xf32>
    %161 = arith.truncf %160 : vector<8x384xf32> to vector<8x384xbf16>
    %c0_67 = arith.constant 0 : index
    %c0_68 = arith.constant 0 : index
    %162 = vector.load %arg18[%c0_67, %c0_68] : memref<384x256xbf16, #tpu.memory_space<vmem>>, vector<384x256xbf16>
    %cst_69 = arith.constant dense<0.000000e+00> : vector<8x256xf32>
    %163 = tpu.matmul %161, %162, %cst_69 {dimension_numbers = #tpu.dot_dimension_numbers<[1], [0], [0], [1], [0, 0, 1, 1], [], []>} : vector<8x384xbf16>, vector<384x256xbf16>, vector<8x256xf32> -> vector<8x256xf32>
    %c0_70 = arith.constant 0 : index
    %c0_71 = arith.constant 0 : index
    %164 = vector.load %arg27[%c0_70, %c0_71] : memref<2x256xf32, #tpu.memory_space<vmem>>, vector<2x256xf32>
    %165 = vector.extract_strided_slice %164 {offsets = [0, 0], sizes = [1, 256], strides = [1, 1]} : vector<2x256xf32> to vector<1x256xf32>
    %166 = vector.broadcast %165 : vector<1x256xf32> to vector<8x256xf32>
    %167 = arith.mulf %163, %166 : vector<8x256xf32>
    %168 = vector.extract_strided_slice %164 {offsets = [1, 0], sizes = [1, 256], strides = [1, 1]} : vector<2x256xf32> to vector<1x256xf32>
    %169 = vector.broadcast %168 : vector<1x256xf32> to vector<8x256xf32>
    %170 = arith.addf %167, %169 : vector<8x256xf32>
    %cst_72 = arith.constant 0.000000e+00 : f32
    %171 = vector.broadcast %cst_72 : f32 to vector<8x256xf32>
    %172 = arith.maximumf %170, %171 : vector<8x256xf32>
    %173 = arith.truncf %172 : vector<8x256xf32> to vector<8x256xbf16>
    %c0_73 = arith.constant 0 : index
    %c0_74 = arith.constant 0 : index
    %174 = vector.load %arg10[%c0_73, %c0_74] : memref<8x8xbf16, #tpu.memory_space<vmem>>, vector<8x8xbf16>
    %cst_75 = arith.constant dense<0.000000e+00> : vector<8x256xf32>
    %175 = tpu.matmul %174, %173, %cst_75 {dimension_numbers = #tpu.dot_dimension_numbers<[1], [0], [0], [1], [0, 0, 1, 1], [], []>} : vector<8x8xbf16>, vector<8x256xbf16>, vector<8x256xf32> -> vector<8x256xf32>
    %176 = arith.truncf %175 : vector<8x256xf32> to vector<8x256xbf16>
    %c0_76 = arith.constant 0 : index
    %c0_77 = arith.constant 0 : index
    %177 = vector.load %arg19[%c0_76, %c0_77] : memref<256x128xbf16, #tpu.memory_space<vmem>>, vector<256x128xbf16>
    %cst_78 = arith.constant dense<0.000000e+00> : vector<8x128xf32>
    %178 = tpu.matmul %176, %177, %cst_78 {dimension_numbers = #tpu.dot_dimension_numbers<[1], [0], [0], [1], [0, 0, 1, 1], [], []>} : vector<8x256xbf16>, vector<256x128xbf16>, vector<8x128xf32> -> vector<8x128xf32>
    %c0_79 = arith.constant 0 : index
    %c0_80 = arith.constant 0 : index
    %179 = vector.load %arg28[%c0_79, %c0_80] : memref<2x128xf32, #tpu.memory_space<vmem>>, vector<2x128xf32>
    %180 = vector.extract_strided_slice %179 {offsets = [0, 0], sizes = [1, 128], strides = [1, 1]} : vector<2x128xf32> to vector<1x128xf32>
    %181 = vector.broadcast %180 : vector<1x128xf32> to vector<8x128xf32>
    %182 = arith.mulf %178, %181 : vector<8x128xf32>
    %183 = vector.extract_strided_slice %179 {offsets = [1, 0], sizes = [1, 128], strides = [1, 1]} : vector<2x128xf32> to vector<1x128xf32>
    %184 = vector.broadcast %183 : vector<1x128xf32> to vector<8x128xf32>
    %185 = arith.addf %182, %184 : vector<8x128xf32>
    %186 = vector.shape_cast %185 : vector<8x128xf32> to vector<1x8x128xf32>
    %c0_81 = arith.constant 0 : index
    %c0_82 = arith.constant 0 : index
    %c0_83 = arith.constant 0 : index
    %187 = vector.load %arg29[%c0_81, %c0_82, %c0_83] : memref<1x8x128xf32, #tpu.memory_space<vmem>>, vector<1x8x128xf32>
    tpu.vector_store %arg29[%c0_81, %c0_82, %c0_83], %186 {strides = array<i32>} : memref<1x8x128xf32, #tpu.memory_space<vmem>>, vector<1x8x128xf32>,
    return
  }
  func.func @transform_0(%arg0: i32) -> (i32, i32, i32) {
    %c0_i32 = arith.constant 0 : i32
    %c0_i32_0 = arith.constant 0 : i32
    %c0_i32_1 = arith.constant 0 : i32
    return %arg0, %c0_i32, %c0_i32_0 : i32, i32, i32
  }
  func.func @transform_1(%arg0: i32) -> (i32, i32) {
    %c0_i32 = arith.constant 0 : i32
    %c0_i32_0 = arith.constant 0 : i32
    %c0_i32_1 = arith.constant 0 : i32
    return %c0_i32, %c0_i32_0 : i32, i32
  }
  func.func @transform_2(%arg0: i32) -> (i32, i32) {
    %c0_i32 = arith.constant 0 : i32
    %c0_i32_0 = arith.constant 0 : i32
    %c0_i32_1 = arith.constant 0 : i32
    return %c0_i32, %c0_i32_0 : i32, i32
  }
  func.func @transform_3(%arg0: i32) -> (i32, i32) {
    %c0_i32 = arith.constant 0 : i32
    %c0_i32_0 = arith.constant 0 : i32
    %c0_i32_1 = arith.constant 0 : i32
    return %c0_i32, %c0_i32_0 : i32, i32
  }
  func.func @transform_4(%arg0: i32) -> (i32, i32) {
    %c0_i32 = arith.constant 0 : i32
    %c0_i32_0 = arith.constant 0 : i32
    %c0_i32_1 = arith.constant 0 : i32
    return %c0_i32, %c0_i32_0 : i32, i32
  }
  func.func @transform_5(%arg0: i32) -> (i32, i32) {
    %c0_i32 = arith.constant 0 : i32
    %c0_i32_0 = arith.constant 0 : i32
    %c0_i32_1 = arith.constant 0 : i32
    return %c0_i32, %c0_i32_0 : i32, i32
  }
  func.func @transform_6(%arg0: i32) -> (i32, i32) {
    %c0_i32 = arith.constant 0 : i32
    %c0_i32_0 = arith.constant 0 : i32
    %c0_i32_1 = arith.constant 0 : i32
    return %c0_i32, %c0_i32_0 : i32, i32
  }
  func.func @transform_7(%arg0: i32) -> (i32, i32) {
    %c0_i32 = arith.constant 0 : i32
    %c0_i32_0 = arith.constant 0 : i32
    %c0_i32_1 = arith.constant 0 : i32
    return %c0_i32, %c0_i32_0 : i32, i32
  }
  func.func @transform_8(%arg0: i32) -> (i32, i32) {
    %c0_i32 = arith.constant 0 : i32
    %c0_i32_0 = arith.constant 0 : i32
    %c0_i32_1 = arith.constant 0 : i32
    return %c0_i32, %c0_i32_0 : i32, i32
  }
  func.func @transform_9(%arg0: i32) -> (i32, i32) {
    %c0_i32 = arith.constant 0 : i32
    %c0_i32_0 = arith.constant 0 : i32
    %c0_i32_1 = arith.constant 0 : i32
    return %c0_i32, %c0_i32_0 : i32, i32
  }
  func.func @transform_10(%arg0: i32) -> (i32, i32) {
    %c0_i32 = arith.constant 0 : i32
    %c0_i32_0 = arith.constant 0 : i32
    %c0_i32_1 = arith.constant 0 : i32
    return %c0_i32, %c0_i32_0 : i32, i32
  }
  func.func @transform_11(%arg0: i32) -> (i32, i32) {
    %c0_i32 = arith.constant 0 : i32
    %c0_i32_0 = arith.constant 0 : i32
    %c0_i32_1 = arith.constant 0 : i32
    return %c0_i32, %c0_i32_0 : i32, i32
  }
  func.func @transform_12(%arg0: i32) -> (i32, i32) {
    %c0_i32 = arith.constant 0 : i32
    %c0_i32_0 = arith.constant 0 : i32
    %c0_i32_1 = arith.constant 0 : i32
    return %c0_i32, %c0_i32_0 : i32, i32
  }
  func.func @transform_13(%arg0: i32) -> (i32, i32) {
    %c0_i32 = arith.constant 0 : i32
    %c0_i32_0 = arith.constant 0 : i32
    %c0_i32_1 = arith.constant 0 : i32
    return %c0_i32, %c0_i32_0 : i32, i32
  }
  func.func @transform_14(%arg0: i32) -> (i32, i32) {
    %c0_i32 = arith.constant 0 : i32
    %c0_i32_0 = arith.constant 0 : i32
    %c0_i32_1 = arith.constant 0 : i32
    return %c0_i32, %c0_i32_0 : i32, i32
  }
  func.func @transform_15(%arg0: i32) -> (i32, i32) {
    %c0_i32 = arith.constant 0 : i32
    %c0_i32_0 = arith.constant 0 : i32
    %c0_i32_1 = arith.constant 0 : i32
    return %c0_i32, %c0_i32_0 : i32, i32
  }
  func.func @transform_16(%arg0: i32) -> (i32, i32) {
    %c0_i32 = arith.constant 0 : i32
    %c0_i32_0 = arith.constant 0 : i32
    %c0_i32_1 = arith.constant 0 : i32
    return %c0_i32, %c0_i32_0 : i32, i32
  }
  func.func @transform_17(%arg0: i32) -> (i32, i32) {
    %c0_i32 = arith.constant 0 : i32
    %c0_i32_0 = arith.constant 0 : i32
    %c0_i32_1 = arith.constant 0 : i32
    return %c0_i32, %c0_i32_0 : i32, i32
  }
  func.func @transform_18(%arg0: i32) -> (i32, i32) {
    %c0_i32 = arith.constant 0 : i32
    %c0_i32_0 = arith.constant 0 : i32
    %c0_i32_1 = arith.constant 0 : i32
    return %c0_i32, %c0_i32_0 : i32, i32
  }
  func.func @transform_19(%arg0: i32) -> (i32, i32) {
    %c0_i32 = arith.constant 0 : i32
    %c0_i32_0 = arith.constant 0 : i32
    %c0_i32_1 = arith.constant 0 : i32
    return %c0_i32, %c0_i32_0 : i32, i32
  }
  func.func @transform_20(%arg0: i32) -> (i32, i32) {
    %c0_i32 = arith.constant 0 : i32
    %c0_i32_0 = arith.constant 0 : i32
    %c0_i32_1 = arith.constant 0 : i32
    return %c0_i32, %c0_i32_0 : i32, i32
  }
  func.func @transform_21(%arg0: i32) -> (i32, i32) {
    %c0_i32 = arith.constant 0 : i32
    %c0_i32_0 = arith.constant 0 : i32
    %c0_i32_1 = arith.constant 0 : i32
    return %c0_i32, %c0_i32_0 : i32, i32
  }
  func.func @transform_22(%arg0: i32) -> (i32, i32) {
    %c0_i32 = arith.constant 0 : i32
    %c0_i32_0 = arith.constant 0 : i32
    %c0_i32_1 = arith.constant 0 : i32
    return %c0_i32, %c0_i32_0 : i32, i32
  }
  func.func @transform_23(%arg0: i32) -> (i32, i32) {
    %c0_i32 = arith.constant 0 : i32
    %c0_i32_0 = arith.constant 0 : i32
    %c0_i32_1 = arith.constant 0 : i32
    return %c0_i32, %c0_i32_0 : i32, i32
  }
  func.func @transform_24(%arg0: i32) -> (i32, i32) {
    %c0_i32 = arith.constant 0 : i32
    %c0_i32_0 = arith.constant 0 : i32
    %c0_i32_1 = arith.constant 0 : i32
    return %c0_i32, %c0_i32_0 : i32, i32
  }
  func.func @transform_25(%arg0: i32) -> (i32, i32) {
    %c0_i32 = arith.constant 0 : i32
    %c0_i32_0 = arith.constant 0 : i32
    %c0_i32_1 = arith.constant 0 : i32
    return %c0_i32, %c0_i32_0 : i32, i32
  }
  func.func @transform_26(%arg0: i32) -> (i32, i32) {
    %c0_i32 = arith.constant 0 : i32
    %c0_i32_0 = arith.constant 0 : i32
    %c0_i32_1 = arith.constant 0 : i32
    return %c0_i32, %c0_i32_0 : i32, i32
  }
  func.func @transform_27(%arg0: i32) -> (i32, i32) {
    %c0_i32 = arith.constant 0 : i32
    %c0_i32_0 = arith.constant 0 : i32
    %c0_i32_1 = arith.constant 0 : i32
    return %c0_i32, %c0_i32_0 : i32, i32
  }
  func.func @transform_28(%arg0: i32) -> (i32, i32, i32) {
    %c0_i32 = arith.constant 0 : i32
    %c0_i32_0 = arith.constant 0 : i32
    %c0_i32_1 = arith.constant 0 : i32
    return %arg0, %c0_i32, %c0_i32_0 : i32, i32, i32
  }
}

</mosaic_0001>

<bundles_post_ra>
// kernel: simple_cnn_forward.1
= control target key start
LH: loop header
LB: loop body
LE: loop exit
PB: predicated region body
PF: predicated region fallthrough
CT: control target
= control target key end

     0   :  { %s10264_s0 = inlined_call_operand.vmem [shape: bf16[2,64,128], index: 0, kind: input, shape index: {}]   ;;  %s10265_s1 = inlined_call_operand.vmem [shape: bf16[192,64], index: 1, kind: input, shape index: {}]   ;;  %s10266_s2 = inlined_call_operand.vmem [shape: bf16[120,32], index: 2, kind: input, shape index: {}]   ;;  %s10267_s3 = inlined_call_operand.vmem [shape: bf16[56,24], index: 3, kind: input, shape index: {}]   ;;  %s10268_s4 = inlined_call_operand.vmem [shape: bf16[56,8], index: 4, kind: input, shape index: {}]   ;;  %s10269_s5 = inlined_call_operand.vmem [shape: bf16[56,8], index: 5, kind: input, shape index: {}]   ;;  %s10270_s6 = inlined_call_operand.vmem [shape: bf16[16,8], index: 6, kind: input, shape index: {}]   ;;  %s10271_s7 = inlined_call_operand.vmem [shape: bf16[56,8], index: 7, kind: input, shape index: {}]   ;;  %s10272_s8 = inlined_call_operand.vmem [shape: bf16[24,8], index: 8, kind: input, shape index: {}]   ;;  %s10273_s9 = inlined_call_operand.vmem [shape: bf16[8,8], index: 9, kind: input, shape index: {}]   ;;  %s10274_s10 = inlined_call_operand.hbm [shape: bf16[768,256], index: 10, kind: input, shape index: {}]   ;;  %s10275_s11 = inlined_call_operand.vmem [shape: bf16[1280,128], index: 11, kind: input, shape index: {}]   ;;  %s10276_s12 = inlined_call_operand.hbm [shape: bf16[896,128], index: 12, kind: input, shape index: {}]   ;;  %s10277_s13 = inlined_call_operand.hbm [shape: bf16[896,128], index: 13, kind: input, shape index: {}]   ;;  %s10278_s14 = inlined_call_operand.hbm [shape: bf16[896,128], index: 14, kind: input, shape index: {}]   ;;  %s10279_s15 = inlined_call_operand.hbm [shape: bf16[256,128], index: 15, kind: input, shape index: {}]   ;;  %s10280_s16 = inlined_call_operand.hbm [shape: bf16[896,128], index: 16, kind: input, shape index: {}]   ;;  %s10281_s17 = inlined_call_operand.hbm [shape: bf16[384,256], index: 17, kind: input, shape index: {}]   ;;  %s10282_s18 = inlined_call_operand.hbm [shape: bf16[256,128], index: 18, kind: input, shape index: {}]   ;;  %s10283_s19 = inlined_call_operand.vmem [shape: f32[2,256], index: 19, kind: input, shape index: {}]   ;;  %s10284_s20 = inlined_call_operand.vmem [shape: f32[2,128], index: 20, kind: input, shape index: {}]   ;;  %s10285_s21 = inlined_call_operand.vmem [shape: f32[2,128], index: 21, kind: input, shape index: {}]   ;;  %s10286_s22 = inlined_call_operand.vmem [shape: f32[2,128], index: 22, kind: input, shape index: {}]   ;;  %s10287_s23 = inlined_call_operand.vmem [shape: f32[2,128], index: 23, kind: input, shape index: {}]   ;;  %s10288_s24 = inlined_call_operand.vmem [shape: f32[2,128], index: 24, kind: input, shape index: {}]   ;;  %s10289_s25 = inlined_call_operand.vmem [shape: f32[2,128], index: 25, kind: input, shape index: {}]   ;;  %s10290_s26 = inlined_call_operand.vmem [shape: f32[2,256], index: 26, kind: input, shape index: {}]   ;;  %s10291_s27 = inlined_call_operand.vmem [shape: f32[2,128], index: 27, kind: input, shape index: {}]   ;;  %s10292_s28 = inlined_call_operand.vmem [shape: f32[2,8,128], index: 28, kind: output, shape index: {}]  }
   0x1   :  { %10307 = sst [smem:[#allocation21_spill]] %s10264_s0 }
   0x2   :  { %10308 = sst [smem:[#allocation22_spill]] %s10265_s1 }
   0x3   :  { %10309 = sst [smem:[#allocation23_spill]] %s10266_s2 }
   0x4   :  { %10310 = sst [smem:[#allocation24_spill]] %s10267_s3 }
   0x5   :  { %10311 = sst [smem:[#allocation25_spill]] %s10268_s4 }
   0x6   :  { %10312 = sst [smem:[#allocation26_spill]] %s10269_s5 }
   0x7   :  { %10313 = sst [smem:[#allocation27_spill]] %s10270_s6 }
   0x8   :  { %10314 = sst [smem:[#allocation28_spill]] %s10271_s7 }
   0x9   :  { %10315 = sst [smem:[#allocation29_spill]] %s10272_s8 }
   0xa   :  { %10316 = sst [smem:[#allocation30_spill]] %s10273_s9 }
   0xb   :  { %10317 = sst [smem:[#allocation31_spill]] %s10274_s10 }
   0xc   :  { %10318 = sst [smem:[#allocation32_spill]] %s10275_s11 }
   0xd   :  { %10319 = sst [smem:[#allocation33_spill]] %s10276_s12 }
   0xe   :  { %10320 = sst [smem:[#allocation34_spill]] %s10278_s14 }
   0xf   :  { %33 = vsyncpa [#allocation3], 0 }
  0x10   :  { %34 = vsyncpa [#allocation5], 0 }
  0x11   :  { %35 = vsyncpa [#allocation8], 0 }
  0x12   :  { %36 = vsyncpa [#allocation11], 0 }
  0x13   :  { %37 = vsyncpa [#allocation14], 0  ;;  %s9561_s8 = smov 0  }
  0x14 LB: > { %10321 = sst [smem:[#allocation20_spill]] %s9399_s8  ;;  %s9401_s5 = smov [#allocation4]   ;;  %s9399_s8 = sphi %s9561_s8, %s43_s8  }
  0x15   : > { %s722_s9 = sshll.u32 %s9401_s5, 4  ;;  %s9567_s30 = sadd.s32 4294967295, %s9399_s8   ;;  %s723_s9 = int_to_ptr.vmem [resolvable:$true] %s722_s9 }
  0x16   : > { %p7188_p0 = scmp.ge.s32.totalorder %s9399_s8, 1  ;;  %p667_p1 = scmp.lt.s32.totalorder %s9399_s8, 3 }
  0x17   : > { %p8531_p2 = scmp.eq.s32.totalorder %s9567_s30, 0  ;;  %s9402_s6 = smov [#allocation7]  }
  0x18   : > { %p9572_p3 = pnand %p7188_p0, %p667_p1  ;;  %s748_s10 = sshll.u32 %s9402_s6, 4  ;;  %s9578_s10 = int_to_ptr.vmem [resolvable:$true] %s748_s10 }
  0x19   : > { %s9403_s11 = smov [#allocation10]   ;;  %s9404_s2 = smov [#allocation2]  }
  0x1a   : > { %p8506_p4 = pneg %p9572_p3  ;;  %s774_s29 = sshll.u32 %s9403_s11, 4  ;;  %s9586_s29 = int_to_ptr.vmem [resolvable:$true] %s774_s29 }
  0x1b   : > { %s9588_s7 = sshll.u32 %s9404_s2, 4  ;;  %s9176_s1 = scalar_lea.vmem %s723_s9, 7168  ;;  %s707_s7 = int_to_ptr.vmem [resolvable:$true] %s9588_s7 }
  0x1c   : > { %p9582_p5 = pnand %p8531_p2, %p8506_p4  ;;  %p9177_p7 = scmp.ne.s32.totalorder %s723_s9, %s9176_s1 }
  0x1d   : > { %p9184_p10 = scmp.lt.s32.totalorder %s723_s9, %s723_s9  ;;  %p9185_p11 = scmp.lt.s32.totalorder %s9176_s1, %s9176_s1 }
  0x1e   : > { %p9592_p6 = pneg %p9582_p5 }
  0x1f   : > { %p9186_p12 = por %p9185_p11, %p9184_p10 }
  0x20   : > { %p9179_p8 = pnand %p9177_p7, %p9592_p6 }
  0x22   : > { %p9180_p9 = pneg %p9179_p8 }
  0x24   : > { %p9187_p13 = pnand %p9186_p12, %p9180_p9 }
  0x26   : > { %9190 = shalt.err (!%p9187_p13)
}
  0x27   : > { %s10302_s4 = smov 64   ;;  %s10304_s5 = smov 4  }
  0x28   : > { %s10325_s2 = sld [smem:[#allocation33_spill]]  ;;  %s9202_s8 = scalar_lea.vmem %s9578_s10, 7168 }
  0x29   : > { %p9203_p0 = scmp.ne.s32.totalorder %s9578_s10, %s9202_s8  ;;  %p9210_p7 = scmp.lt.s32.totalorder %s9578_s10, %s9578_s10 }
  0x2a   : > { %p9211_p8 = scmp.lt.s32.totalorder %s9202_s8, %s9202_s8 }
  0x2b   : > { %p9205_p1 = pnand %p9203_p0, %p9592_p6 }
  0x2c   : > { %p9212_p9 = por %p9211_p8, %p9210_p7 }
  0x2d   : > { %p9206_p4 = pneg %p9205_p1 }
  0x2e   : > { %8512 = dma.hbm_to_vmem [thread:$0]  (!%p9582_p5), %s10325_s2, 7168, %s723_s9, [#allocation5], %s10302_s4, %s10302_s4, %s10304_s5  }
  0x2f   : > { %p9213_p10 = pnand %p9212_p9, %p9206_p4 }
  0x31   : > { %9216 = shalt.err (!%p9213_p10)
}
  0x32   : > { %s10326_s14 = sld [smem:[#allocation34_spill]]  ;;  %s9228_s9 = scalar_lea.vmem %s9586_s29, 7168 }
  0x33   : > { %p9229_p11 = scmp.ne.s32.totalorder %s9586_s29, %s9228_s9  ;;  %p9236_p0 = scmp.lt.s32.totalorder %s9586_s29, %s9586_s29 }
  0x34   : > { %p9237_p1 = scmp.lt.s32.totalorder %s9228_s9, %s9228_s9 }
  0x35   : > { %p9231_p12 = pnand %p9229_p11, %p9592_p6 }
  0x36   : > { %p9238_p4 = por %p9237_p1, %p9236_p0 }
  0x37   : > { %p9232_p13 = pneg %p9231_p12 }
  0x38   : > { %8518 = dma.hbm_to_vmem [thread:$0]  (!%p9582_p5), %s10326_s14, 7168, %s9578_s10, [#allocation8], %s10302_s4, %s10302_s4, %s10304_s5  }
  0x39   : > { %p9239_p7 = pnand %p9238_p4, %p9232_p13 }
  0x3b   : > { %9242 = shalt.err (!%p9239_p7)
}
  0x3c   : > { %8524 = dma.hbm_to_vmem [thread:$0]  (!%p9582_p5), %s10280_s16, 7168, %s9586_s29, [#allocation11], %s10302_s4, %s10302_s4, %s10304_s5  }
  0x3d   : > { %s9254_s10 = scalar_lea.vmem %s707_s7, 12288  ;;  %p9262_p11 = scmp.lt.s32.totalorder %s707_s7, %s707_s7 }
  0x3e   : > { %p9255_p8 = scmp.ne.s32.totalorder %s707_s7, %s9254_s10  ;;  %p9263_p12 = scmp.lt.s32.totalorder %s9254_s10, %s9254_s10 }
  0x40   : > { %p9257_p9 = pnand %p9255_p8, %p9592_p6  ;;  %p9264_p13 = por %p9263_p12, %p9262_p11 }
  0x42   : > { %p9258_p10 = pneg %p9257_p9 }
  0x44   : > { %p9265_p0 = pnand %p9264_p13, %p9258_p10 }
  0x46   : > { %9268 = shalt.err (!%p9265_p0)
}
  0x47   : > { %s10306_s2 = smov 128   ;;  %s9408_s1 = smov 8  }
  0x48   : > { %s10327_s9 = sld [smem:[#allocation31_spill]]  ;;  %s9409_s8 = smov [#allocation6]  }
  0x49   : > { %s735_s11 = sshll.u32 %s9409_s8, 4  ;;  %s9410_s4 = smov [#allocation9]   ;;  %s736_s11 = int_to_ptr.vmem [resolvable:$true] %s735_s11 }
  0x4a   : > { %s761_s10 = sshll.u32 %s9410_s4, 4  ;;  %s9280_s5 = scalar_lea.vmem %s736_s11, 7168  ;;  %s762_s10 = int_to_ptr.vmem [resolvable:$true] %s761_s10 }
  0x4b   : > { %p9281_p1 = scmp.ne.s32.totalorder %s736_s11, %s9280_s5  ;;  %p9288_p8 = scmp.lt.s32.totalorder %s736_s11, %s736_s11 }
  0x4c   : > { %p9289_p9 = scmp.lt.s32.totalorder %s9280_s5, %s9280_s5 }
  0x4d   : > { %p9283_p4 = pnand %p9281_p1, %p9592_p6 }
  0x4e   : > { %8509 = dma.hbm_to_vmem [thread:$0]  (!%p9582_p5), %s10327_s9, 12288, %s707_s7, [#allocation3], %s10306_s2, %s10306_s2, %s9408_s1  }
  0x4f   : > { %p9284_p7 = pneg %p9283_p4  ;;  %p9290_p10 = por %p9289_p9, %p9288_p8 }
  0x51   : > { %p9291_p11 = pnand %p9290_p10, %p9284_p7 }
  0x53   : > { %9294 = shalt.err (!%p9291_p11)
}
  0x54   : > { %s10328_s14 = smov 4   ;;  %s10329_s29 = smov 64  }
  0x55   : > { %8515 = dma.hbm_to_vmem [thread:$0]  (!%p9582_p5), %s10277_s13, 7168, %s736_s11, [#allocation5], %s10329_s29, %s10329_s29, %s10328_s14  }
  0x56   : > { %s9306_s4 = scalar_lea.vmem %s762_s10, 2048  ;;  %p9314_p1 = scmp.lt.s32.totalorder %s762_s10, %s762_s10 }
  0x57   : > { %p9307_p12 = scmp.ne.s32.totalorder %s762_s10, %s9306_s4  ;;  %p9315_p4 = scmp.lt.s32.totalorder %s9306_s4, %s9306_s4 }
  0x59   : > { %p9309_p13 = pnand %p9307_p12, %p9592_p6  ;;  %p9316_p7 = por %p9315_p4, %p9314_p1 }
  0x5b   : > { %p9310_p0 = pneg %p9309_p13 }
  0x5d   : > { %p9317_p8 = pnand %p9316_p7, %p9310_p0 }
  0x5f   : > { %9320 = shalt.err (!%p9317_p8)
}
  0x60   : > { %8521 = dma.hbm_to_vmem [thread:$0]  (!%p9582_p5), %s10279_s15, 2048, %s762_s10, [#allocation8], %s10329_s29, %s10329_s29, %s10328_s14  }
  0x61   : > { %s9411_s8 = smov [#allocation12]   ;;  %s9412_s7 = smov [#allocation13]  }
  0x62   : > { %s787_s11 = sshll.u32 %s9411_s8, 4  ;;  %s800_s6 = sshll.u32 %s9412_s7, 4  ;;  %s788_s11 = int_to_ptr.vmem [resolvable:$true] %s787_s11  ;;  %s801_s6 = int_to_ptr.vmem [resolvable:$true] %s800_s6 }
  0x63   : > { %s9332_s2 = scalar_lea.vmem %s788_s11, 6144  ;;  %p9340_p12 = scmp.lt.s32.totalorder %s788_s11, %s788_s11 }
  0x64   : > { %p9333_p9 = scmp.ne.s32.totalorder %s788_s11, %s9332_s2  ;;  %p9341_p13 = scmp.lt.s32.totalorder %s9332_s2, %s9332_s2 }
  0x66   : > { %p9335_p10 = pnand %p9333_p9, %p9592_p6  ;;  %p9342_p0 = por %p9341_p13, %p9340_p12 }
  0x68   : > { %p9336_p11 = pneg %p9335_p10 }
  0x6a   : > { %p9343_p1 = pnand %p9342_p0, %p9336_p11 }
  0x6c   : > { %9346 = shalt.err (!%p9343_p1)
}
  0x6d   : > { %s10330_s4 = smov 128   ;;  %s9358_s9 = scalar_lea.vmem %s801_s6, 2048 }
  0x6e   : > { %8527 = dma.hbm_to_vmem [thread:$0]  (!%p9582_p5), %s10281_s17, 6144, %s788_s11, [#allocation11], %s10330_s4, %s10330_s4, %s9408_s1  }
  0x6f   : > { %p9359_p4 = scmp.ne.s32.totalorder %s801_s6, %s9358_s9  ;;  %p9366_p9 = scmp.lt.s32.totalorder %s801_s6, %s801_s6 }
  0x70   : > { %p9367_p10 = scmp.lt.s32.totalorder %s9358_s9, %s9358_s9 }
  0x71   : > { %p9361_p7 = pnand %p9359_p4, %p9592_p6 }
  0x72   : > { %p9368_p11 = por %p9367_p10, %p9366_p9 }
  0x73   : > { %p9362_p8 = pneg %p9361_p7 }
  0x75   : > { %p9369_p12 = pnand %p9368_p11, %p9362_p8 }
  0x77   : > { %9372 = shalt.err (!%p9369_p12)
}
  0x78   : > { %8530 = dma.hbm_to_vmem [thread:$0]  (!%p9582_p5), %s10282_s18, 2048, %s801_s6, [#allocation14], %s10329_s29, %s10329_s29, %s10328_s14  }
  0x79   : > { %851 = sbr.rel (%p9572_p3) target bundleno = 4155 (0x103b), region = 132 }
  0x7e   : > { %9378 = dma.done.wait (%p8531_p2), [#allocation3], 12288  }
  0x7f   : > { %9380 = vsyncadd (%p8531_p2), [#allocation3], 4294955008 }
  0x80   : > { %9382 = dma.done.wait (%p8531_p2), [#allocation5], 14336  }
  0x81   : > { %9384 = vsyncadd (%p8531_p2), [#allocation5], 4294952960 }
  0x82   : > { %9386 = dma.done.wait (%p8531_p2), [#allocation8], 9216  }
  0x83   : > { %9388 = vsyncadd (%p8531_p2), [#allocation8], 4294958080 }
  0x84   : > { %9390 = dma.done.wait (%p8531_p2), [#allocation11], 13312  }
  0x85   : > { %9392 = vsyncadd (%p8531_p2), [#allocation11], 4294953984 }
  0x86   : > { %9394 = dma.done.wait (%p8531_p2), [#allocation14], 2048  }
  0x87   : > { %9396 = vsyncadd (%p8531_p2), [#allocation14], 4294965248  ;;  %p952_p3 = scmp.lt.s32.totalorder %s9567_s30, 1  ;;  %s10331_s12 = sld [smem:[#allocation21_spill]]  ;;  %vm1078_vm0 = vcmask 523264   ;;  %vm2110_vm1 = vcmask 261120  }
  0x88   : > { %s10332_s7 = sld [smem:[#allocation22_spill]]  ;;  %v8586_v7 = vld [vmem:[#allocation2 + $0x74] ss:$8 sps:$4 sm:$0xff]   ;;  %v8588_v8 = vld [vmem:[#allocation2 + $0x70] ss:$8 sps:$4 sm:$0xff]   ;;  %vm3191_vm2 = vcmask 195584  }
  0x89   : > { %s10345_s30 = smov (!%p952_p3, %s9567_s30), 1  ;;  %1832 = vmatprep.subr.bf16.mxu1 %v8586_v7  ;;  %v8589_v9 = vld [vmem:[#allocation2 + $0x64] ss:$8 sps:$4 sm:$0xff]   ;;  %v8591_v10 = vld [vmem:[#allocation2 + $0x60] ss:$8 sps:$4 sm:$0xff]   ;;  %s10334_s6 = sld [smem:[#allocation23_spill]] }
  0x8a   : > { %s7776_s14 = sshll.u32 %s10345_s30, 5  ;;  %1833 = vmatpush1.bf16.msra.mxu1 %v8588_v8  ;;  %v8592_v11 = vld [vmem:[#allocation2 + $0x54] ss:$8 sps:$4 sm:$0xff]   ;;  %v8594_v14 = vld [vmem:[#allocation2 + $0x50] ss:$8 sps:$4 sm:$0xff]   ;;  %vm3204_vm3 = vcmask 1043456  }
  0x8b   : > { %1834 = vmatprep.subr.bf16.mxu1 %v8589_v9  ;;  %v8595_v15 = vld [vmem:[#allocation2 + $0x44] ss:$8 sps:$4 sm:$0xff]   ;;  %v8603_v16 = vld [vmem:[#allocation2 + $0x174] ss:$8 sps:$4 sm:$0xff]   ;;  %v8601_v17 = vld [vmem:[#allocation2 + $0x170] ss:$8 sps:$4 sm:$0xff]  }
  0x8c   : > { %v8609_v18 = vld [vmem:[#allocation2 + $0x164] ss:$8 sps:$4 sm:$0xff]   ;;  %v8597_v19 = vld [vmem:[#allocation2 + $0x40] ss:$8 sps:$4 sm:$0xff]   ;;  %v8598_v20 = vld [vmem:[#allocation2 + $0x34] ss:$8 sps:$4 sm:$0xff]  }
  0x8d   : > { %s956_s1 = scalar_lea.vmem %s10331_s12, %s7776_s14  ;;  %v8607_v21 = vld [vmem:[#allocation2 + $0x160] ss:$8 sps:$4 sm:$0xff]   ;;  %v8615_v22 = vld [vmem:[#allocation2 + $0x154] ss:$8 sps:$4 sm:$0xff]   ;;  %v8600_v25 = vld [vmem:[#allocation2 + $0x30] ss:$8 sps:$4 sm:$0xff]  }
  0x8e   : > { %v8570_v0 = vld [vmem:[%s956_s1 + $0x18] sm:$0xff]   ;;  %v8571_v1 = vld [vmem:[%s956_s1 + $0x10] sm:$0xff]   ;;  %v8572_v2 = vld [vmem:[%s956_s1 + $0x8] sm:$0xff]   ;;  %1835 = vmatpush1.bf16.msra.mxu1 %v8591_v10  ;;  %s10333_s12 = sld [smem:[#allocation32_spill]]  ;;  %vm9415_vm4 = vmmov 0   ;;  %vm3925_vm5 = vcmask 64512  }
  0x8f   : > { %8303 = vmatprep.subr.bf16.mxu0 %v8570_v0  ;;  %v8574_v3 = vld [vmem:[%s10332_s7] sm:$0xff]   ;;  %v8575_v5 = vld [vmem:[%s10332_s7 + $0x8] sm:$0xff]   ;;  %v8576_v6 = vld [vmem:[%s10332_s7 + $0x10] sm:$0xff]   ;;  %1836 = vmatprep.subr.bf16.mxu1 %v8592_v11  ;;  %s10335_s14 = sld [smem:[#allocation24_spill]]  ;;  %s7209_s5 = sshll.u32 %s10345_s30, 3 }
  0x90   : > { %8304 = vmatpush3.bf16.msra.mxu0 %v8570_v0  ;;  %8311 = vmatprep.mubr.msk.bf16.mxu0 %vm1078_vm0, %v8574_v3  ;;  %v8573_v4 = vld [vmem:[%s956_s1] sm:$0xff]   ;;  %v8577_v12 = vld [vmem:[%s10332_s7 + $0x18] sm:$0xff]   ;;  %v8579_v23 = vld [vmem:[%s10332_s7 + $0x28] sm:$0xff]   ;;  %s10336_s8 = sld [smem:[#allocation25_spill]]  ;;  %s960_s29 = scalar_lea.vmem %s10292_s28, %s7209_s5 }
  0x91   : > { %8305 = vmatprep.subr.bf16.mxu0 %v8571_v1  ;;  %v8578_v13 = vld [vmem:[%s10332_s7 + $0x20] sm:$0xff]   ;;  %v8580_v24 = vld [vmem:[%s10332_s7 + $0x30] sm:$0xff]   ;;  %v8581_v33 = vld [vmem:[%s10332_s7 + $0x38] sm:$0xff]   ;;  %s10338_s0 = sld [smem:[#allocation26_spill]] }
  0x92   : > { %1837 = vmatpush1.bf16.msra.mxu1 %v8594_v14  ;;  %v8604_v26 = vld [vmem:[#allocation2 + $0x24] ss:$8 sps:$4 sm:$0xff]   ;;  %v8613_v27 = vld [vmem:[#allocation2 + $0x150] ss:$8 sps:$4 sm:$0xff]   ;;  %v8606_v29 = vld [vmem:[#allocation2 + $0x20] ss:$8 sps:$4 sm:$0xff]  }
  0x93   : > { %1838 = vmatprep.subr.bf16.mxu1 %v8595_v15  ;;  %v8621_v28 = vld [vmem:[#allocation2 + $0x144] ss:$8 sps:$4 sm:$0xff]   ;;  %v8610_v30 = vld [vmem:[#allocation2 + $0x14] ss:$8 sps:$4 sm:$0xff]   ;;  %v8619_v31 = vld [vmem:[#allocation2 + $0x140] ss:$8 sps:$4 sm:$0xff]  }
  0x94   : > { %8306 = vmatpush3.bf16.msra.mxu0 %v8571_v1  ;;  %v8627_v32 = vld [vmem:[#allocation2 + $0x134] ss:$8 sps:$4 sm:$0xff]   ;;  %v8582_v34 = vld [vmem:[%s10332_s7 + $0x40] sm:$0xff]   ;;  %v8612_v35 = vld [vmem:[#allocation2 + $0x10] ss:$8 sps:$4 sm:$0xff]   ;;  %s10339_s4 = sld [smem:[#allocation27_spill]] }
  0x95   : > { %8307 = vmatprep.subr.bf16.mxu0 %v8572_v2  ;;  %v8616_v36 = vld [vmem:[#allocation2 + $0x4] ss:$8 sps:$4 sm:$0xff]   ;;  %v8625_v37 = vld [vmem:[#allocation2 + $0x130] ss:$8 sps:$4 sm:$0xff]   ;;  %v8618_v38 = vld [vmem:[#allocation2] ss:$8 sps:$4 sm:$0xff]  }
  0x96   : > { %1839 = vmatpush1.bf16.msra.mxu1 %v8597_v19  ;;  %v8633_v39 = vld [vmem:[#allocation2 + $0x124] ss:$8 sps:$4 sm:$0xff]   ;;  %v8622_v40 = vld [vmem:[#allocation2 + $0xf4] ss:$8 sps:$4 sm:$0xff]   ;;  %v8631_v41 = vld [vmem:[#allocation2 + $0x120] ss:$8 sps:$4 sm:$0xff]   ;;  %s10337_s3 = smov %s10336_s8 }
  0x97   : > { %1840 = vmatprep.subr.bf16.mxu1 %v8598_v20  ;;  %v8639_v42 = vld [vmem:[#allocation2 + $0x114] ss:$8 sps:$4 sm:$0xff]   ;;  %v8583_v43 = vld [vmem:[%s10332_s7 + $0x48] sm:$0xff]   ;;  %v8624_v45 = vld [vmem:[#allocation2 + $0xf0] ss:$8 sps:$4 sm:$0xff]   ;;  %s10340_s9 = sld [smem:[#allocation28_spill]] }
  0x98   : > { %8308 = vmatpush3.bf16.msra.mxu0 %v8572_v2  ;;  %v8584_v44 = vld [vmem:[%s10332_s7 + $0x50] sm:$0xff]   ;;  %v8628_v46 = vld [vmem:[#allocation2 + $0xe4] ss:$8 sps:$4 sm:$0xff]   ;;  %v8630_v49 = vld [vmem:[#allocation2 + $0xe0] ss:$8 sps:$4 sm:$0xff]   ;;  %s10341_s1 = sld [smem:[#allocation29_spill]] }
  0x99   : > { %8309 = vmatprep.subr.bf16.mxu0 %v8573_v4  ;;  %v8637_v47 = vld [vmem:[#allocation2 + $0x110] ss:$8 sps:$4 sm:$0xff]   ;;  %v8645_v48 = vld [vmem:[#allocation2 + $0x104] ss:$8 sps:$4 sm:$0xff]   ;;  %v8634_v50 = vld [vmem:[#allocation2 + $0xd4] ss:$8 sps:$4 sm:$0xff]  }
  0x9a   : > { %1841 = vmatpush1.bf16.msra.mxu1 %v8600_v25  ;;  %v8643_v51 = vld [vmem:[#allocation2 + $0x100] ss:$8 sps:$4 sm:$0xff]   ;;  %v8585_v52 = vld [vmem:[%s10332_s7 + $0x58] sm:$0xff]   ;;  %v8640_v54 = vld [vmem:[#allocation2 + $0xc4] ss:$8 sps:$4 sm:$0xff]   ;;  %s10342_s11 = sld [smem:[#allocation30_spill]] }
  0x9b   : > { %1842 = vmatprep.subr.bf16.mxu1 %v8604_v26  ;;  %v8636_v53 = vld [vmem:[#allocation2 + $0xd0] ss:$8 sps:$4 sm:$0xff]   ;;  %v8642_v55 = vld [vmem:[#allocation2 + $0xc0] ss:$8 sps:$4 sm:$0xff]   ;;  %v8646_v56 = vld [vmem:[#allocation2 + $0xb4] ss:$8 sps:$4 sm:$0xff]  }
  0x9c   : > { %8310 = vmatpush3.bf16.msra.mxu0 %v8573_v4  ;;  %v8648_v57 = vld [vmem:[#allocation2 + $0xb0] ss:$8 sps:$4 sm:$0xff]   ;;  %v8651_v58 = vld [vmem:[#allocation2 + $0x1f4] ss:$8 sps:$4 sm:$0xff]   ;;  %v8652_v60 = vld [vmem:[#allocation2 + $0xa4] ss:$8 sps:$4 sm:$0xff]  }
  0x9d   : > { %1885 = vmatprep.subr.bf16.mxu0 %v8603_v16  ;;  %v8649_v59 = vld [vmem:[#allocation2 + $0x1f0] ss:$8 sps:$4 sm:$0xff]   ;;  %v8654_v61 = vld [vmem:[#allocation2 + $0xa0] ss:$8 sps:$4 sm:$0xff]   ;;  %v8657_v62 = vld [vmem:[#allocation2 + $0x1e4] ss:$8 sps:$4 sm:$0xff]  }
  0x9e   : > { %1843 = vmatpush1.bf16.msra.mxu1 %v8606_v29  ;;  %v8655_v63 = vld [vmem:[#allocation2 + $0x1e0] ss:$8 sps:$4 sm:$0xff]   ;;  %v8658_v0 = vld [vmem:[#allocation2 + $0x94] ss:$8 sps:$4 sm:$0xff]   ;;  %v8660_v1 = vld [vmem:[#allocation2 + $0x90] ss:$8 sps:$4 sm:$0xff]  }
  0x9f   : > { %8312 = vmatmul.mubr.msk.bf16.vlgmr.msra.gmra.mxu0 %vm1078_vm0, %v8575_v5  ;;  %1844 = vmatprep.subr.bf16.mxu1 %v8610_v30  ;;  %v8663_v2 = vld [vmem:[#allocation2 + $0x1d4] ss:$8 sps:$4 sm:$0xff]   ;;  %v8661_v3 = vld [vmem:[#allocation2 + $0x1d0] ss:$8 sps:$4 sm:$0xff]   ;;  %v8664_v4 = vld [vmem:[#allocation2 + $0x84] ss:$8 sps:$4 sm:$0xff]  }
  0xa0   : > { %8315 = vmatprep.mubr.msk.bf16.mxu0 %vm1078_vm0, %v8576_v6  ;;  %1886 = vmatpush1.bf16.msra.mxu0 %v8601_v17  ;;  %v8666_v5 = vld [vmem:[#allocation2 + $0x80] ss:$8 sps:$4 sm:$0xff]   ;;  %v8669_v6 = vld [vmem:[#allocation2 + $0x1c4] ss:$8 sps:$4 sm:$0xff]   ;;  %v8672_v8 = vld [vmem:[#allocation2 + $0x274] ss:$8 sps:$4 sm:$0xff]  }
  0xa1   : > { %1887 = vmatprep.subr.bf16.mxu0 %v8609_v18  ;;  %v8667_v7 = vld [vmem:[#allocation2 + $0x1c0] ss:$8 sps:$4 sm:$0xff]   ;;  %v8675_v9 = vld [vmem:[#allocation2 + $0x1b4] ss:$8 sps:$4 sm:$0xff]   ;;  %v8673_v10 = vld [vmem:[#allocation2 + $0x1b0] ss:$8 sps:$4 sm:$0xff]  }
  0xa2   : > { %1845 = vmatpush1.bf16.msra.mxu1 %v8612_v35  ;;  %v8681_v11 = vld [vmem:[#allocation2 + $0x1a4] ss:$8 sps:$4 sm:$0xff]   ;;  %v8685_v14 = vld [vmem:[#allocation2 + $0x190] ss:$8 sps:$4 sm:$0xff]   ;;  %v8691_v16 = vld [vmem:[#allocation2 + $0x180] ss:$8 sps:$4 sm:$0xff]  }
  0xa3   : > { %1846 = vmatprep.subr.bf16.mxu1 %v8616_v36  ;;  %v8693_v15 = vld [vmem:[#allocation2 + $0x184] ss:$8 sps:$4 sm:$0xff]   ;;  %v8682_v35 = vld [vmem:[#allocation2 + $0x250] ss:$8 sps:$4 sm:$0xff]  }
  0xa4   : > { %1888 = vmatpush1.bf16.msra.mxu0 %v8607_v21  ;;  %v8678_v26 = vld [vmem:[#allocation2 + $0x264] ss:$8 sps:$4 sm:$0xff]  }
  0xa5   : > { %1889 = vmatprep.subr.bf16.mxu0 %v8615_v22 }
  0xa6   : > { %1847 = vmatpush1.bf16.msra.mxu1 %v8618_v38 }
  0xa7   : > { %8316 = vmatmul.mubr.msk.bf16.gmra.mxu0 %vm1078_vm0, %v8577_v12  ;;  %1848 = vmatprep.subr.bf16.mxu1 %v8622_v40  ;;  %v8679_v12 = vld [vmem:[#allocation2 + $0x1a0] ss:$8 sps:$4 sm:$0xff]  }
  0xa8   : > { %8319 = vmatprep.mubr.msk.bf16.mxu0 %vm1078_vm0, %v8578_v13  ;;  %1890 = vmatpush1.bf16.msra.mxu0 %v8613_v27  ;;  %v8687_v13 = vld [vmem:[#allocation2 + $0x194] ss:$8 sps:$4 sm:$0xff]   ;;  %v8688_v40 = vld [vmem:[#allocation2 + $0x240] ss:$8 sps:$4 sm:$0xff]  }
  0xa9   : > { %1891 = vmatprep.subr.bf16.mxu0 %v8621_v28 }
  0xaa   : > { %1849 = vmatpush2.bf16.msra.mxu1 %v8624_v45 }
  0xab   : > { %1850 = vmatprep.subr.bf16.mxu1 %v8628_v46 }
  0xac   : > { %1892 = vmatpush1.bf16.msra.mxu0 %v8619_v31  ;;  %v8676_v31 = vld [vmem:[#allocation2 + $0x260] ss:$8 sps:$4 sm:$0xff]  }
  0xad   : > { %1893 = vmatprep.subr.bf16.mxu0 %v8627_v32 }
  0xae   : > { %1851 = vmatpush2.bf16.msra.mxu1 %v8630_v49 }
  0xaf   : > { %8320 = vmatmul.mubr.msk.bf16.gmra.mxu0 %vm1078_vm0, %v8579_v23  ;;  %1852 = vmatprep.subr.bf16.mxu1 %v8634_v50 }
  0xb0   : > { %8323 = vmatprep.mubr.msk.bf16.mxu0 %vm1078_vm0, %v8580_v24  ;;  %1894 = vmatpush1.bf16.msra.mxu0 %v8625_v37  ;;  %v8670_v24 = vld [vmem:[#allocation2 + $0x270] ss:$8 sps:$4 sm:$0xff]   ;;  %v8690_v37 = vld [vmem:[#allocation2 + $0x244] ss:$8 sps:$4 sm:$0xff]  }
  0xb1   : > { %1895 = vmatprep.subr.bf16.mxu0 %v8633_v39 }
  0xb2   : > { %1853 = vmatpush2.bf16.msra.mxu1 %v8636_v53 }
  0xb3   : > { %1854 = vmatprep.subr.bf16.mxu1 %v8640_v54 }
  0xb4   : > { %1896 = vmatpush1.bf16.msra.mxu0 %v8631_v41 }
  0xb5   : > { %1897 = vmatprep.subr.bf16.mxu0 %v8639_v42  ;;  %v8696_v42 = vld [vmem:[#allocation2 + $0x234] ss:$8 sps:$4 sm:$0xff]  }
  0xb6   : > { %1855 = vmatpush2.bf16.msra.mxu1 %v8642_v55  ;;  %v8700_v55 = vld [vmem:[#allocation2 + $0x210] ss:$8 sps:$4 sm:$0xff]  }
  0xb7   : > { %8324 = vmatmul.mubr.msk.bf16.gmra.mxu0 %vm1078_vm0, %v8581_v33  ;;  %1856 = vmatprep.subr.bf16.mxu1 %v8646_v56  ;;  %v8684_v33 = vld [vmem:[#allocation2 + $0x254] ss:$8 sps:$4 sm:$0xff]  }
  0xb8   : > { %8327 = vmatprep.mubr.msk.bf16.mxu0 %vm1078_vm0, %v8582_v34  ;;  %1898 = vmatpush1.bf16.msra.mxu0 %v8637_v47  ;;  %v8699_v47 = vld [vmem:[#allocation2 + $0x224] ss:$8 sps:$4 sm:$0xff]  }
  0xb9   : > { %1899 = vmatprep.subr.bf16.mxu0 %v8645_v48 }
  0xba   : > { %1857 = vmatpush2.bf16.msra.mxu1 %v8648_v57  ;;  %v8705_v57 = vld [vmem:[#allocation2 + $0x204] ss:$8 sps:$4 sm:$0xff]  }
  0xbb   : > { %1858 = vmatprep.subr.bf16.mxu1 %v8652_v60  ;;  %v8703_v60 = vld [vmem:[#allocation2 + $0x200] ss:$8 sps:$4 sm:$0xff]  }
  0xbc   : > { %1900 = vmatpush1.bf16.msra.mxu0 %v8643_v51  ;;  %v8697_v51 = vld [vmem:[#allocation2 + $0x220] ss:$8 sps:$4 sm:$0xff]  }
  0xbd   : > { %1901 = vmatprep.subr.bf16.mxu0 %v8651_v58 }
  0xbe   : > { %1859 = vmatpush2.bf16.msra.mxu1 %v8654_v61  ;;  %v8708_v61 = vld [vmem:[#allocation2 + $0x2f4] ss:$8 sps:$4 sm:$0xff]  }
  0xbf   : > { %8328 = vmatmul.mubr.msk.bf16.gmra.mxu0 %vm1078_vm0, %v8583_v43  ;;  %1860 = vmatprep.subr.bf16.mxu1 %v8658_v0  ;;  %v8706_v0 = vld [vmem:[#allocation2 + $0x2f0] ss:$8 sps:$4 sm:$0xff]  }
  0xc0   : > { %8331 = vmatprep.mubr.msk.bf16.mxu0 %vm1078_vm0, %v8584_v44  ;;  %1902 = vmatpush2.bf16.msra.mxu0 %v8649_v59  ;;  %v8694_v44 = vld [vmem:[#allocation2 + $0x230] ss:$8 sps:$4 sm:$0xff]  }
  0xc1   : > { %1903 = vmatprep.subr.bf16.mxu0 %v8657_v62 }
  0xc2   : > { %1861 = vmatpush2.bf16.msra.mxu1 %v8660_v1  ;;  %v8711_v1 = vld [vmem:[#allocation2 + $0x2e4] ss:$8 sps:$4 sm:$0xff]  }
  0xc3   : > { %1862 = vmatprep.subr.bf16.mxu1 %v8664_v4  ;;  %v8709_v4 = vld [vmem:[#allocation2 + $0x2e0] ss:$8 sps:$4 sm:$0xff]  }
  0xc4   : > { %1904 = vmatpush2.bf16.msra.mxu0 %v8655_v63 }
  0xc5   : > { %1905 = vmatprep.subr.bf16.mxu0 %v8663_v2 }
  0xc6   : > { %1863 = vmatpush2.bf16.msra.mxu1 %v8666_v5  ;;  %v8714_v5 = vld [vmem:[#allocation2 + $0x2d4] ss:$8 sps:$4 sm:$0xff]  }
  0xc7   : > { %8332 = vmatmul.mubr.msk.bf16.gmra.mxu0 %vm1078_vm0, %v8585_v52  ;;  %1938 = vmatprep.subr.bf16.mxu1 %v8672_v8  ;;  %v8702_v52 = vld [vmem:[#allocation2 + $0x214] ss:$8 sps:$4 sm:$0xff]   ;;  %v8715_v8 = vld [vmem:[#allocation2 + $0x2c0] ss:$8 sps:$4 sm:$0xff]  }
  0xc8   : > { %1906 = vmatpush2.bf16.msra.mxu0 %v8661_v3 }
  0xc9   : > { %1907 = vmatprep.subr.bf16.mxu0 %v8669_v6  ;;  %v8712_v6 = vld [vmem:[#allocation2 + $0x2d0] ss:$8 sps:$4 sm:$0xff]  }
  0xcc   : > { %1908 = vmatpush2.bf16.msra.mxu0 %v8667_v7  ;;  %v8717_v7 = vld [vmem:[#allocation2 + $0x2c4] ss:$8 sps:$4 sm:$0xff]  }
  0xcd   : > { %1909 = vmatprep.subr.bf16.mxu0 %v8675_v9  ;;  %v8720_v9 = vld [vmem:[#allocation2 + $0x2b4] ss:$8 sps:$4 sm:$0xff]  }
  0xd0   : > { %1910 = vmatpush2.bf16.msra.mxu0 %v8673_v10  ;;  %v8718_v10 = vld [vmem:[#allocation2 + $0x2b0] ss:$8 sps:$4 sm:$0xff]  }
  0xd1   : > { %1911 = vmatprep.subr.bf16.mxu0 %v8681_v11  ;;  %v8723_v11 = vld [vmem:[#allocation2 + $0x2a4] ss:$8 sps:$4 sm:$0xff]  }
  0xd4   : > { %1912 = vmatpush2.bf16.msra.mxu0 %v8679_v12  ;;  %v8721_v12 = vld [vmem:[#allocation2 + $0x2a0] ss:$8 sps:$4 sm:$0xff]  }
  0xd5   : > { %1913 = vmatprep.subr.bf16.mxu0 %v8687_v13  ;;  %v8726_v13 = vld [vmem:[#allocation2 + $0x294] ss:$8 sps:$4 sm:$0xff]  }
  0xd8   : > { %1914 = vmatpush2.bf16.msra.mxu0 %v8685_v14  ;;  %v8724_v14 = vld [vmem:[#allocation2 + $0x290] ss:$8 sps:$4 sm:$0xff]  }
  0xd9   : > { %1915 = vmatprep.subr.bf16.mxu0 %v8693_v15  ;;  %v8729_v15 = vld [vmem:[#allocation2 + $0x284] ss:$8 sps:$4 sm:$0xff]  }
  0xdc   : > { %1916 = vmatpush2.bf16.msra.mxu0 %v8691_v16  ;;  %v8727_v16 = vld [vmem:[#allocation2 + $0x280] ss:$8 sps:$4 sm:$0xff]  }
 0x15f   : > { %v8313_v17 = vpop.f32.mrf.mxu0 }
 0x161   : > { %v1149_v18 = vpop.f32.mrf.mxu0 }
 0x163   : > { %v8314_v19 = vpop.f32.mrf.mxu0 }
 0x164   : > { %v1250_v38 = vpack.c.bf16 %v8314_v19, %v8313_v17 }
 0x165   : > { %v1152_v20 = vpop.f32.mrf.mxu0 }
 0x166   : > { %v1244_v28 = vpack.c.bf16 %v1152_v20, %v1149_v18  ;;  %v9413_v20 = vmov 0  }
 0x167   : > { %v8317_v21 = vpop.f32.mrf.mxu0 }
 0x169   : > { %v1165_v22 = vpop.f32.mrf.mxu0 }
 0x16b   : > { %v8318_v23 = vpop.f32.mrf.mxu0 }
 0x16c   : > { %v1251_v30 = vpack.c.bf16 %v8318_v23, %v8317_v21  ;;  %v8748_v21 = vld [vmem:[%s10333_s12 + $0xf8] sm:$0xff]   ;;  %v8750_v23 = vld [vmem:[%s10333_s12 + $0xf0] sm:$0xff]  }
 0x16d   : > { %v1168_v25 = vpop.f32.mrf.mxu0 }
 0x16e   : > { %v1245_v27 = vpack.c.bf16 %v1168_v25, %v1165_v22  ;;  %v8749_v22 = vld [vmem:[%s10333_s12 + $0xb8] sm:$0xff]   ;;  %v8754_v25 = vld [vmem:[%s10333_s12 + $0xe8] sm:$0xff]  }
 0x16f   : > { %v8321_v29 = vpop.f32.mrf.mxu0 }
 0x170   : > { %1864 = vmatprep.mubr.bf16.mxu1 %v1245_v27  ;;  %v8755_v27 = vld [vmem:[%s10333_s12 + $0xa8] sm:$0xff]  }
 0x171   : > { %v1181_v32 = vpop.f32.mrf.mxu0  ;;  %1865 = vmatmul.mubr.bf16.vlgmr.msra.gmra.mxu1 %v1244_v28 }
 0x172   : > { %1939 = vmatpush1.bf16.msra.mxu1 %v8670_v24  ;;  %1874 = vmatprep.mubr.bf16.mxu1 %v1251_v30  ;;  %v8752_v24 = vld [vmem:[%s10333_s12 + $0xb0] sm:$0xff]  }
 0x173   : > { %v8322_v34 = vpop.f32.mrf.mxu0  ;;  %1940 = vmatprep.subr.bf16.mxu1 %v8678_v26 }
 0x174   : > { %v1252_v56 = vpack.c.bf16 %v8322_v34, %v8321_v29 }
 0x175   : > { %v1184_v36 = vpop.f32.mrf.mxu0 }
 0x176   : > { %1941 = vmatpush1.bf16.msra.mxu1 %v8676_v31  ;;  %v1246_v45 = vpack.c.bf16 %v1184_v36, %v1181_v32 }
 0x177   : > { %v8325_v39 = vpop.f32.mrf.mxu0  ;;  %1942 = vmatprep.subr.bf16.mxu1 %v8684_v33 }
 0x179   : > { %v1197_v41 = vpop.f32.mrf.mxu0  ;;  %1875 = vmatmul.mubr.bf16.gmra.mxu1 %v1250_v38  ;;  %v1993_v38 = vlaneseq }
 0x17a   : > { %1943 = vmatpush1.bf16.msra.mxu1 %v8682_v35 }
 0x17b   : > { %v8326_v43 = vpop.f32.mrf.mxu0  ;;  %1944 = vmatprep.subr.bf16.mxu1 %v8690_v37 }
 0x17c   : > { %v1253_v48 = vpack.c.bf16 %v8326_v43, %v8325_v39 }
 0x17d   : > { %v1200_v46 = vpop.f32.mrf.mxu0 }
 0x17e   : > { %v1247_v49 = vpack.c.bf16 %v1200_v46, %v1197_v41  ;;  %1945 = vmatpush1.bf16.msra.mxu1 %v8688_v40  ;;  %v9787_v41 = vshrl.u32 %v1993_v38, 7  ;;  %v1991_v46 = vld [vmem:[%s10283_s19] sm:$0xf] }
 0x17f   : > { %1946 = vmatprep.subr.bf16.mxu1 %v8696_v42  ;;  %v9765_v50 = vpop.f32.mrf.mxu0 }
 0x180   : > { %1917 = vmatprep.mubr.bf16.mxu0 %v1247_v49 }
 0x181   : > { %1918 = vmatmul.mubr.bf16.vlgmr.msra.gmra.mxu0 %v1246_v45  ;;  %v1213_v53 = vpop.f32.mrf.mxu0 }
 0x182   : > { %1947 = vmatpush1.bf16.msra.mxu1 %v8694_v44  ;;  %1927 = vmatprep.mubr.bf16.mxu0 %v1253_v48  ;;  %v9790_v44 = vsub.s32 0, %v9787_v41 }
 0x183   : > { %1948 = vmatprep.subr.bf16.mxu1 %v8699_v47  ;;  %v8330_v54 = vpop.f32.mrf.mxu0  ;;  %v1999_v47 = vsub.s32 2, %v9787_v41 }
 0x184   : > { %v1254_v19 = vpack.c.bf16 %v8330_v54, %v9765_v50  ;;  %v1996_v50 = vrot.slane %v1991_v46, %v9790_v44  ;;  %v2025_v54 = vsub.s32 3, %v9787_v41 }
 0x185   : > { %v1216_v58 = vpop.f32.mrf.mxu0 }
 0x186   : > { %1949 = vmatpush1.bf16.msra.mxu1 %v8697_v51  ;;  %v1248_v17 = vpack.c.bf16 %v1216_v58, %v1213_v53  ;;  %v2000_v53 = vrot.slane %v1991_v46, %v1999_v47 }
 0x187   : > { %1950 = vmatprep.subr.bf16.mxu1 %v8702_v52  ;;  %v8333_v59 = vpop.f32.mrf.mxu0 }
 0x189   : > { %1928 = vmatmul.mubr.bf16.gmra.mxu0 %v1252_v56  ;;  %v1229_v62 = vpop.f32.mrf.mxu0  ;;  %v9801_v56 = vsub.s32 1, %v9787_v41 }
 0x18a   : > { %1951 = vmatpush1.bf16.msra.mxu1 %v8700_v55  ;;  %2167 = vmatprep.mubr.bf16.mxu0 %v9413_v20 }
 0x18b   : > { %1952 = vmatprep.subr.bf16.mxu1 %v8705_v57  ;;  %v8334_v63 = vpop.f32.mrf.mxu0 }
 0x18c   : > { %v1255_v18 = vpack.c.bf16 %v8334_v63, %v8333_v59  ;;  %v2006_v63 = vrot.slane %v1996_v50, %v9790_v44 }
 0x18d   : > { %v1232_v2 = vpop.f32.mrf.mxu0 }
 0x18e   : > { %1953 = vmatpush1.bf16.msra.mxu1 %v8703_v60  ;;  %v1249_v3 = vpack.c.bf16 %v1232_v2, %v1229_v62 }
 0x18f   : > { %1954 = vmatprep.subr.bf16.mxu1 %v8708_v61 }
 0x190   : > { %1970 = vmatprep.mubr.bf16.mxu1 %v1249_v3  ;;  %v2010_v3 = vrot.slane %v2000_v53, %v9790_v44  ;;  %v8740_v53 = vld [vmem:[%s10333_s12 + $0x70] sm:$0xff]  }
 0x192   : > { %1955 = vmatpush2.bf16.msra.mxu1 %v8706_v0 }
 0x193   : > { %1956 = vmatprep.subr.bf16.mxu1 %v8711_v1 }
 0x196   : > { %1957 = vmatpush2.bf16.msra.mxu1 %v8709_v4  ;;  %v2026_v4 = vrot.slane %v1991_v46, %v2025_v54 }
 0x197   : > { %1958 = vmatprep.subr.bf16.mxu1 %v8714_v5 }
 0x19a   : > { %1959 = vmatpush2.bf16.msra.mxu1 %v8712_v6 }
 0x19b   : > { %1960 = vmatprep.subr.bf16.mxu1 %v8717_v7 }
 0x19e   : > { %1961 = vmatpush2.bf16.msra.mxu1 %v8715_v8  ;;  %v2022_v8 = vrot.slane %v1991_v46, %v9801_v56 }
 0x19f   : > { %1962 = vmatprep.subr.bf16.mxu1 %v8720_v9 }
 0x1a2   : > { %1963 = vmatpush2.bf16.msra.mxu1 %v8718_v10 }
 0x1a3   : > { %1964 = vmatprep.subr.bf16.mxu1 %v8723_v11 }
 0x1a6   : > { %1965 = vmatpush2.bf16.msra.mxu1 %v8721_v12 }
 0x1a7   : > { %1966 = vmatprep.subr.bf16.mxu1 %v8726_v13 }
 0x1aa   : > { %1967 = vmatpush2.bf16.msra.mxu1 %v8724_v14 }
 0x1ab   : > { %1968 = vmatprep.subr.bf16.mxu1 %v8729_v15 }
 0x1ae   : > { %1969 = vmatpush2.bf16.msra.mxu1 %v8727_v16 }
 0x1af   : > { %7821 = vmatprep.subr.bf16.mxu1 %v8748_v21 }
 0x1b1   : > { %1971 = vmatmul.mubr.bf16.vlgmr.msra.gmra.mxu1 %v1248_v17 }
 0x1b2   : > { %1980 = vmatprep.mubr.bf16.mxu1 %v1255_v18  ;;  %7822 = vmatpush3.bf16.msra.mxu1 %v8749_v22  ;;  %v2032_v22 = vrot.slane %v2022_v8, %v9801_v56  ;;  %v8756_v8 = vld [vmem:[%s10333_s12 + $0x48] sm:$0xff]  }
 0x1b3   : > { %7823 = vmatprep.subr.bf16.mxu1 %v8750_v23 }
 0x1b6   : > { %7824 = vmatpush3.bf16.msra.mxu1 %v8752_v24 }
 0x1b7   : > { %7825 = vmatprep.subr.bf16.mxu1 %v8754_v25 }
 0x1b9   : > { %1981 = vmatmul.mubr.bf16.gmra.mxu1 %v1254_v19  ;;  %v2036_v19 = vrot.slane %v2026_v4, %v9801_v56  ;;  %v8734_v4 = vld [vmem:[%s10334_s6 + $0x20] sm:$0xff]  }
 0x1ba   : > { %7826 = vmatpush3.bf16.msra.mxu1 %v8755_v27 }
 0x231   : > { %v1866_v26 = vpop.f32.mrf.mxu1 }
 0x233   : > { %v1868_v28 = vpop.f32.mrf.mxu1 }
 0x235   : > { %v1870_v29 = vpop.f32.mrf.mxu1 }
 0x237   : > { %v1872_v30 = vpop.f32.mrf.mxu1 }
 0x239   : > { %v1876_v32 = vpop.f32.mrf.mxu1 }
 0x23b   : > { %v1878_v34 = vpop.f32.mrf.mxu1 }
 0x23d   : > { %v1880_v36 = vpop.f32.mrf.mxu1 }
 0x23f   : > { %v1882_v39 = vpop.f32.mrf.mxu1 }
 0x241   : > { %v1919_v31 = vpop.f32.mrf.mxu0 }
 0x242   : > { %v1920_v6 = vadd.f32 %v1919_v31, %v1866_v26 }
 0x243   : > { %v1921_v33 = vpop.f32.mrf.mxu0 }
 0x244   : > { %v1922_v58 = vadd.f32 %v1921_v33, %v1868_v28 }
 0x245   : > { %v1923_v35 = vpop.f32.mrf.mxu0 }
 0x246   : > { %v1924_v61 = vadd.f32 %v1923_v35, %v1870_v29 }
 0x247   : > { %v1925_v37 = vpop.f32.mrf.mxu0 }
 0x248   : > { %v1926_v52 = vadd.f32 %v1925_v37, %v1872_v30 }
 0x249   : > { %v1929_v40 = vpop.f32.mrf.mxu0 }
 0x24a   : > { %v1930_v55 = vadd.f32 %v1929_v40, %v1876_v32 }
 0x24b   : > { %v1931_v43 = vpop.f32.mrf.mxu0 }
 0x24c   : > { %v1932_v59 = vadd.f32 %v1931_v43, %v1878_v34 }
 0x24d   : > { %v1933_v49 = vpop.f32.mrf.mxu0 }
 0x24e   : > { %v1934_v7 = vadd.f32 %v1933_v49, %v1880_v36  ;;  %v8738_v49 = vld [vmem:[%s10333_s12 + $0x78] sm:$0xff]  }
 0x24f   : > { %v1935_v62 = vpop.f32.mrf.mxu0 }
 0x250   : > { %v1936_v11 = vadd.f32 %v1935_v62, %v1882_v39  ;;  %v8746_v62 = vld [vmem:[%s10333_s12 + $0x58] sm:$0xff]  }
 0x271   : > { %v1972_v42 = vpop.f32.mrf.mxu1 }
 0x272   : > { %v1973_v14 = vadd.f32 %v1972_v42, %v1920_v6  ;;  %v8736_v6 = vld [vmem:[%s10334_s6 + $0x30] sm:$0xff]  }
 0x273   : > { %v1974_v45 = vpop.f32.mrf.mxu1 }
 0x274   : > { %v1975_v2 = vadd.f32 %v1974_v45, %v1922_v58  ;;  %v2011_v28 = vmul.f32 %v2006_v63, %v1973_v14  ;;  %v8731_v58 = vld [vmem:[%s10334_s6 + $0x8] sm:$0xff]   ;;  %v8762_v14 = vld [vmem:[%s10333_s12] sm:$0xff]  }
 0x275   : > { %v1976_v48 = vpop.f32.mrf.mxu1 }
 0x276   : > { %v1977_v9 = vadd.f32 %v1976_v48, %v1924_v61  ;;  %v2012_v18 = vmul.f32 %v2010_v3, %v1975_v2  ;;  %v2037_v38 = vadd.f32 %v2032_v22, %v2011_v28  ;;  %v8745_v61 = vld [vmem:[%s10333_s12 + $0x20] sm:$0xff]   ;;  %v8753_v2 = vld [vmem:[%s10333_s12 + $0x10] sm:$0xff]  }
 0x277   : > { %v1978_v51 = vpop.f32.mrf.mxu1 }
 0x278   : > { %v1979_v60 = vadd.f32 %v1978_v51, %v1926_v52  ;;  %v2013_v23 = vmul.f32 %v2006_v63, %v1977_v9  ;;  %v2038_v31 = vadd.f32 %v2036_v19, %v2012_v18  ;;  %v2045_v48 = vmax.f32 %v2037_v38, 0.0  ;;  %v8730_v51 = vld [vmem:[%s10334_s6] sm:$0xff]   ;;  %v8739_v52 = vld [vmem:[%s10333_s12 + $0x38] sm:$0xff]   ;;  %v8766_v18 = vld [vmem:[%s10333_s12 + $0x90] sm:$0xff]  }
 0x279   : > { %v1982_v57 = vpop.f32.mrf.mxu1  ;;  %v8757_v9 = vld [vmem:[%s10333_s12 + $0xe0] sm:$0xff]   ;;  %v8773_v38 = vld [vmem:[%s10333_s12 + $0x168] sm:$0xff]  }
 0x27a   : > { %v1983_v0 = vadd.f32 %v1982_v57, %v1930_v55  ;;  %v2014_v12 = vmul.f32 %v2010_v3, %v1979_v60  ;;  %v2039_v33 = vadd.f32 %v2032_v22, %v2013_v23  ;;  %v2046_v40 = vmax.f32 %v2038_v31, 0.0  ;;  %v8741_v55 = vld [vmem:[%s10333_s12 + $0x30] sm:$0xff]   ;;  %v8742_v57 = vld [vmem:[%s10333_s12 + $0x68] sm:$0xff]   ;;  %v8744_v60 = vld [vmem:[%s10333_s12 + $0x60] sm:$0xff]   ;;  %7827 = vmatprep.subr.bf16.mxu1 %v8757_v9 }
 0x27b   : > { %v1984_v1 = vpop.f32.mrf.mxu1  ;;  %v8774_v23 = vld [vmem:[%s10333_s12 + $0x80] sm:$0xff]   ;;  %v8790_v9 = vld [vmem:[%s10333_s12 + $0x108] sm:$0xff]  }
 0x27c   : > { %v1985_v5 = vadd.f32 %v1984_v1, %v1932_v59  ;;  %v2015_v15 = vmul.f32 %v2006_v63, %v1983_v0  ;;  %v2040_v25 = vadd.f32 %v2036_v19, %v2014_v12  ;;  %v2047_v43 = vmax.f32 %v2039_v33, 0.0  ;;  %v8743_v59 = vld [vmem:[%s10333_s12 + $0x28] sm:$0xff]   ;;  %v8747_v0 = vld [vmem:[%s10333_s12 + $0x18] sm:$0xff]   ;;  %v8751_v1 = vld [vmem:[%s10333_s12 + $0x50] sm:$0xff]  }
 0x27d   : > { %v1986_v10 = vpop.f32.mrf.mxu1  ;;  %v8760_v12 = vld [vmem:[%s10333_s12 + $0x40] sm:$0xff]   ;;  %v8769_v33 = vld [vmem:[%s10333_s12 + $0x170] sm:$0xff]  }
 0x27e   : > { %v2016_v13 = vmul.f32 %v2010_v3, %v1985_v5  ;;  %v1987_v16 = vadd.f32 %v1986_v10, %v1934_v7  ;;  %v2041_v29 = vadd.f32 %v2032_v22, %v2015_v15  ;;  %v2048_v35 = vmax.f32 %v2040_v25, 0.0  ;;  %v8735_v5 = vld [vmem:[%s10334_s6 + $0x28] sm:$0xff]   ;;  %v8737_v7 = vld [vmem:[%s10334_s6 + $0x38] ss:$0 sps:$4 sm:$0xff]  }
 0x27f   : > { %v1988_v17 = vpop.f32.mrf.mxu1  ;;  %v2053_v50 = vpack.c.bf16 %v2047_v43, %v2045_v48  ;;  %v8758_v10 = vld [vmem:[%s10333_s12 + $0x8] sm:$0xff]   ;;  %v8763_v15 = vld [vmem:[%s10333_s12 + $0x98] sm:$0xff]  }
 0x280   : > { %v1989_v21 = vadd.f32 %v1988_v17, %v1936_v11  ;;  %v2017_v24 = vmul.f32 %v2006_v63, %v1987_v16  ;;  %v2042_v26 = vadd.f32 %v2036_v19, %v2016_v13  ;;  %v2049_v39 = vmax.f32 %v2041_v29, 0.0  ;;  %v8732_v63 = vld [vmem:[%s10334_s6 + $0x10] sm:$0xff]   ;;  %v8759_v11 = vld [vmem:[%s10333_s12 + $0xa0] sm:$0xff]   ;;  %v8761_v13 = vld [vmem:[%s10333_s12 + $0xd8] sm:$0xff]  }
 0x281   : > { %v2054_v46 = vpack.c.bf16 %v2048_v35, %v2046_v40  ;;  %7828 = vmatpush3.bf16.msra.mxu1 %v8759_v11  ;;  %v8764_v16 = vld [vmem:[%s10333_s12 + $0xd0] sm:$0xff]   ;;  %v8765_v17 = vld [vmem:[%s10333_s12 + $0x178] sm:$0xff]  }
 0x282   : > { %v2018_v27 = vmul.f32 %v2010_v3, %v1989_v21  ;;  %v2043_v30 = vadd.f32 %v2032_v22, %v2017_v24  ;;  %v2050_v36 = vmax.f32 %v2042_v26, 0.0  ;;  %v8733_v3 = vld [vmem:[%s10334_s6 + $0x18] sm:$0xff]   ;;  %7829 = vmatprep.subr.bf16.mxu1 %v8761_v13  ;;  %v8770_v21 = vld [vmem:[%s10333_s12 + $0x88] sm:$0xff]   ;;  %v8772_v22 = vld [vmem:[%s10333_s12 + $0xc0] sm:$0xff]  }
 0x283   : > { %v8777_v24 = vld [vmem:[%s10333_s12 + $0x1f8] sm:$0xff]  }
 0x284   : > { %v2044_v32 = vadd.f32 %v2036_v19, %v2018_v27  ;;  %v2051_v34 = vmax.f32 %v2043_v30, 0.0  ;;  %v8768_v19 = vld [vmem:[%s10333_s12 + $0xc8] sm:$0xff]   ;;  %v8767_v30 = vld [vmem:[%s10333_s12 + $0x138] sm:$0xff]  }
 0x285   : > { %7830 = vmatpush3.bf16.msra.mxu1 %v8763_v15  ;;  %v8793_v13 = vld [vmem:[%s10333_s12 + $0x1d8] sm:$0xff]   ;;  %v8794_v15 = vld [vmem:[%s10333_s12 + $0x100] sm:$0xff]  }
 0x286   : > { %v2052_v37 = vmax.f32 %v2044_v32, 0.0  ;;  %v2055_v45 = vpack.c.bf16 %v2051_v34, %v2049_v39  ;;  %7831 = vmatprep.subr.bf16.mxu1 %v8764_v16  ;;  %v8795_v16 = vld [vmem:[%s10333_s12 + $0x198] sm:$0xff]  }
 0x288   : > { %v2056_v42 = vpack.c.bf16 %v2052_v37, %v2050_v36  ;;  %v8771_v36 = vld [vmem:[%s10333_s12 + $0x130] sm:$0xff]  }
 0x289   : > { %7832 = vmatpush3.bf16.msra.mxu1 %v8766_v18  ;;  %v8796_v18 = vld [vmem:[%s10333_s12 + $0x1d0] sm:$0xff]  }
 0x28a   : > { %2147 = vmatprep.subr.bf16.mxu0 %v2056_v42  ;;  %7833 = vmatprep.subr.bf16.mxu1 %v8768_v19  ;;  %v8775_v42 = vld [vmem:[%s10333_s12 + $0x128] sm:$0xff]   ;;  %v8797_v19 = vld [vmem:[%s10333_s12 + $0x278] sm:$0xff]  }
 0x28b   : > { %2148 = vmatpush1.bf16.msra.mxu0 %v2055_v45  ;;  %v8776_v45 = vld [vmem:[%s10333_s12 + $0x160] sm:$0xff]  }
 0x28c   : > { %2149 = vmatprep.subr.bf16.mxu0 %v2054_v46 }
 0x28d   : > { %7834 = vmatpush3.bf16.msra.mxu1 %v8770_v21 }
 0x28e   : > { %7835 = vmatprep.subr.bf16.mxu1 %v8772_v22  ;;  %v8798_v22 = vld [vmem:[%s10333_s12 + $0x190] sm:$0xff]  }
 0x28f   : > { %2150 = vmatpush1.bf16.msra.mxu0 %v2053_v50  ;;  %v8779_v50 = vld [vmem:[%s10333_s12 + $0x1b8] sm:$0xff]  }
 0x290   : > { %7793 = vmatprep.subr.bf16.mxu0 %v8738_v49  ;;  %v8778_v49 = vld [vmem:[%s10333_s12 + $0x120] sm:$0xff]  }
 0x291   : > { %7836 = vmatpush3.bf16.msra.mxu1 %v8774_v23  ;;  %v8799_v23 = vld [vmem:[%s10333_s12 + $0x238] sm:$0xff]  }
 0x292   : > { %7342 = vmatmul.mubr.msk.bf16.vlgmr.msra.gmra.mxu0 %vm2110_vm1, %v8730_v51  ;;  %7877 = vmatprep.subr.bf16.mxu1 %v8777_v24 }
 0x293   : > { %2177 = vmatprep.mubr.bf16.mxu0 %v9413_v20  ;;  %7794 = vmatpush3.bf16.msra.mxu0 %v8739_v52 }
 0x294   : > { %7795 = vmatprep.subr.bf16.mxu0 %v8740_v53  ;;  %v8780_v53 = vld [vmem:[%s10333_s12 + $0x158] sm:$0xff]  }
 0x297   : > { %7796 = vmatpush3.bf16.msra.mxu0 %v8741_v55  ;;  %v8781_v55 = vld [vmem:[%s10333_s12 + $0x1f0] sm:$0xff]  }
 0x298   : > { %7797 = vmatprep.subr.bf16.mxu0 %v8742_v57 }
 0x29a   : > { %7343 = vmatmul.mubr.msk.bf16.gmra.mxu0 %vm2110_vm1, %v8731_v58 }
 0x29b   : > { %2187 = vmatprep.mubr.bf16.mxu0 %v9413_v20  ;;  %7798 = vmatpush3.bf16.msra.mxu0 %v8743_v59  ;;  %v8782_v59 = vld [vmem:[%s10333_s12 + $0x118] sm:$0xff]  }
 0x29c   : > { %7799 = vmatprep.subr.bf16.mxu0 %v8744_v60  ;;  %v8783_v60 = vld [vmem:[%s10333_s12 + $0x1b0] sm:$0xff]  }
 0x29f   : > { %7800 = vmatpush3.bf16.msra.mxu0 %v8745_v61 }
 0x2a0   : > { %7801 = vmatprep.subr.bf16.mxu0 %v8746_v62  ;;  %v8784_v62 = vld [vmem:[%s10333_s12 + $0x150] sm:$0xff]  }
 0x2a2   : > { %7344 = vmatmul.mubr.msk.bf16.gmra.mxu0 %vm2110_vm1, %v8732_v63  ;;  %v8785_v63 = vld [vmem:[%s10333_s12 + $0x1e8] sm:$0xff]  }
 0x2a3   : > { %2197 = vmatprep.mubr.bf16.mxu0 %v9413_v20  ;;  %7802 = vmatpush3.bf16.msra.mxu0 %v8747_v0 }
 0x2a4   : > { %7803 = vmatprep.subr.bf16.mxu0 %v8751_v1  ;;  %v8786_v1 = vld [vmem:[%s10333_s12 + $0x110] sm:$0xff]  }
 0x2a7   : > { %7804 = vmatpush3.bf16.msra.mxu0 %v8753_v2  ;;  %v8787_v2 = vld [vmem:[%s10333_s12 + $0x1a8] sm:$0xff]  }
 0x2a8   : > { %7805 = vmatprep.subr.bf16.mxu0 %v8756_v8 }
 0x2aa   : > { %7345 = vmatmul.mubr.msk.bf16.gmra.mxu0 %vm2110_vm1, %v8733_v3 }
 0x2ab   : > { %2207 = vmatprep.mubr.bf16.mxu0 %v9413_v20  ;;  %7806 = vmatpush3.bf16.msra.mxu0 %v8758_v10  ;;  %v8791_v10 = vld [vmem:[%s10333_s12 + $0x1a0] sm:$0xff]  }
 0x2ac   : > { %7807 = vmatprep.subr.bf16.mxu0 %v8760_v12  ;;  %v8792_v12 = vld [vmem:[%s10333_s12 + $0x140] sm:$0xff]  }
 0x2af   : > { %7808 = vmatpush3.bf16.msra.mxu0 %v8762_v14 }
 0x2b0   : > { %7849 = vmatprep.subr.bf16.mxu0 %v8765_v17 }
 0x2b2   : > { %7346 = vmatmul.mubr.msk.bf16.gmra.mxu0 %vm2110_vm1, %v8734_v4 }
 0x2b3   : > { %2217 = vmatprep.mubr.bf16.mxu0 %v9413_v20 }
 0x2ba   : > { %7347 = vmatmul.mubr.msk.bf16.gmra.mxu0 %vm2110_vm1, %v8735_v5  ;;  %v8788_v5 = vld [vmem:[%s10333_s12 + $0x148] sm:$0xff]  }
 0x2bb   : > { %2227 = vmatprep.mubr.bf16.mxu0 %v9413_v20 }
 0x2c2   : > { %7348 = vmatmul.mubr.msk.bf16.gmra.mxu0 %vm2110_vm1, %v8736_v6  ;;  %v8789_v6 = vld [vmem:[%s10333_s12 + $0x1e0] sm:$0xff]  }
 0x2c3   : > { %2237 = vmatprep.mubr.bf16.mxu0 %v9413_v20 }
 0x2ca   : > { %7349 = vmatmul.mubr.msk.bf16.gmra.mxu0 %vm2110_vm1, %v8737_v7 }
 0x352   : > { %v2169_v25 = vpop.f32.mrf.mxu0 }
 0x354   : > { %v2171_v26 = vpop.f32.mrf.mxu0 }
 0x356   : > { %v2173_v27 = vpop.f32.mrf.mxu0 }
 0x357   : > { %v2246_v31 = vpack.c.bf16 %v2173_v27, %v2169_v25  ;;  %v8801_v27 = vld [vmem:[%s10333_s12 + $0x270] sm:$0xff]  }
 0x358   : > { %v2175_v28 = vpop.f32.mrf.mxu0 }
 0x359   : > { %v2247_v29 = vpack.c.bf16 %v2175_v28, %v2171_v26  ;;  %v8800_v26 = vld [vmem:[%s10333_s12 + $0x1c8] sm:$0xff]  }
 0x35a   : > { %v2179_v32 = vpop.f32.mrf.mxu0 }
 0x35b   : > { %2938 = vmatprep.mubr.bf16.mxu0 %v2247_v29  ;;  %v2256_v39 = vpack.c.bf16 %v2179_v32, %v2179_v32 }
 0x35c   : > { %v2181_v34 = vpop.f32.mrf.mxu0  ;;  %2939 = vmatmul.mubr.bf16.vlgmr.msra.gmra.mxu0 %v2246_v31  ;;  %v8803_v31 = vld [vmem:[%s10333_s12 + $0x230] sm:$0xff]  }
 0x35d   : > { %v2257_v35 = vpack.c.bf16 %v2181_v34, %v2181_v34  ;;  %7850 = vmatpush3.bf16.msra.mxu0 %v8767_v30  ;;  %v8802_v30 = vld [vmem:[%s10333_s12 + $0x188] sm:$0xff]  }
 0x35e   : > { %v2183_v37 = vpop.f32.mrf.mxu0  ;;  %7851 = vmatprep.subr.bf16.mxu0 %v8769_v33  ;;  %v8804_v33 = vld [vmem:[%s10333_s12 + $0x1c0] sm:$0xff]   ;;  %v8805_v34 = vld [vmem:[%s10333_s12 + $0x268] sm:$0xff]  }
 0x35f   : > { %2946 = vmatprep.mubr.bf16.mxu0 %v2257_v35 }
 0x360   : > { %v2185_v40 = vpop.f32.mrf.mxu0 }
 0x361   : > { %7852 = vmatpush3.bf16.msra.mxu0 %v8771_v36 }
 0x362   : > { %v2189_v43 = vpop.f32.mrf.mxu0  ;;  %7853 = vmatprep.subr.bf16.mxu0 %v8773_v38  ;;  %v8806_v38 = vld [vmem:[%s10333_s12 + $0x180] sm:$0xff]  }
 0x363   : > { %v2248_v51 = vpack.c.bf16 %v2189_v43, %v2183_v37 }
 0x364   : > { %v2191_v46 = vpop.f32.mrf.mxu0  ;;  %2947 = vmatmul.mubr.bf16.gmra.mxu0 %v2256_v39  ;;  %v8807_v39 = vld [vmem:[%s10333_s12 + $0x228] sm:$0xff]  }
 0x365   : > { %v2249_v48 = vpack.c.bf16 %v2191_v46, %v2185_v40  ;;  %7854 = vmatpush3.bf16.msra.mxu0 %v8775_v42  ;;  %v8808_v40 = vld [vmem:[%s10333_s12 + $0x260] sm:$0xff]  }
 0x366   : > { %7855 = vmatprep.subr.bf16.mxu0 %v8776_v45  ;;  %v2193_v52 = vpop.f32.mrf.mxu0  ;;  %v8809_v45 = vld [vmem:[%s10333_s12 + $0x220] sm:$0xff]  }
 0x367   : > { %2986 = vmatprep.mubr.bf16.mxu1 %v2249_v48  ;;  %v2258_v3 = vpack.c.bf16 %v2193_v52, %v2193_v52  ;;  %v8811_v52 = vld [vmem:[%s10333_s12 + $0x218] sm:$0xff]  }
 0x368   : > { %2987 = vmatmul.mubr.bf16.vlgmr.msra.gmra.mxu1 %v2248_v51  ;;  %v2195_v57 = vpop.f32.mrf.mxu0 }
 0x369   : > { %7856 = vmatpush3.bf16.msra.mxu0 %v8778_v49  ;;  %7878 = vmatpush3.bf16.msra.mxu1 %v8779_v50  ;;  %v2259_v58 = vpack.c.bf16 %v2195_v57, %v2195_v57  ;;  %v8810_v49 = vld [vmem:[%s10333_s12 + $0x258] sm:$0xff]  }
 0x36a   : > { %7857 = vmatprep.subr.bf16.mxu0 %v8780_v53  ;;  %7879 = vmatprep.subr.bf16.mxu1 %v8781_v55  ;;  %v2199_v61 = vpop.f32.mrf.mxu0  ;;  %v8812_v55 = vld [vmem:[%s10333_s12 + $0x250] sm:$0xff]  }
 0x36b   : > { %2994 = vmatprep.mubr.bf16.mxu1 %v2259_v58 }
 0x36c   : > { %v2201_v0 = vpop.f32.mrf.mxu0 }
 0x36d   : > { %7858 = vmatpush3.bf16.msra.mxu0 %v8782_v59  ;;  %7880 = vmatpush3.bf16.msra.mxu1 %v8783_v60  ;;  %v8813_v59 = vld [vmem:[%s10333_s12 + $0x210] sm:$0xff]  }
 0x36e   : > { %7859 = vmatprep.subr.bf16.mxu0 %v8784_v62  ;;  %7881 = vmatprep.subr.bf16.mxu1 %v8785_v63  ;;  %v2203_v4 = vpop.f32.mrf.mxu0 }
 0x36f   : > { %v2250_v24 = vpack.c.bf16 %v2203_v4, %v2199_v61  ;;  %v8814_v61 = vld [vmem:[%s10333_s12 + $0x248] sm:$0xff]  }
 0x370   : > { %2995 = vmatmul.mubr.bf16.gmra.mxu1 %v2258_v3  ;;  %v2205_v7 = vpop.f32.mrf.mxu0 }
 0x371   : > { %7860 = vmatpush3.bf16.msra.mxu0 %v8786_v1  ;;  %7882 = vmatpush3.bf16.msra.mxu1 %v8787_v2  ;;  %v2251_v8 = vpack.c.bf16 %v2205_v7, %v2201_v0  ;;  %v8815_v0 = vld [vmem:[%s10333_s12 + $0x208] sm:$0xff]   ;;  %v8816_v1 = vld [vmem:[%s10333_s12 + $0x240] sm:$0xff]   ;;  %v8822_v7 = vld [vmem:[#allocation4 + $0xf8] sm:$0xff]  }
 0x372   : > { %7861 = vmatprep.subr.bf16.mxu0 %v8788_v5  ;;  %7883 = vmatprep.subr.bf16.mxu1 %v8789_v6  ;;  %v2209_v11 = vpop.f32.mrf.mxu0  ;;  %v8817_v2 = vld [vmem:[%s10333_s12 + $0x200] sm:$0xff]  }
 0x373   : > { %3034 = vmatprep.mubr.bf16.mxu0 %v2251_v8  ;;  %v2260_v36 = vpack.c.bf16 %v2209_v11, %v2209_v11  ;;  %v8818_v6 = vld [vmem:[%s10335_s14] sm:$0xff]   ;;  %v8823_v8 = vld [vmem:[#allocation4 + $0xb8] sm:$0xff]   ;;  %v8830_v11 = vld [vmem:[#allocation4 + $0xe8] sm:$0xff]  }
 0x374   : > { %v2211_v14 = vpop.f32.mrf.mxu0 }
 0x375   : > { %7862 = vmatpush3.bf16.msra.mxu0 %v8790_v9  ;;  %7884 = vmatpush3.bf16.msra.mxu1 %v8791_v10  ;;  %v2261_v28 = vpack.c.bf16 %v2211_v14, %v2211_v14  ;;  %v8826_v9 = vld [vmem:[#allocation4 + $0xf0] sm:$0xff]   ;;  %v8835_v14 = vld [vmem:[#allocation4 + $0xa0] sm:$0xff]  }
 0x376   : > { %7863 = vmatprep.subr.bf16.mxu0 %v8792_v12  ;;  %7885 = vmatprep.subr.bf16.mxu1 %v8793_v13  ;;  %v2213_v17 = vpop.f32.mrf.mxu0  ;;  %v8827_v10 = vld [vmem:[#allocation4 + $0xb0] sm:$0xff]   ;;  %v8831_v12 = vld [vmem:[#allocation4 + $0xa8] sm:$0xff]   ;;  %v8834_v13 = vld [vmem:[#allocation4 + $0xe0] sm:$0xff]  }
 0x378   : > { %v2215_v21 = vpop.f32.mrf.mxu0 }
 0x379   : > { %7864 = vmatpush3.bf16.msra.mxu0 %v8794_v15  ;;  %7886 = vmatpush3.bf16.msra.mxu1 %v8795_v16  ;;  %v8838_v15 = vld [vmem:[#allocation4 + $0xd8] sm:$0xff]  }
 0x37a   : > { %7887 = vmatprep.subr.bf16.mxu1 %v8796_v18  ;;  %7905 = vmatprep.subr.bf16.mxu0 %v8797_v19  ;;  %v2219_v25 = vpop.f32.mrf.mxu0  ;;  %v8839_v16 = vld [vmem:[#allocation4 + $0x98] sm:$0xff]   ;;  %v8843_v18 = vld [vmem:[#allocation4 + $0x90] sm:$0xff]   ;;  %v8846_v19 = vld [vmem:[#allocation4 + $0xc8] sm:$0xff]  }
 0x37b   : > { %v2252_v48 = vpack.c.bf16 %v2219_v25, %v2213_v17  ;;  %v8842_v17 = vld [vmem:[#allocation4 + $0xd0] sm:$0xff]  }
 0x37c   : > { %3035 = vmatmul.mubr.bf16.vlgmr.msra.gmra.mxu0 %v2250_v24  ;;  %v2221_v29 = vpop.f32.mrf.mxu0 }
 0x37d   : > { %7888 = vmatpush3.bf16.msra.mxu1 %v8798_v22  ;;  %7906 = vmatpush3.bf16.msra.mxu0 %v8799_v23  ;;  %v2253_v32 = vpack.c.bf16 %v2221_v29, %v2215_v21 }
 0x37e   : > { %7889 = vmatprep.subr.bf16.mxu1 %v8800_v26  ;;  %7907 = vmatprep.subr.bf16.mxu0 %v8801_v27  ;;  %v2223_v35 = vpop.f32.mrf.mxu0 }
 0x37f   : > { %3042 = vmatprep.mubr.bf16.mxu0 %v2261_v28  ;;  %3082 = vmatprep.mubr.bf16.mxu1 %v2253_v32  ;;  %v2262_v60 = vpack.c.bf16 %v2223_v35, %v2223_v35 }
 0x380   : > { %v2225_v37 = vpop.f32.mrf.mxu0 }
 0x381   : > { %7890 = vmatpush3.bf16.msra.mxu1 %v8802_v30  ;;  %7908 = vmatpush3.bf16.msra.mxu0 %v8803_v31  ;;  %v2263_v46 = vpack.c.bf16 %v2225_v37, %v2225_v37 }
 0x382   : > { %7891 = vmatprep.subr.bf16.mxu1 %v8804_v33  ;;  %7909 = vmatprep.subr.bf16.mxu0 %v8805_v34  ;;  %v2229_v42 = vpop.f32.mrf.mxu0 }
 0x384   : > { %3043 = vmatmul.mubr.bf16.gmra.mxu0 %v2260_v36  ;;  %v2231_v43 = vpop.f32.mrf.mxu0 }
 0x385   : > { %7892 = vmatpush3.bf16.msra.mxu1 %v8806_v38  ;;  %7910 = vmatpush3.bf16.msra.mxu0 %v8807_v39 }
 0x386   : > { %7911 = vmatprep.subr.bf16.mxu0 %v8808_v40  ;;  %v2233_v50 = vpop.f32.mrf.mxu0 }
 0x387   : > { %v2254_v4 = vpack.c.bf16 %v2233_v50, %v2229_v42 }
 0x388   : > { %3083 = vmatmul.mubr.bf16.vlgmr.msra.gmra.mxu1 %v2252_v48  ;;  %v2235_v51 = vpop.f32.mrf.mxu0 }
 0x389   : > { %7912 = vmatpush3.bf16.msra.mxu0 %v8809_v45  ;;  %3090 = vmatprep.mubr.bf16.mxu1 %v2263_v46  ;;  %v2255_v53 = vpack.c.bf16 %v2235_v51, %v2231_v43 }
 0x38a   : > { %7913 = vmatprep.subr.bf16.mxu0 %v8810_v49  ;;  %v2239_v57 = vpop.f32.mrf.mxu0 }
 0x38b   : > { %3130 = vmatprep.mubr.bf16.mxu0 %v2255_v53  ;;  %v2264_v5 = vpack.c.bf16 %v2239_v57, %v2239_v57 }
 0x38c   : > { %v2241_v58 = vpop.f32.mrf.mxu0 }
 0x38d   : > { %7914 = vmatpush3.bf16.msra.mxu0 %v8811_v52  ;;  %v2265_v3 = vpack.c.bf16 %v2241_v58, %v2241_v58 }
 0x38e   : > { %7915 = vmatprep.subr.bf16.mxu0 %v8812_v55  ;;  %v2243_v62 = vpop.f32.mrf.mxu0 }
 0x390   : > { %3091 = vmatmul.mubr.bf16.gmra.mxu1 %v2262_v60  ;;  %v2244_v63 = vpop.f32.mrf.mxu0 }
 0x391   : > { %7916 = vmatpush3.bf16.msra.mxu0 %v8813_v59  ;;  %8339 = vmatprep.mubr.msk.bf16.mxu1 %vm3191_vm2, %v8818_v6 }
 0x392   : > { %7917 = vmatprep.subr.bf16.mxu0 %v8814_v61 }
 0x395   : > { %7918 = vmatpush3.bf16.msra.mxu0 %v8815_v0 }
 0x396   : > { %7919 = vmatprep.subr.bf16.mxu0 %v8816_v1  ;;  %v3146_v1 = vld [vmem:[%s10284_s20] sm:$0x3] }
 0x399   : > { %7920 = vmatpush3.bf16.msra.mxu0 %v8817_v2 }
 0x39a   : > { %7961 = vmatprep.subr.bf16.mxu0 %v8822_v7  ;;  %v3150_v7 = vrot.slane %v3146_v1, %v9790_v44 }
 0x39c   : > { %3131 = vmatmul.mubr.bf16.vlgmr.msra.gmra.mxu0 %v2254_v4 }
 0x39d   : > { %3138 = vmatprep.mubr.bf16.mxu0 %v2265_v3  ;;  %7962 = vmatpush3.bf16.msra.mxu0 %v8823_v8 }
 0x39e   : > { %7963 = vmatprep.subr.bf16.mxu0 %v8826_v9 }
 0x3a1   : > { %7964 = vmatpush3.bf16.msra.mxu0 %v8827_v10 }
 0x3a2   : > { %7965 = vmatprep.subr.bf16.mxu0 %v8830_v11 }
 0x3a4   : > { %3139 = vmatmul.mubr.bf16.gmra.mxu0 %v2264_v5 }
 0x3a5   : > { %7966 = vmatpush3.bf16.msra.mxu0 %v8831_v12 }
 0x3a6   : > { %7967 = vmatprep.subr.bf16.mxu0 %v8834_v13 }
 0x3a9   : > { %7968 = vmatpush3.bf16.msra.mxu0 %v8835_v14 }
 0x3aa   : > { %7969 = vmatprep.subr.bf16.mxu0 %v8838_v15 }
 0x3ad   : > { %7970 = vmatpush3.bf16.msra.mxu0 %v8839_v16 }
 0x3ae   : > { %7971 = vmatprep.subr.bf16.mxu0 %v8842_v17 }
 0x3b1   : > { %7972 = vmatpush3.bf16.msra.mxu0 %v8843_v18 }
 0x3b2   : > { %7973 = vmatprep.subr.bf16.mxu0 %v8846_v19  ;;  %v3157_v19 = vrot.slane %v3146_v1, %v9801_v56  ;;  %v8847_v1 = vld [vmem:[#allocation4 + $0x88] sm:$0xff]  }
 0x3b5   : > { %7974 = vmatpush3.bf16.msra.mxu0 %v8847_v1  ;;  %v8904_v1 = vld [vmem:[#allocation6 + $0x50] sm:$0xff]  }
 0x41c   : > { %v7809_v21 = vpop.f32.mrf.mxu0 }
 0x41e   : > { %v7810_v22 = vpop.f32.mrf.mxu0 }
 0x41f   : > { %v7811_v23 = vadd.f32 %v7810_v22, %v7809_v21 }
 0x420   : > { %v7812_v24 = vpop.f32.mrf.mxu0 }
 0x422   : > { %v7813_v25 = vpop.f32.mrf.mxu0 }
 0x423   : > { %v7814_v26 = vadd.f32 %v7813_v25, %v7812_v24 }
 0x424   : > { %v7815_v27 = vpop.f32.mrf.mxu0 }
 0x426   : > { %v7816_v28 = vpop.f32.mrf.mxu0 }
 0x427   : > { %v7817_v12 = vadd.f32 %v7816_v28, %v7815_v27 }
 0x428   : > { %v7818_v29 = vpop.f32.mrf.mxu0  ;;  %v7837_v30 = vpop.f32.mrf.mxu1 }
 0x42a   : > { %v7819_v31 = vpop.f32.mrf.mxu0  ;;  %v7838_v32 = vpop.f32.mrf.mxu1 }
 0x42b   : > { %v7839_v60 = vadd.f32 %v7838_v32, %v7837_v30 }
 0x42c   : > { %v7840_v33 = vpop.f32.mrf.mxu1 }
 0x42d   : > { %v2989_v62 = vadd.f32 %v7839_v60, %v7811_v23  ;;  %v8837_v60 = vld [vmem:[#allocation4 + $0x20] sm:$0xff]  }
 0x42e   : > { %v7841_v34 = vpop.f32.mrf.mxu1 }
 0x42f   : > { %v7842_v63 = vadd.f32 %v7841_v34, %v7840_v33 }
 0x430   : > { %v7843_v35 = vpop.f32.mrf.mxu1 }
 0x431   : > { %v2992_v8 = vadd.f32 %v7842_v63, %v7814_v26  ;;  %v8844_v63 = vld [vmem:[#allocation4 + $0x50] sm:$0xff]  }
 0x432   : > { %v7844_v36 = vpop.f32.mrf.mxu1 }
 0x433   : > { %v7845_v5 = vadd.f32 %v7844_v36, %v7843_v35 }
 0x434   : > { %v7846_v37 = vpop.f32.mrf.mxu1 }
 0x435   : > { %v2997_v17 = vadd.f32 %v7845_v5, %v7817_v12  ;;  %v8851_v5 = vld [vmem:[#allocation4 + $0x80] sm:$0xff]  }
 0x436   : > { %v7847_v38 = vpop.f32.mrf.mxu1 }
 0x43c   : > { %v7865_v39 = vpop.f32.mrf.mxu0 }
 0x43e   : > { %v7866_v40 = vpop.f32.mrf.mxu0 }
 0x43f   : > { %v7867_v61 = vadd.f32 %v7866_v40, %v7865_v39 }
 0x440   : > { %v7868_v42 = vpop.f32.mrf.mxu0 }
 0x441   : > { %v3037_v3 = vadd.f32 %v7867_v61, %v2989_v62  ;;  %v8840_v61 = vld [vmem:[#allocation4 + $0x58] sm:$0xff]  }
 0x442   : > { %v7869_v43 = vpop.f32.mrf.mxu0  ;;  %v8841_v62 = vld [vmem:[#allocation4 + $0x18] sm:$0xff]  }
 0x443   : > { %v7870_v4 = vadd.f32 %v7869_v43, %v7868_v42 }
 0x444   : > { %v7871_v45 = vpop.f32.mrf.mxu0 }
 0x445   : > { %v3040_v14 = vadd.f32 %v7870_v4, %v2992_v8  ;;  %v8850_v4 = vld [vmem:[#allocation4 + $0xc0] sm:$0xff]   ;;  %v9414_v8 = vmov 0.0  }
 0x446   : > { %v7872_v46 = vpop.f32.mrf.mxu0  ;;  %7975 = vmatprep.subr.bf16.mxu0 %v8850_v4 }
 0x447   : > { %v7873_v15 = vadd.f32 %v7872_v46, %v7871_v45  ;;  %7976 = vmatpush3.bf16.msra.mxu0 %v8851_v5 }
 0x448   : > { %v7874_v48 = vpop.f32.mrf.mxu0  ;;  %v7893_v49 = vpop.f32.mrf.mxu1  ;;  %8347 = vmatprep.subr.bf16.mxu0 %v9414_v8 }
 0x449   : > { %v3045_v29 = vadd.f32 %v7873_v15, %v2997_v17  ;;  %v8824_v48 = vld [vmem:[#allocation4 + $0x78] sm:$0xff]  }
 0x44a   : > { %v7875_v50 = vpop.f32.mrf.mxu0  ;;  %v7894_v51 = vpop.f32.mrf.mxu1 }
 0x44b   : > { %v7895_v0 = vadd.f32 %v7894_v51, %v7893_v49  ;;  %v8819_v49 = vld [vmem:[%s10335_s14 + $0x8] sm:$0xff]   ;;  %v8820_v50 = vld [vmem:[%s10335_s14 + $0x10] sm:$0xff]   ;;  %v8825_v51 = vld [vmem:[#allocation4 + $0x38] sm:$0xff]  }
 0x44c   : > { %v7896_v52 = vpop.f32.mrf.mxu1 }
 0x44d   : > { %v3085_v9 = vadd.f32 %v7895_v0, %v3037_v3  ;;  %v8845_v0 = vld [vmem:[#allocation4 + $0x10] sm:$0xff]   ;;  %v8849_v3 = vld [vmem:[#allocation4 + $0x8] sm:$0xff]  }
 0x44e   : > { %v7897_v53 = vpop.f32.mrf.mxu1 }
 0x44f   : > { %v7898_v10 = vadd.f32 %v7897_v53, %v7896_v52  ;;  %v8828_v52 = vld [vmem:[#allocation4 + $0x70] sm:$0xff]  }
 0x450   : > { %v7899_v55 = vpop.f32.mrf.mxu1  ;;  %v8829_v53 = vld [vmem:[#allocation4 + $0x30] sm:$0xff]  }
 0x451   : > { %v3088_v21 = vadd.f32 %v7898_v10, %v3040_v14  ;;  %v8854_v14 = vld [vmem:[#allocation4 + $0x1b8] sm:$0xff]  }
 0x452   : > { %v7900_v57 = vpop.f32.mrf.mxu1 }
 0x453   : > { %v7901_v22 = vadd.f32 %v7900_v57, %v7899_v55  ;;  %v8832_v55 = vld [vmem:[#allocation4 + $0x68] sm:$0xff]   ;;  %v8821_v57 = vld [vmem:[%s10335_s14 + $0x18] ss:$0 sps:$4 sm:$0xff]  }
 0x454   : > { %v7902_v58 = vpop.f32.mrf.mxu1 }
 0x455   : > { %v3093_v31 = vadd.f32 %v7901_v22, %v3045_v29  ;;  %v8833_v58 = vld [vmem:[#allocation4 + $0x28] sm:$0xff]  }
 0x456   : > { %v7903_v59 = vpop.f32.mrf.mxu1  ;;  %v8861_v29 = vld [vmem:[#allocation4 + $0x168] sm:$0xff]  }
 0x457   : > { %v8836_v59 = vld [vmem:[#allocation4 + $0x60] sm:$0xff]  }
 0x45c   : > { %v7921_v2 = vpop.f32.mrf.mxu0 }
 0x45e   : > { %v7922_v6 = vpop.f32.mrf.mxu0 }
 0x45f   : > { %v7923_v11 = vadd.f32 %v7922_v6, %v7921_v2  ;;  %v8848_v2 = vld [vmem:[#allocation4 + $0x48] sm:$0xff]   ;;  %v8852_v6 = vld [vmem:[#allocation4 + $0x40] sm:$0xff]  }
 0x460   : > { %v7924_v13 = vpop.f32.mrf.mxu0 }
 0x461   : > { %v3133_v16 = vadd.f32 %v7923_v11, %v3085_v9  ;;  %v8855_v9 = vld [vmem:[#allocation4 + $0x178] sm:$0xff]  }
 0x462   : > { %v7925_v18 = vpop.f32.mrf.mxu0 }
 0x463   : > { %v3151_v23 = vmul.f32 %v3150_v7, %v3133_v16  ;;  %v7926_v24 = vadd.f32 %v7925_v18, %v7924_v13  ;;  %v8856_v18 = vld [vmem:[#allocation4 + $0x138] sm:$0xff]  }
 0x464   : > { %v7927_v25 = vpop.f32.mrf.mxu0 }
 0x465   : > { %v3136_v30 = vadd.f32 %v7926_v24, %v3088_v21  ;;  %v3158_v27 = vadd.f32 %v3157_v19, %v3151_v23  ;;  %v8858_v21 = vld [vmem:[#allocation4 + $0x170] sm:$0xff]  }
 0x466   : > { %v7928_v26 = vpop.f32.mrf.mxu0  ;;  %v8857_v23 = vld [vmem:[#allocation4 + $0x1b0] sm:$0xff]  }
 0x467   : > { %v3152_v32 = vmul.f32 %v3150_v7, %v3136_v30  ;;  %v7929_v33 = vadd.f32 %v7928_v26, %v7927_v25  ;;  %v3161_v38 = vmax.f32 %v3158_v27, 0.0  ;;  %v8859_v25 = vld [vmem:[#allocation4 + $0x130] sm:$0xff]   ;;  %v8860_v26 = vld [vmem:[#allocation4 + $0x1a8] sm:$0xff]   ;;  %v8864_v27 = vld [vmem:[#allocation4 + $0x160] sm:$0xff]  }
 0x468   : > { %v7930_v28 = vpop.f32.mrf.mxu0 }
 0x469   : > { %v3141_v34 = vadd.f32 %v7929_v33, %v3093_v31  ;;  %v3159_v35 = vadd.f32 %v3157_v19, %v3152_v32  ;;  %v8862_v32 = vld [vmem:[#allocation4 + $0x128] sm:$0xff]   ;;  %v8863_v28 = vld [vmem:[#allocation4 + $0x1a0] sm:$0xff]  }
 0x46a   : > { %v7931_v36 = vpop.f32.mrf.mxu0 }
 0x46b   : > { %v3153_v37 = vmul.f32 %v3150_v7, %v3141_v34  ;;  %v3162_v39 = vmax.f32 %v3159_v35, 0.0  ;;  %v8853_v7 = vld [vmem:[#allocation4] sm:$0xff]   ;;  %v8867_v35 = vld [vmem:[#allocation4 + $0x158] sm:$0xff]  }
 0x46c   : > { %v8865_v34 = vld [vmem:[#allocation4 + $0x120] sm:$0xff]   ;;  %v8866_v36 = vld [vmem:[#allocation4 + $0x198] sm:$0xff]  }
 0x46d   : > { %v3160_v40 = vadd.f32 %v3157_v19, %v3153_v37  ;;  %v3164_v42 = vpack.c.bf16 %v3162_v39, %v3161_v38  ;;  %v8868_v37 = vld [vmem:[#allocation4 + $0x118] sm:$0xff]   ;;  %v8870_v38 = vld [vmem:[#allocation4 + $0x150] sm:$0xff]  }
 0x46e   : > { %v8869_v39 = vld [vmem:[#allocation4 + $0x190] sm:$0xff]  }
 0x46f   : > { %v3163_v43 = vmax.f32 %v3160_v40, 0.0  ;;  %v8871_v40 = vld [vmem:[#allocation4 + $0x110] sm:$0xff]  }
 0x471   : > { %v3165_v45 = vpack.c.bf16 %v3163_v43, %v3163_v43  ;;  %v8872_v43 = vld [vmem:[#allocation4 + $0x188] sm:$0xff]  }
 0x473   : > { %8469 = vmatprep.subr.msk.bf16.mxu1 %vm3204_vm3, %v3165_v45  ;;  %v3206_v46 = vsel %vm3204_vm3, %v3165_v45, 0  ;;  %v8874_v45 = vld [vmem:[#allocation4 + $0x108] sm:$0xff]  }
 0x474   : > { %8336 = vmatpush3.bf16.msra.mxu1 %v3206_v46  ;;  %v8876_v46 = vld [vmem:[#allocation4 + $0x140] sm:$0xff]  }
 0x475   : > { %8337 = vmatprep.subr.bf16.mxu1 %v3164_v42 }
 0x478   : > { %8338 = vmatpush3.bf16.msra.mxu1 %v3164_v42  ;;  %v8873_v42 = vld [vmem:[#allocation4 + $0x148] sm:$0xff]  }
 0x479   : > { %7939 = vmatprep.subr.bf16.mxu1 %v8824_v48  ;;  %v8875_v48 = vld [vmem:[#allocation4 + $0x180] sm:$0xff]  }
 0x47b   : > { %8340 = vmatmul.mubr.msk.bf16.vlgmr.msra.gmra.mxu1 %vm3191_vm2, %v8819_v49  ;;  %v8877_v49 = vld [vmem:[#allocation4 + $0x100] sm:$0xff]  }
 0x47c   : > { %8343 = vmatprep.mubr.msk.bf16.mxu1 %vm3191_vm2, %v8820_v50  ;;  %7940 = vmatpush3.bf16.msra.mxu1 %v8825_v51 }
 0x47d   : > { %7941 = vmatprep.subr.bf16.mxu1 %v8828_v52  ;;  %v8878_v52 = vld [vmem:[%s10336_s8] sm:$0xff]  }
 0x480   : > { %7942 = vmatpush3.bf16.msra.mxu1 %v8829_v53  ;;  %v8884_v53 = vld [vmem:[#allocation6 + $0x78] sm:$0xff]  }
 0x481   : > { %7943 = vmatprep.subr.bf16.mxu1 %v8832_v55  ;;  %v8885_v55 = vld [vmem:[#allocation6 + $0x38] sm:$0xff]  }
 0x483   : > { %8344 = vmatmul.mubr.msk.bf16.gmra.mxu1 %vm3191_vm2, %v8821_v57  ;;  %v8888_v57 = vld [vmem:[#allocation6 + $0x70] sm:$0xff]  }
 0x484   : > { %7944 = vmatpush3.bf16.msra.mxu1 %v8833_v58  ;;  %v8889_v58 = vld [vmem:[#allocation6 + $0x30] sm:$0xff]  }
 0x485   : > { %7945 = vmatprep.subr.bf16.mxu1 %v8836_v59  ;;  %v8892_v59 = vld [vmem:[#allocation6 + $0x68] sm:$0xff]  }
 0x488   : > { %7946 = vmatpush3.bf16.msra.mxu1 %v8837_v60  ;;  %v8893_v60 = vld [vmem:[#allocation6 + $0x28] sm:$0xff]  }
 0x489   : > { %7947 = vmatprep.subr.bf16.mxu1 %v8840_v61  ;;  %v8896_v61 = vld [vmem:[#allocation6 + $0x60] sm:$0xff]  }
 0x48c   : > { %7948 = vmatpush3.bf16.msra.mxu1 %v8841_v62  ;;  %v8897_v62 = vld [vmem:[#allocation6 + $0x20] sm:$0xff]  }
 0x48d   : > { %7949 = vmatprep.subr.bf16.mxu1 %v8844_v63  ;;  %v8900_v63 = vld [vmem:[#allocation6 + $0x58] sm:$0xff]  }
 0x490   : > { %7950 = vmatpush3.bf16.msra.mxu1 %v8845_v0  ;;  %v8901_v0 = vld [vmem:[#allocation6 + $0x18] sm:$0xff]  }
 0x491   : > { %7951 = vmatprep.subr.bf16.mxu1 %v8848_v2  ;;  %v8905_v2 = vld [vmem:[#allocation6 + $0x10] sm:$0xff]  }
 0x494   : > { %7952 = vmatpush3.bf16.msra.mxu1 %v8849_v3 }
 0x495   : > { %7953 = vmatprep.subr.bf16.mxu1 %v8852_v6 }
 0x498   : > { %7954 = vmatpush3.bf16.msra.mxu1 %v8853_v7 }
 0x499   : > { %7983 = vmatprep.subr.bf16.mxu1 %v8855_v9 }
 0x53b   : > { %v8341_v10 = vpop.f32.mrf.mxu1 }
 0x53c   : > { %v3274_v15 = vpack.c.bf16 %v8341_v10, %v8341_v10 }
 0x53d   : > { %v3242_v11 = vpop.f32.mrf.mxu1 }
 0x53e   : > { %v3272_v19 = vpack.c.bf16 %v3242_v11, %v3242_v11 }
 0x53f   : > { %v8342_v12 = vpop.f32.mrf.mxu1 }
 0x540   : > { %v3275_v13 = vpack.c.bf16 %v8342_v12, %v8342_v12 }
 0x541   : > { %v3245_v16 = vpop.f32.mrf.mxu1 }
 0x542   : > { %v3273_v17 = vpack.c.bf16 %v3245_v16, %v3245_v16  ;;  %3799 = vmatprep.mubr.bf16.mxu0 %v3275_v13 }
 0x543   : > { %3800 = vmatmul.mubr.bf16.vlgmr.msra.gmra.mxu0 %v3274_v15  ;;  %v8345_v22 = vpop.f32.mrf.mxu1 }
 0x544   : > { %8348 = vmatpush3.bf16.msra.mxu0 %v8854_v14  ;;  %3759 = vmatprep.mubr.bf16.mxu1 %v3273_v17  ;;  %v3278_v50 = vpack.c.bf16 %v8345_v22, %v8345_v22 }
 0x545   : > { %3760 = vmatmul.mubr.bf16.vlgmr.msra.gmra.mxu1 %v3272_v19  ;;  %8349 = vmatprep.subr.bf16.mxu0 %v9414_v8  ;;  %v3258_v24 = vpop.f32.mrf.mxu1 }
 0x546   : > { %7984 = vmatpush3.bf16.msra.mxu1 %v8856_v18  ;;  %8363 = vmatprep.mubr.msk.bf16.mxu0 %vm9415_vm4, %v9414_v8  ;;  %v3276_v51 = vpack.c.bf16 %v3258_v24, %v3258_v24  ;;  %v3887_v18 = vld [vmem:[%s10285_s21] sm:$0x3] }
 0x547   : > { %7985 = vmatprep.subr.bf16.mxu1 %v8858_v21  ;;  %v8346_v30 = vpop.f32.mrf.mxu1 }
 0x548   : > { %8350 = vmatpush3.bf16.msra.mxu0 %v8857_v23 }
 0x549   : > { %8351 = vmatprep.subr.bf16.mxu0 %v9414_v8  ;;  %v3261_v31 = vpop.f32.mrf.mxu1 }
 0x54a   : > { %7986 = vmatpush3.bf16.msra.mxu1 %v8859_v25  ;;  %v3277_v33 = vpack.c.bf16 %v3261_v31, %v3261_v31  ;;  %v3896_v31 = vrot.slane %v3887_v18, %v9801_v56 }
 0x54b   : > { %7987 = vmatprep.subr.bf16.mxu1 %v8861_v29  ;;  %v3891_v29 = vrot.slane %v3887_v18, %v9790_v44  ;;  %v8920_v18 = vld [vmem:[#allocation6 + $0x1a8] sm:$0xff]  }
 0x54c   : > { %8352 = vmatpush3.bf16.msra.mxu0 %v8860_v26  ;;  %3839 = vmatprep.mubr.bf16.mxu1 %v3277_v33 }
 0x54d   : > { %8353 = vmatprep.subr.bf16.mxu0 %v9414_v8 }
 0x54e   : > { %7988 = vmatpush3.bf16.msra.mxu1 %v8862_v32 }
 0x54f   : > { %7989 = vmatprep.subr.bf16.mxu1 %v8864_v27 }
 0x550   : > { %8354 = vmatpush3.bf16.msra.mxu0 %v8863_v28 }
 0x551   : > { %8355 = vmatprep.subr.bf16.mxu0 %v9414_v8 }
 0x552   : > { %7990 = vmatpush3.bf16.msra.mxu1 %v8865_v34  ;;  %v8882_v34 = vld [vmem:[#allocation6 + $0xf8] sm:$0xff]  }
 0x553   : > { %7991 = vmatprep.subr.bf16.mxu1 %v8867_v35 }
 0x554   : > { %8356 = vmatpush3.bf16.msra.mxu0 %v8866_v36  ;;  %v8879_v36 = vld [vmem:[%s10337_s3 + $0x8] sm:$0xff]  }
 0x555   : > { %8357 = vmatprep.subr.bf16.mxu0 %v9414_v8 }
 0x556   : > { %7992 = vmatpush3.bf16.msra.mxu1 %v8868_v37  ;;  %v8880_v37 = vld [vmem:[%s10337_s3 + $0x10] sm:$0xff]  }
 0x557   : > { %7993 = vmatprep.subr.bf16.mxu1 %v8870_v38  ;;  %v8883_v38 = vld [vmem:[#allocation6 + $0xb8] sm:$0xff]  }
 0x558   : > { %8358 = vmatpush3.bf16.msra.mxu0 %v8869_v39  ;;  %v8886_v39 = vld [vmem:[#allocation6 + $0xf0] sm:$0xff]  }
 0x559   : > { %8359 = vmatprep.subr.bf16.mxu0 %v9414_v8 }
 0x55a   : > { %7994 = vmatpush3.bf16.msra.mxu1 %v8871_v40  ;;  %v8887_v40 = vld [vmem:[#allocation6 + $0xb0] sm:$0xff]  }
 0x55b   : > { %7995 = vmatprep.subr.bf16.mxu1 %v8873_v42  ;;  %v8890_v42 = vld [vmem:[#allocation6 + $0xe8] sm:$0xff]  }
 0x55c   : > { %8360 = vmatpush3.bf16.msra.mxu0 %v8872_v43  ;;  %v8881_v43 = vld [vmem:[%s10337_s3 + $0x18] ss:$0 sps:$4 sm:$0xff]  }
 0x55d   : > { %8361 = vmatprep.subr.bf16.mxu0 %v9414_v8 }
 0x55e   : > { %7996 = vmatpush3.bf16.msra.mxu1 %v8874_v45  ;;  %v8891_v45 = vld [vmem:[#allocation6 + $0xa8] sm:$0xff]  }
 0x55f   : > { %7997 = vmatprep.subr.bf16.mxu1 %v8876_v46  ;;  %v8894_v46 = vld [vmem:[#allocation6 + $0xe0] sm:$0xff]  }
 0x560   : > { %8362 = vmatpush3.bf16.msra.mxu0 %v8875_v48  ;;  %v8895_v48 = vld [vmem:[#allocation6 + $0xa0] sm:$0xff]  }
 0x562   : > { %7998 = vmatpush3.bf16.msra.mxu1 %v8877_v49  ;;  %v8898_v49 = vld [vmem:[#allocation6 + $0xd8] sm:$0xff]  }
 0x563   : > { %8364 = vmatmul.mubr.bf16.vlgmr.msra.gmra.mxu0 %v3278_v50  ;;  %8019 = vmatprep.subr.bf16.mxu1 %v8884_v53  ;;  %v8899_v50 = vld [vmem:[#allocation6 + $0x98] sm:$0xff]   ;;  %v8906_v53 = vld [vmem:[#allocation6 + $0xc8] sm:$0xff]  }
 0x564   : > { %8369 = vmatprep.mubr.msk.bf16.mxu0 %vm3925_vm5, %v8878_v52  ;;  %v8903_v52 = vld [vmem:[#allocation6 + $0x90] sm:$0xff]  }
 0x565   : > { %3840 = vmatmul.mubr.bf16.vlgmr.msra.gmra.mxu1 %v3276_v51  ;;  %v8902_v51 = vld [vmem:[#allocation6 + $0xd0] sm:$0xff]  }
 0x566   : > { %8020 = vmatpush3.bf16.msra.mxu1 %v8885_v55  ;;  %v8907_v55 = vld [vmem:[#allocation6 + $0x88] sm:$0xff]  }
 0x567   : > { %8021 = vmatprep.subr.bf16.mxu1 %v8888_v57  ;;  %v8908_v57 = vld [vmem:[#allocation6 + $0x48] sm:$0xff]  }
 0x56a   : > { %8022 = vmatpush3.bf16.msra.mxu1 %v8889_v58  ;;  %v8909_v58 = vld [vmem:[#allocation6 + $0x8] sm:$0xff]  }
 0x56b   : > { %8023 = vmatprep.subr.bf16.mxu1 %v8892_v59  ;;  %v8910_v59 = vld [vmem:[#allocation6 + $0xc0] sm:$0xff]  }
 0x56e   : > { %8024 = vmatpush3.bf16.msra.mxu1 %v8893_v60  ;;  %v8911_v60 = vld [vmem:[#allocation6 + $0x80] sm:$0xff]  }
 0x56f   : > { %8025 = vmatprep.subr.bf16.mxu1 %v8896_v61  ;;  %v8912_v61 = vld [vmem:[#allocation6 + $0x40] sm:$0xff]  }
 0x572   : > { %8026 = vmatpush3.bf16.msra.mxu1 %v8897_v62  ;;  %v8913_v62 = vld [vmem:[#allocation6] sm:$0xff]  }
 0x573   : > { %8027 = vmatprep.subr.bf16.mxu1 %v8900_v63  ;;  %v8915_v63 = vld [vmem:[#allocation6 + $0x178] sm:$0xff]  }
 0x576   : > { %8028 = vmatpush3.bf16.msra.mxu1 %v8901_v0 }
 0x577   : > { %8029 = vmatprep.subr.bf16.mxu1 %v8904_v1 }
 0x57a   : > { %8030 = vmatpush3.bf16.msra.mxu1 %v8905_v2 }
 0x57b   : > { %8031 = vmatprep.subr.bf16.mxu1 %v8908_v57  ;;  %v8965_v57 = vld [vmem:[#allocation7 + $0x10] sm:$0xff]  }
 0x57e   : > { %8032 = vmatpush3.bf16.msra.mxu1 %v8909_v58 }
 0x57f   : > { %8033 = vmatprep.subr.bf16.mxu1 %v8912_v61 }
 0x582   : > { %8034 = vmatpush3.bf16.msra.mxu1 %v8913_v62 }
 0x583   : > { %8063 = vmatprep.subr.bf16.mxu1 %v8915_v63 }
 0x603   : > { %v7977_v3 = vpop.f32.mrf.mxu0 }
 0x605   : > { %v7955_v4 = vpop.f32.mrf.mxu1  ;;  %v7978_v5 = vpop.f32.mrf.mxu0 }
 0x606   : > { %v7979_v16 = vadd.f32 %v7978_v5, %v7977_v3 }
 0x607   : > { %v7956_v6 = vpop.f32.mrf.mxu1  ;;  %v7980_v7 = vpop.f32.mrf.mxu0 }
 0x608   : > { %v7957_v13 = vadd.f32 %v7956_v6, %v7955_v4  ;;  %v8914_v4 = vld [vmem:[#allocation6 + $0x1b8] sm:$0xff]  }
 0x609   : > { %v7958_v9 = vpop.f32.mrf.mxu1  ;;  %v7981_v10 = vpop.f32.mrf.mxu0 }
 0x60a   : > { %v3802_v21 = vadd.f32 %v7979_v16, %v7957_v13  ;;  %v8916_v9 = vld [vmem:[#allocation6 + $0x138] sm:$0xff]   ;;  %v8917_v13 = vld [vmem:[#allocation6 + $0x1b0] sm:$0xff]   ;;  %v8921_v16 = vld [vmem:[#allocation6 + $0x168] sm:$0xff]  }
 0x60b   : > { %v7959_v11 = vpop.f32.mrf.mxu1 }
 0x60c   : > { %v8918_v11 = vld [vmem:[#allocation6 + $0x170] sm:$0xff]  }
 0x623   : > { %v3881_v12 = vpop.f32.mrf.mxu0 }
 0x625   : > { %v7999_v14 = vpop.f32.mrf.mxu1  ;;  %v8365_v15 = vpop.f32.mrf.mxu0 }
 0x626   : > { %v8919_v15 = vld [vmem:[#allocation6 + $0x130] sm:$0xff]  }
 0x627   : > { %v8000_v17 = vpop.f32.mrf.mxu1  ;;  %v3884_v19 = vpop.f32.mrf.mxu0 }
 0x628   : > { %v8001_v22 = vadd.f32 %v8000_v17, %v7999_v14 }
 0x629   : > { %v8002_v23 = vpop.f32.mrf.mxu1  ;;  %v8366_v24 = vpop.f32.mrf.mxu0 }
 0x62a   : > { %v3842_v25 = vadd.f32 %v8001_v22, %v3802_v21  ;;  %v8922_v21 = vld [vmem:[#allocation6 + $0x128] sm:$0xff]   ;;  %v8924_v23 = vld [vmem:[#allocation6 + $0x160] sm:$0xff]  }
 0x62b   : > { %v8003_v30 = vpop.f32.mrf.mxu1  ;;  %v8923_v24 = vld [vmem:[#allocation6 + $0x1a0] sm:$0xff]  }
 0x62c   : > { %v3882_v26 = vadd.f32 %v3881_v12, %v3842_v25  ;;  %v8925_v25 = vld [vmem:[#allocation6 + $0x120] sm:$0xff]   ;;  %v8926_v30 = vld [vmem:[#allocation6 + $0x198] sm:$0xff]  }
 0x62e   : > { %v3892_v32 = vmul.f32 %v3891_v29, %v3882_v26  ;;  %v8927_v29 = vld [vmem:[#allocation6 + $0x158] sm:$0xff]  }
 0x62f   : > { %v8928_v26 = vld [vmem:[#allocation6 + $0x118] sm:$0xff]  }
 0x630   : > { %v3897_v33 = vadd.f32 %v3896_v31, %v3892_v32  ;;  %v8930_v31 = vld [vmem:[#allocation6 + $0x150] sm:$0xff]  }
 0x631   : > { %v8929_v32 = vld [vmem:[#allocation6 + $0x190] sm:$0xff]  }
 0x632   : > { %v3898_v27 = vmax.f32 %v3897_v33, 0.0  ;;  %v8931_v33 = vld [vmem:[#allocation6 + $0x110] sm:$0xff]  }
 0x634   : > { %v3899_v28 = vpack.c.bf16 %v3898_v27, %v3898_v27  ;;  %v8933_v27 = vld [vmem:[#allocation6 + $0x148] sm:$0xff]  }
 0x636   : > { %8470 = vmatprep.subr.msk.bf16.mxu0 %vm3204_vm3, %v3899_v28  ;;  %v3939_v35 = vsel %vm3204_vm3, %v3899_v28, 0  ;;  %v8932_v28 = vld [vmem:[#allocation6 + $0x188] sm:$0xff]  }
 0x637   : > { %8368 = vmatpush3.bf16.msra.mxu0 %v3939_v35  ;;  %v8936_v35 = vld [vmem:[#allocation6 + $0x140] sm:$0xff]  }
 0x638   : > { %8041 = vmatprep.subr.bf16.mxu0 %v8882_v34  ;;  %v8934_v34 = vld [vmem:[#allocation6 + $0x108] sm:$0xff]  }
 0x63a   : > { %8370 = vmatmul.mubr.msk.bf16.vlgmr.msra.gmra.mxu0 %vm3925_vm5, %v8879_v36  ;;  %v8935_v36 = vld [vmem:[#allocation6 + $0x180] sm:$0xff]  }
 0x63b   : > { %8373 = vmatprep.mubr.msk.bf16.mxu0 %vm3925_vm5, %v8880_v37  ;;  %8042 = vmatpush3.bf16.msra.mxu0 %v8883_v38  ;;  %v8937_v37 = vld [vmem:[#allocation6 + $0x100] sm:$0xff]  }
 0x63c   : > { %8043 = vmatprep.subr.bf16.mxu0 %v8886_v39 }
 0x63f   : > { %8044 = vmatpush3.bf16.msra.mxu0 %v8887_v40  ;;  %v8938_v40 = vld [vmem:[%s10338_s0] sm:$0xff]  }
 0x640   : > { %8045 = vmatprep.subr.bf16.mxu0 %v8890_v42  ;;  %v8944_v42 = vld [vmem:[#allocation7 + $0x78] sm:$0xff]  }
 0x642   : > { %8374 = vmatmul.mubr.msk.bf16.gmra.mxu0 %vm3925_vm5, %v8881_v43  ;;  %v8945_v43 = vld [vmem:[#allocation7 + $0x38] sm:$0xff]  }
 0x643   : > { %8046 = vmatpush3.bf16.msra.mxu0 %v8891_v45  ;;  %v8948_v45 = vld [vmem:[#allocation7 + $0x70] sm:$0xff]  }
 0x644   : > { %8047 = vmatprep.subr.bf16.mxu0 %v8894_v46  ;;  %v8949_v46 = vld [vmem:[#allocation7 + $0x30] sm:$0xff]  }
 0x647   : > { %8048 = vmatpush3.bf16.msra.mxu0 %v8895_v48  ;;  %v8952_v48 = vld [vmem:[#allocation7 + $0x68] sm:$0xff]  }
 0x648   : > { %8049 = vmatprep.subr.bf16.mxu0 %v8898_v49  ;;  %v8953_v49 = vld [vmem:[#allocation7 + $0x28] sm:$0xff]  }
 0x64b   : > { %8050 = vmatpush3.bf16.msra.mxu0 %v8899_v50  ;;  %v8956_v50 = vld [vmem:[#allocation7 + $0x60] sm:$0xff]  }
 0x64c   : > { %8051 = vmatprep.subr.bf16.mxu0 %v8902_v51  ;;  %v8957_v51 = vld [vmem:[#allocation7 + $0x20] sm:$0xff]  }
 0x64f   : > { %8052 = vmatpush3.bf16.msra.mxu0 %v8903_v52  ;;  %v8960_v52 = vld [vmem:[#allocation7 + $0x58] sm:$0xff]  }
 0x650   : > { %8053 = vmatprep.subr.bf16.mxu0 %v8906_v53  ;;  %v8961_v53 = vld [vmem:[#allocation7 + $0x18] sm:$0xff]  }
 0x653   : > { %8054 = vmatpush3.bf16.msra.mxu0 %v8907_v55  ;;  %v8964_v55 = vld [vmem:[#allocation7 + $0x50] sm:$0xff]  }
 0x654   : > { %8055 = vmatprep.subr.bf16.mxu0 %v8910_v59 }
 0x657   : > { %8056 = vmatpush3.bf16.msra.mxu0 %v8911_v60 }
 0x658   : > { %8377 = vmatprep.subr.bf16.mxu0 %v9414_v8 }
 0x6fa   : > { %v8371_v0 = vpop.f32.mrf.mxu0 }
 0x6fb   : > { %v4007_v5 = vpack.c.bf16 %v8371_v0, %v8371_v0 }
 0x6fc   : > { %v3975_v1 = vpop.f32.mrf.mxu0 }
 0x6fd   : > { %v4005_v10 = vpack.c.bf16 %v3975_v1, %v3975_v1 }
 0x6fe   : > { %v8372_v2 = vpop.f32.mrf.mxu0 }
 0x6ff   : > { %v4008_v3 = vpack.c.bf16 %v8372_v2, %v8372_v2 }
 0x700   : > { %v3978_v6 = vpop.f32.mrf.mxu0 }
 0x701   : > { %v4006_v7 = vpack.c.bf16 %v3978_v6, %v3978_v6  ;;  %4532 = vmatprep.mubr.bf16.mxu0 %v4008_v3 }
 0x702   : > { %4533 = vmatmul.mubr.bf16.vlgmr.msra.gmra.mxu0 %v4007_v5  ;;  %v8375_v12 = vpop.f32.mrf.mxu0 }
 0x703   : > { %8378 = vmatpush3.bf16.msra.mxu0 %v8914_v4  ;;  %4492 = vmatprep.mubr.bf16.mxu1 %v4006_v7  ;;  %v4011_v38 = vpack.c.bf16 %v8375_v12, %v8375_v12 }
 0x704   : > { %4493 = vmatmul.mubr.bf16.vlgmr.msra.gmra.mxu1 %v4005_v10  ;;  %8379 = vmatprep.subr.bf16.mxu0 %v9414_v8  ;;  %v3991_v14 = vpop.f32.mrf.mxu0 }
 0x705   : > { %8064 = vmatpush3.bf16.msra.mxu1 %v8916_v9  ;;  %8393 = vmatprep.mubr.msk.bf16.mxu0 %vm9415_vm4, %v9414_v8  ;;  %v4009_v39 = vpack.c.bf16 %v3991_v14, %v3991_v14  ;;  %v4620_v9 = vld [vmem:[%s10286_s22] sm:$0x3] }
 0x706   : > { %8065 = vmatprep.subr.bf16.mxu1 %v8918_v11  ;;  %v8376_v17 = vpop.f32.mrf.mxu0 }
 0x707   : > { %8380 = vmatpush3.bf16.msra.mxu0 %v8917_v13 }
 0x708   : > { %8381 = vmatprep.subr.bf16.mxu0 %v9414_v8  ;;  %v3994_v19 = vpop.f32.mrf.mxu0 }
 0x709   : > { %8066 = vmatpush3.bf16.msra.mxu1 %v8919_v15  ;;  %v4010_v22 = vpack.c.bf16 %v3994_v19, %v3994_v19  ;;  %v4629_v19 = vrot.slane %v4620_v9, %v9801_v56 }
 0x70a   : > { %8067 = vmatprep.subr.bf16.mxu1 %v8921_v16  ;;  %v4624_v16 = vrot.slane %v4620_v9, %v9790_v44  ;;  %v8980_v9 = vld [vmem:[#allocation7 + $0x1a8] sm:$0xff]  }
 0x70b   : > { %8382 = vmatpush3.bf16.msra.mxu0 %v8920_v18  ;;  %4572 = vmatprep.mubr.bf16.mxu1 %v4010_v22 }
 0x70c   : > { %8383 = vmatprep.subr.bf16.mxu0 %v9414_v8 }
 0x70d   : > { %8068 = vmatpush3.bf16.msra.mxu1 %v8922_v21 }
 0x70e   : > { %8069 = vmatprep.subr.bf16.mxu1 %v8924_v23 }
 0x70f   : > { %8384 = vmatpush3.bf16.msra.mxu0 %v8923_v24 }
 0x710   : > { %8385 = vmatprep.subr.bf16.mxu0 %v9414_v8 }
 0x711   : > { %8070 = vmatpush3.bf16.msra.mxu1 %v8925_v25  ;;  %v8942_v25 = vld [vmem:[#allocation7 + $0xf8] sm:$0xff]  }
 0x712   : > { %8071 = vmatprep.subr.bf16.mxu1 %v8927_v29 }
 0x713   : > { %8386 = vmatpush3.bf16.msra.mxu0 %v8926_v30  ;;  %v8939_v30 = vld [vmem:[%s10338_s0 + $0x8] sm:$0xff]  }
 0x714   : > { %8387 = vmatprep.subr.bf16.mxu0 %v9414_v8 }
 0x715   : > { %8072 = vmatpush3.bf16.msra.mxu1 %v8928_v26  ;;  %v8940_v26 = vld [vmem:[%s10338_s0 + $0x10] sm:$0xff]  }
 0x716   : > { %8073 = vmatprep.subr.bf16.mxu1 %v8930_v31  ;;  %v8943_v31 = vld [vmem:[#allocation7 + $0xb8] sm:$0xff]  }
 0x717   : > { %8388 = vmatpush3.bf16.msra.mxu0 %v8929_v32  ;;  %v8946_v32 = vld [vmem:[#allocation7 + $0xf0] sm:$0xff]  }
 0x718   : > { %8389 = vmatprep.subr.bf16.mxu0 %v9414_v8 }
 0x719   : > { %8074 = vmatpush3.bf16.msra.mxu1 %v8931_v33  ;;  %v8947_v33 = vld [vmem:[#allocation7 + $0xb0] sm:$0xff]  }
 0x71a   : > { %8075 = vmatprep.subr.bf16.mxu1 %v8933_v27  ;;  %v8950_v27 = vld [vmem:[#allocation7 + $0xe8] sm:$0xff]  }
 0x71b   : > { %8390 = vmatpush3.bf16.msra.mxu0 %v8932_v28  ;;  %v8941_v28 = vld [vmem:[%s10338_s0 + $0x18] ss:$0 sps:$4 sm:$0xff]  }
 0x71c   : > { %8391 = vmatprep.subr.bf16.mxu0 %v9414_v8 }
 0x71d   : > { %8076 = vmatpush3.bf16.msra.mxu1 %v8934_v34  ;;  %v8951_v34 = vld [vmem:[#allocation7 + $0xa8] sm:$0xff]  }
 0x71e   : > { %8077 = vmatprep.subr.bf16.mxu1 %v8936_v35  ;;  %v8954_v35 = vld [vmem:[#allocation7 + $0xe0] sm:$0xff]  }
 0x71f   : > { %8392 = vmatpush3.bf16.msra.mxu0 %v8935_v36  ;;  %v8955_v36 = vld [vmem:[#allocation7 + $0xa0] sm:$0xff]  }
 0x720   : > { %8099 = vmatprep.subr.bf16.mxu0 %v8944_v42  ;;  %v8966_v42 = vld [vmem:[#allocation7 + $0xc8] sm:$0xff]  }
 0x721   : > { %8078 = vmatpush3.bf16.msra.mxu1 %v8937_v37  ;;  %v8958_v37 = vld [vmem:[#allocation7 + $0xd8] sm:$0xff]  }
 0x722   : > { %8394 = vmatmul.mubr.bf16.vlgmr.msra.gmra.mxu0 %v4011_v38  ;;  %v8959_v38 = vld [vmem:[#allocation7 + $0x98] sm:$0xff]  }
 0x723   : > { %8100 = vmatpush3.bf16.msra.mxu0 %v8945_v43  ;;  %v8967_v43 = vld [vmem:[#allocation7 + $0x88] sm:$0xff]  }
 0x724   : > { %4573 = vmatmul.mubr.bf16.vlgmr.msra.gmra.mxu1 %v4009_v39  ;;  %8101 = vmatprep.subr.bf16.mxu0 %v8948_v45  ;;  %v8962_v39 = vld [vmem:[#allocation7 + $0xd0] sm:$0xff]   ;;  %v8968_v45 = vld [vmem:[#allocation7 + $0x48] sm:$0xff]  }
 0x725   : > { %8399 = vmatprep.mubr.msk.bf16.mxu1 %vm3925_vm5, %v8938_v40  ;;  %v8963_v40 = vld [vmem:[#allocation7 + $0x90] sm:$0xff]  }
 0x727   : > { %8102 = vmatpush3.bf16.msra.mxu0 %v8949_v46  ;;  %v8969_v46 = vld [vmem:[#allocation7 + $0x8] sm:$0xff]  }
 0x728   : > { %8103 = vmatprep.subr.bf16.mxu0 %v8952_v48  ;;  %v8970_v48 = vld [vmem:[#allocation7 + $0xc0] sm:$0xff]  }
 0x72b   : > { %8104 = vmatpush3.bf16.msra.mxu0 %v8953_v49  ;;  %v8971_v49 = vld [vmem:[#allocation7 + $0x80] sm:$0xff]  }
 0x72c   : > { %8105 = vmatprep.subr.bf16.mxu0 %v8956_v50  ;;  %v8972_v50 = vld [vmem:[#allocation7 + $0x40] sm:$0xff]  }
 0x72f   : > { %8106 = vmatpush3.bf16.msra.mxu0 %v8957_v51  ;;  %v8973_v51 = vld [vmem:[#allocation7] sm:$0xff]  }
 0x730   : > { %8107 = vmatprep.subr.bf16.mxu0 %v8960_v52  ;;  %v8975_v52 = vld [vmem:[#allocation7 + $0x178] sm:$0xff]  }
 0x733   : > { %8108 = vmatpush3.bf16.msra.mxu0 %v8961_v53 }
 0x734   : > { %8109 = vmatprep.subr.bf16.mxu0 %v8964_v55 }
 0x737   : > { %8110 = vmatpush3.bf16.msra.mxu0 %v8965_v57 }
 0x738   : > { %8111 = vmatprep.subr.bf16.mxu0 %v8968_v45 }
 0x73b   : > { %8112 = vmatpush3.bf16.msra.mxu0 %v8969_v46 }
 0x73c   : > { %8113 = vmatprep.subr.bf16.mxu0 %v8972_v50 }
 0x73f   : > { %8114 = vmatpush3.bf16.msra.mxu0 %v8973_v51 }
 0x740   : > { %8143 = vmatprep.subr.bf16.mxu0 %v8975_v52 }
 0x7c2   : > { %v8057_v58 = vpop.f32.mrf.mxu0 }
 0x7c4   : > { %v8035_v59 = vpop.f32.mrf.mxu1  ;;  %v8058_v60 = vpop.f32.mrf.mxu0 }
 0x7c5   : > { %v8059_v6 = vadd.f32 %v8058_v60, %v8057_v58 }
 0x7c6   : > { %v8036_v61 = vpop.f32.mrf.mxu1  ;;  %v8060_v62 = vpop.f32.mrf.mxu0 }
 0x7c7   : > { %v8037_v3 = vadd.f32 %v8036_v61, %v8035_v59  ;;  %v8974_v59 = vld [vmem:[#allocation7 + $0x1b8] sm:$0xff]  }
 0x7c8   : > { %v8038_v63 = vpop.f32.mrf.mxu1  ;;  %v8061_v0 = vpop.f32.mrf.mxu0 }
 0x7c9   : > { %v4535_v11 = vadd.f32 %v8059_v6, %v8037_v3  ;;  %v8976_v63 = vld [vmem:[#allocation7 + $0x138] sm:$0xff]   ;;  %v8977_v3 = vld [vmem:[#allocation7 + $0x1b0] sm:$0xff]   ;;  %v8981_v6 = vld [vmem:[#allocation7 + $0x168] sm:$0xff]  }
 0x7ca   : > { %v8039_v1 = vpop.f32.mrf.mxu1 }
 0x7cb   : > { %v8978_v1 = vld [vmem:[#allocation7 + $0x170] sm:$0xff]  }
 0x7e2   : > { %v4614_v2 = vpop.f32.mrf.mxu0 }
 0x7e4   : > { %v8079_v4 = vpop.f32.mrf.mxu1  ;;  %v8395_v5 = vpop.f32.mrf.mxu0 }
 0x7e5   : > { %v8979_v5 = vld [vmem:[#allocation7 + $0x130] sm:$0xff]  }
 0x7e6   : > { %v8080_v7 = vpop.f32.mrf.mxu1  ;;  %v4617_v10 = vpop.f32.mrf.mxu0 }
 0x7e7   : > { %v8081_v12 = vadd.f32 %v8080_v7, %v8079_v4 }
 0x7e8   : > { %v8082_v13 = vpop.f32.mrf.mxu1  ;;  %v8396_v14 = vpop.f32.mrf.mxu0 }
 0x7e9   : > { %v4575_v15 = vadd.f32 %v8081_v12, %v4535_v11  ;;  %v8982_v11 = vld [vmem:[#allocation7 + $0x128] sm:$0xff]   ;;  %v8984_v13 = vld [vmem:[#allocation7 + $0x160] sm:$0xff]  }
 0x7ea   : > { %v8083_v17 = vpop.f32.mrf.mxu1  ;;  %v8983_v14 = vld [vmem:[#allocation7 + $0x1a0] sm:$0xff]  }
 0x7eb   : > { %v4615_v18 = vadd.f32 %v4614_v2, %v4575_v15  ;;  %v8985_v15 = vld [vmem:[#allocation7 + $0x120] sm:$0xff]   ;;  %v8986_v17 = vld [vmem:[#allocation7 + $0x198] sm:$0xff]  }
 0x7ed   : > { %v4625_v21 = vmul.f32 %v4624_v16, %v4615_v18  ;;  %v8987_v16 = vld [vmem:[#allocation7 + $0x158] sm:$0xff]  }
 0x7ee   : > { %v8988_v18 = vld [vmem:[#allocation7 + $0x118] sm:$0xff]  }
 0x7ef   : > { %v4630_v22 = vadd.f32 %v4629_v19, %v4625_v21  ;;  %v8990_v19 = vld [vmem:[#allocation7 + $0x150] sm:$0xff]  }
 0x7f0   : > { %v8989_v21 = vld [vmem:[#allocation7 + $0x190] sm:$0xff]  }
 0x7f1   : > { %v4631_v23 = vmax.f32 %v4630_v22, 0.0  ;;  %v8991_v22 = vld [vmem:[#allocation7 + $0x110] sm:$0xff]  }
 0x7f3   : > { %v4632_v24 = vpack.c.bf16 %v4631_v23, %v4631_v23  ;;  %v8993_v23 = vld [vmem:[#allocation7 + $0x148] sm:$0xff]  }
 0x7f5   : > { %8471 = vmatprep.subr.msk.bf16.mxu1 %vm3204_vm3, %v4632_v24  ;;  %v4671_v29 = vsel %vm3204_vm3, %v4632_v24, 0  ;;  %v8992_v24 = vld [vmem:[#allocation7 + $0x188] sm:$0xff]  }
 0x7f6   : > { %8398 = vmatpush3.bf16.msra.mxu1 %v4671_v29  ;;  %v8996_v29 = vld [vmem:[#allocation7 + $0x140] sm:$0xff]  }
 0x7f7   : > { %8121 = vmatprep.subr.bf16.mxu1 %v8942_v25  ;;  %v8994_v25 = vld [vmem:[#allocation7 + $0x108] sm:$0xff]  }
 0x7f9   : > { %8400 = vmatmul.mubr.msk.bf16.vlgmr.msra.gmra.mxu1 %vm3925_vm5, %v8939_v30  ;;  %v8995_v30 = vld [vmem:[#allocation7 + $0x180] sm:$0xff]  }
 0x7fa   : > { %8403 = vmatprep.mubr.msk.bf16.mxu1 %vm3925_vm5, %v8940_v26  ;;  %8122 = vmatpush3.bf16.msra.mxu1 %v8943_v31  ;;  %v8997_v26 = vld [vmem:[#allocation7 + $0x100] sm:$0xff]  }
 0x7fb   : > { %8123 = vmatprep.subr.bf16.mxu1 %v8946_v32 }
 0x7fe   : > { %8124 = vmatpush3.bf16.msra.mxu1 %v8947_v33  ;;  %v8999_v33 = vld [vmem:[#allocation9 + $0x78] sm:$0xff]  }
 0x7ff   : > { %8125 = vmatprep.subr.bf16.mxu1 %v8950_v27  ;;  %v9000_v27 = vld [vmem:[#allocation9 + $0x38] sm:$0xff]  }
 0x801   : > { %8404 = vmatmul.mubr.msk.bf16.gmra.mxu1 %vm3925_vm5, %v8941_v28  ;;  %v9001_v28 = vld [vmem:[#allocation9 + $0x70] sm:$0xff]  }
 0x802   : > { %8126 = vmatpush3.bf16.msra.mxu1 %v8951_v34  ;;  %v9002_v34 = vld [vmem:[#allocation9 + $0x30] sm:$0xff]  }
 0x803   : > { %8127 = vmatprep.subr.bf16.mxu1 %v8954_v35  ;;  %v9003_v35 = vld [vmem:[#allocation9 + $0x68] sm:$0xff]  }
 0x806   : > { %8128 = vmatpush3.bf16.msra.mxu1 %v8955_v36  ;;  %v9004_v36 = vld [vmem:[#allocation9 + $0x28] sm:$0xff]  }
 0x807   : > { %8129 = vmatprep.subr.bf16.mxu1 %v8958_v37  ;;  %v9005_v37 = vld [vmem:[#allocation9 + $0x60] sm:$0xff]  }
 0x80a   : > { %8130 = vmatpush3.bf16.msra.mxu1 %v8959_v38  ;;  %v9006_v38 = vld [vmem:[#allocation9 + $0x20] sm:$0xff]  }
 0x80b   : > { %8131 = vmatprep.subr.bf16.mxu1 %v8962_v39  ;;  %v9007_v39 = vld [vmem:[#allocation9 + $0x58] sm:$0xff]  }
 0x80e   : > { %8132 = vmatpush3.bf16.msra.mxu1 %v8963_v40  ;;  %v9008_v40 = vld [vmem:[#allocation9 + $0x18] sm:$0xff]  }
 0x80f   : > { %8133 = vmatprep.subr.bf16.mxu1 %v8966_v42  ;;  %v9009_v42 = vld [vmem:[#allocation9 + $0x50] sm:$0xff]  }
 0x812   : > { %8134 = vmatpush3.bf16.msra.mxu1 %v8967_v43  ;;  %v9010_v43 = vld [vmem:[#allocation9 + $0x10] sm:$0xff]  }
 0x813   : > { %8135 = vmatprep.subr.bf16.mxu1 %v8970_v48 }
 0x816   : > { %8136 = vmatpush3.bf16.msra.mxu1 %v8971_v49 }
 0x817   : > { %8407 = vmatprep.subr.bf16.mxu1 %v9414_v8 }
 0x8b9   : > { %v8401_v53 = vpop.f32.mrf.mxu1 }
 0x8ba   : > { %v4739_v60 = vpack.c.bf16 %v8401_v53, %v8401_v53 }
 0x8bb   : > { %v4707_v55 = vpop.f32.mrf.mxu1 }
 0x8bc   : > { %v4737_v0 = vpack.c.bf16 %v4707_v55, %v4707_v55 }
 0x8bd   : > { %v8402_v57 = vpop.f32.mrf.mxu1 }
 0x8be   : > { %v4740_v58 = vpack.c.bf16 %v8402_v57, %v8402_v57 }
 0x8bf   : > { %v4710_v61 = vpop.f32.mrf.mxu1 }
 0x8c0   : > { %v4738_v62 = vpack.c.bf16 %v4710_v61, %v4710_v61  ;;  %5264 = vmatprep.mubr.bf16.mxu1 %v4740_v58 }
 0x8c1   : > { %5265 = vmatmul.mubr.bf16.vlgmr.msra.gmra.mxu1 %v4739_v60  ;;  %v8405_v2 = vpop.f32.mrf.mxu1 }
 0x8c2   : > { %8408 = vmatpush3.bf16.msra.mxu1 %v8974_v59  ;;  %5224 = vmatprep.mubr.bf16.mxu0 %v4738_v62  ;;  %v4743_v31 = vpack.c.bf16 %v8405_v2, %v8405_v2  ;;  %v5352_v62 = vld [vmem:[%s10287_s23] sm:$0x3] }
 0x8c3   : > { %5225 = vmatmul.mubr.bf16.vlgmr.msra.gmra.mxu0 %v4737_v0  ;;  %8409 = vmatprep.subr.bf16.mxu1 %v9414_v8  ;;  %v4723_v4 = vpop.f32.mrf.mxu1 }
 0x8c4   : > { %8144 = vmatpush3.bf16.msra.mxu0 %v8976_v63  ;;  %8423 = vmatprep.mubr.msk.bf16.mxu1 %vm9415_vm4, %v9414_v8  ;;  %v4741_v32 = vpack.c.bf16 %v4723_v4, %v4723_v4 }
 0x8c5   : > { %8145 = vmatprep.subr.bf16.mxu0 %v8978_v1  ;;  %v8406_v7 = vpop.f32.mrf.mxu1 }
 0x8c6   : > { %8410 = vmatpush3.bf16.msra.mxu1 %v8977_v3 }
 0x8c7   : > { %8411 = vmatprep.subr.bf16.mxu1 %v9414_v8  ;;  %v4726_v10 = vpop.f32.mrf.mxu1 }
 0x8c8   : > { %8146 = vmatpush3.bf16.msra.mxu0 %v8979_v5  ;;  %v4742_v12 = vpack.c.bf16 %v4726_v10, %v4726_v10  ;;  %v5356_v5 = vrot.slane %v5352_v62, %v9790_v44 }
 0x8c9   : > { %8147 = vmatprep.subr.bf16.mxu0 %v8981_v6 }
 0x8ca   : > { %8412 = vmatpush3.bf16.msra.mxu1 %v8980_v9  ;;  %5304 = vmatprep.mubr.bf16.mxu0 %v4742_v12  ;;  %v5361_v9 = vrot.slane %v5352_v62, %v9801_v56  ;;  %v9022_v62 = vld [vmem:[#allocation10 + $0x38] sm:$0xff]  }
 0x8cb   : > { %8413 = vmatprep.subr.bf16.mxu1 %v9414_v8 }
 0x8cc   : > { %8148 = vmatpush3.bf16.msra.mxu0 %v8982_v11 }
 0x8cd   : > { %8149 = vmatprep.subr.bf16.mxu0 %v8984_v13 }
 0x8ce   : > { %8414 = vmatpush3.bf16.msra.mxu1 %v8983_v14 }
 0x8cf   : > { %8415 = vmatprep.subr.bf16.mxu1 %v9414_v8 }
 0x8d0   : > { %8150 = vmatpush3.bf16.msra.mxu0 %v8985_v15  ;;  %v8998_v15 = vld [vmem:[%s10339_s4] sm:$0xff]  }
 0x8d1   : > { %8151 = vmatprep.subr.bf16.mxu0 %v8987_v16  ;;  %v9011_v16 = vld [vmem:[#allocation9 + $0x48] sm:$0xff]  }
 0x8d2   : > { %8416 = vmatpush3.bf16.msra.mxu1 %v8986_v17  ;;  %v9012_v17 = vld [vmem:[#allocation9 + $0x8] sm:$0xff]  }
 0x8d3   : > { %8417 = vmatprep.subr.bf16.mxu1 %v9414_v8 }
 0x8d4   : > { %8152 = vmatpush3.bf16.msra.mxu0 %v8988_v18  ;;  %v9013_v18 = vld [vmem:[#allocation9 + $0x40] sm:$0xff]  }
 0x8d5   : > { %8153 = vmatprep.subr.bf16.mxu0 %v8990_v19  ;;  %v9014_v19 = vld [vmem:[#allocation9] sm:$0xff]  }
 0x8d6   : > { %8418 = vmatpush3.bf16.msra.mxu1 %v8989_v21 }
 0x8d7   : > { %8419 = vmatprep.subr.bf16.mxu1 %v9414_v8 }
 0x8d8   : > { %8154 = vmatpush3.bf16.msra.mxu0 %v8991_v22 }
 0x8d9   : > { %8155 = vmatprep.subr.bf16.mxu0 %v8993_v23 }
 0x8da   : > { %8420 = vmatpush3.bf16.msra.mxu1 %v8992_v24 }
 0x8db   : > { %8421 = vmatprep.subr.bf16.mxu1 %v9414_v8 }
 0x8dc   : > { %8156 = vmatpush3.bf16.msra.mxu0 %v8994_v25 }
 0x8dd   : > { %8157 = vmatprep.subr.bf16.mxu0 %v8996_v29 }
 0x8de   : > { %8422 = vmatpush3.bf16.msra.mxu1 %v8995_v30  ;;  %v9015_v30 = vld [vmem:[%s10340_s9] sm:$0xff]  }
 0x8df   : > { %8176 = vmatprep.subr.bf16.mxu1 %v8999_v33  ;;  %v9024_v33 = vld [vmem:[#allocation10 + $0xb0] sm:$0xff]  }
 0x8e0   : > { %8158 = vmatpush3.bf16.msra.mxu0 %v8997_v26  ;;  %v9019_v26 = vld [vmem:[#allocation10 + $0xf8] sm:$0xff]  }
 0x8e1   : > { %8424 = vmatmul.mubr.bf16.vlgmr.msra.gmra.mxu1 %v4743_v31  ;;  %8427 = vmatprep.subr.bf16.mxu0 %v9414_v8  ;;  %v9020_v31 = vld [vmem:[#allocation10 + $0xb8] sm:$0xff]  }
 0x8e2   : > { %8177 = vmatpush3.bf16.msra.mxu1 %v9000_v27  ;;  %v9027_v27 = vld [vmem:[#allocation10 + $0xe8] sm:$0xff]  }
 0x8e3   : > { %5305 = vmatmul.mubr.bf16.vlgmr.msra.gmra.mxu0 %v4741_v32  ;;  %8178 = vmatprep.subr.bf16.mxu1 %v9001_v28  ;;  %v9023_v32 = vld [vmem:[#allocation10 + $0xf0] sm:$0xff]   ;;  %v9028_v28 = vld [vmem:[#allocation10 + $0xa8] sm:$0xff]  }
 0x8e4   : > { %8429 = vmatprep.mubr.msk.bf16.mxu0 %vm9415_vm4, %v9414_v8 }
 0x8e6   : > { %8179 = vmatpush3.bf16.msra.mxu1 %v9002_v34  ;;  %v9031_v34 = vld [vmem:[#allocation10 + $0xe0] sm:$0xff]  }
 0x8e7   : > { %8180 = vmatprep.subr.bf16.mxu1 %v9003_v35  ;;  %v9032_v35 = vld [vmem:[#allocation10 + $0xa0] sm:$0xff]  }
 0x8ea   : > { %8181 = vmatpush3.bf16.msra.mxu1 %v9004_v36  ;;  %v9035_v36 = vld [vmem:[#allocation10 + $0xd8] sm:$0xff]  }
 0x8eb   : > { %8182 = vmatprep.subr.bf16.mxu1 %v9005_v37  ;;  %v9036_v37 = vld [vmem:[#allocation10 + $0x98] sm:$0xff]  }
 0x8ee   : > { %8183 = vmatpush3.bf16.msra.mxu1 %v9006_v38  ;;  %v9039_v38 = vld [vmem:[#allocation10 + $0xd0] sm:$0xff]  }
 0x8ef   : > { %8184 = vmatprep.subr.bf16.mxu1 %v9007_v39  ;;  %v9040_v39 = vld [vmem:[#allocation10 + $0x90] sm:$0xff]  }
 0x8f2   : > { %8185 = vmatpush3.bf16.msra.mxu1 %v9008_v40  ;;  %v9043_v40 = vld [vmem:[#allocation10 + $0xc8] sm:$0xff]  }
 0x8f3   : > { %8186 = vmatprep.subr.bf16.mxu1 %v9009_v42  ;;  %v5589_v42 = vld [vmem:[%s10288_s24] sm:$0x3] }
 0x8f6   : > { %8187 = vmatpush3.bf16.msra.mxu1 %v9010_v43 }
 0x8f7   : > { %8188 = vmatprep.subr.bf16.mxu1 %v9011_v16  ;;  %v9049_v16 = vld [vmem:[#allocation10 + $0x40] sm:$0xff]  }
 0x8fa   : > { %8189 = vmatpush3.bf16.msra.mxu1 %v9012_v17  ;;  %v9050_v17 = vld [vmem:[#allocation10] sm:$0xff]  }
 0x8fb   : > { %8190 = vmatprep.subr.bf16.mxu1 %v9013_v18  ;;  %v9052_v18 = vld [vmem:[#allocation10 + $0x178] sm:$0xff]  }
 0x8fe   : > { %8191 = vmatpush3.bf16.msra.mxu1 %v9014_v19 }
 0x8ff   : > { %8225 = vmatprep.subr.bf16.mxu1 %v9019_v26  ;;  %v9053_v26 = vld [vmem:[#allocation10 + $0x138] sm:$0xff]  }
 0x981   : > { %v8137_v45 = vpop.f32.mrf.mxu1 }
 0x983   : > { %v8115_v46 = vpop.f32.mrf.mxu0  ;;  %v8138_v48 = vpop.f32.mrf.mxu1 }
 0x984   : > { %v8139_v60 = vadd.f32 %v8138_v48, %v8137_v45  ;;  %v5593_v45 = vrot.slane %v5589_v42, %v9790_v44 }
 0x985   : > { %v8116_v49 = vpop.f32.mrf.mxu0  ;;  %v8140_v50 = vpop.f32.mrf.mxu1 }
 0x986   : > { %v8117_v57 = vadd.f32 %v8116_v49, %v8115_v46  ;;  %v5598_v49 = vrot.slane %v5589_v42, %v9801_v56  ;;  %v9061_v42 = vld [vmem:[#allocation10 + $0x160] sm:$0xff]  }
 0x987   : > { %v8118_v51 = vpop.f32.mrf.mxu0  ;;  %v8141_v52 = vpop.f32.mrf.mxu1 }
 0x988   : > { %v5267_v0 = vadd.f32 %v8139_v60, %v8117_v57  ;;  %v9016_v60 = vld [vmem:[%s10340_s9 + $0x8] sm:$0xff]  }
 0x989   : > { %v8119_v53 = vpop.f32.mrf.mxu0 }
 0x9a1   : > { %v5346_v55 = vpop.f32.mrf.mxu1 }
 0x9a3   : > { %v8159_v58 = vpop.f32.mrf.mxu0  ;;  %v8425_v59 = vpop.f32.mrf.mxu1 }
 0x9a5   : > { %v8160_v61 = vpop.f32.mrf.mxu0  ;;  %v5349_v63 = vpop.f32.mrf.mxu1 }
 0x9a6   : > { %v8161_v1 = vadd.f32 %v8160_v61, %v8159_v58  ;;  %v9021_v58 = vld [vmem:[#allocation10 + $0x78] sm:$0xff]   ;;  %v9017_v61 = vld [vmem:[%s10340_s9 + $0x10] sm:$0xff]  }
 0x9a7   : > { %v8162_v2 = vpop.f32.mrf.mxu0  ;;  %v8426_v3 = vpop.f32.mrf.mxu1  ;;  %v9025_v63 = vld [vmem:[#allocation10 + $0x70] sm:$0xff]  }
 0x9a8   : > { %v5307_v4 = vadd.f32 %v8161_v1, %v5267_v0  ;;  %v9026_v0 = vld [vmem:[#allocation10 + $0x30] sm:$0xff]   ;;  %v9029_v1 = vld [vmem:[#allocation10 + $0x68] sm:$0xff]   ;;  %v9018_v2 = vld [vmem:[%s10340_s9 + $0x18] ss:$0 sps:$4 sm:$0xff]  }
 0x9a9   : > { %v8163_v6 = vpop.f32.mrf.mxu0  ;;  %v9030_v3 = vld [vmem:[#allocation10 + $0x28] sm:$0xff]  }
 0x9aa   : > { %v5347_v7 = vadd.f32 %v5346_v55, %v5307_v4  ;;  %v9033_v4 = vld [vmem:[#allocation10 + $0x60] sm:$0xff]   ;;  %v9037_v6 = vld [vmem:[#allocation10 + $0x58] sm:$0xff]  }
 0x9ac   : > { %v5357_v10 = vmul.f32 %v5356_v5, %v5347_v7  ;;  %v9034_v5 = vld [vmem:[#allocation10 + $0x20] sm:$0xff]   ;;  %v9038_v7 = vld [vmem:[#allocation10 + $0x18] sm:$0xff]  }
 0x9ae   : > { %v5362_v11 = vadd.f32 %v5361_v9, %v5357_v10  ;;  %v9041_v9 = vld [vmem:[#allocation10 + $0x50] sm:$0xff]  }
 0x9af   : > { %v9042_v10 = vld [vmem:[#allocation10 + $0x10] sm:$0xff]  }
 0x9b0   : > { %v5363_v12 = vmax.f32 %v5362_v11, 0.0  ;;  %v9044_v11 = vld [vmem:[#allocation10 + $0x88] sm:$0xff]  }
 0x9b2   : > { %v5364_v13 = vpack.c.bf16 %v5363_v12, %v5363_v12  ;;  %v9045_v12 = vld [vmem:[#allocation10 + $0x48] sm:$0xff]  }
 0x9b4   : > { %v5376_v14 = vsel %vm3204_vm3, %v5364_v13, 0  ;;  %v9046_v13 = vld [vmem:[#allocation10 + $0x8] sm:$0xff]  }
 0x9b5   : > { %8428 = vmatpush3.bf16.msra.mxu0 %v5376_v14  ;;  %v9047_v14 = vld [vmem:[#allocation10 + $0xc0] sm:$0xff]  }
 0x9b8   : > { %8430 = vmatmul.mubr.msk.bf16.vlgmr.msra.gmra.mxu0 %vm3925_vm5, %v8998_v15  ;;  %v9048_v15 = vld [vmem:[#allocation10 + $0x80] sm:$0xff]  }
 0x9b9   : > { %8435 = vmatprep.mubr.msk.bf16.mxu0 %vm3925_vm5, %v9015_v30 }
 0xa78   : > { %v5412_v21 = vpop.f32.mrf.mxu0 }
 0xa79   : > { %v5419_v25 = vpack.c.bf16 %v5412_v21, %v5412_v21 }
 0xa7a   : > { %v8431_v22 = vpop.f32.mrf.mxu0 }
 0xa7c   : > { %v5415_v23 = vpop.f32.mrf.mxu0 }
 0xa7d   : > { %v5420_v24 = vpack.c.bf16 %v5415_v23, %v5415_v23 }
 0xa7e   : > { %v8432_v29 = vpop.f32.mrf.mxu0 }
 0xa7f   : > { %5581 = vmatprep.mubr.bf16.mxu1 %v5420_v24  ;;  %v9051_v24 = vld [vmem:[#allocation10 + $0x1b8] sm:$0xff]  }
 0xa80   : > { %5582 = vmatmul.mubr.bf16.vlgmr.msra.gmra.mxu1 %v5419_v25 }
 0xa81   : > { %8226 = vmatpush3.bf16.msra.mxu1 %v9020_v31 }
 0xa82   : > { %8227 = vmatprep.subr.bf16.mxu1 %v9023_v32  ;;  %v9055_v32 = vld [vmem:[#allocation10 + $0x170] sm:$0xff]  }
 0xa85   : > { %8228 = vmatpush3.bf16.msra.mxu1 %v9024_v33 }
 0xa86   : > { %8229 = vmatprep.subr.bf16.mxu1 %v9027_v27  ;;  %v9054_v27 = vld [vmem:[#allocation10 + $0x1b0] sm:$0xff]  }
 0xa89   : > { %8230 = vmatpush3.bf16.msra.mxu1 %v9028_v28 }
 0xa8a   : > { %8231 = vmatprep.subr.bf16.mxu1 %v9031_v34  ;;  %v9056_v34 = vld [vmem:[#allocation10 + $0x130] sm:$0xff]  }
 0xa8d   : > { %8232 = vmatpush3.bf16.msra.mxu1 %v9032_v35  ;;  %v9058_v35 = vld [vmem:[#allocation10 + $0x168] sm:$0xff]  }
 0xa8e   : > { %8233 = vmatprep.subr.bf16.mxu1 %v9035_v36 }
 0xa91   : > { %8234 = vmatpush3.bf16.msra.mxu1 %v9036_v37  ;;  %v9057_v37 = vld [vmem:[#allocation10 + $0x1a8] sm:$0xff]  }
 0xa92   : > { %8235 = vmatprep.subr.bf16.mxu1 %v9039_v38 }
 0xa95   : > { %8236 = vmatpush3.bf16.msra.mxu1 %v9040_v39  ;;  %v9059_v39 = vld [vmem:[#allocation10 + $0x128] sm:$0xff]  }
 0xa96   : > { %8237 = vmatprep.subr.bf16.mxu1 %v9043_v40 }
 0xa99   : > { %8238 = vmatpush3.bf16.msra.mxu1 %v9044_v11  ;;  %v9130_v11 = vld [vmem:[#allocation12 + $0x124] ss:$8 sps:$4 sm:$0xff]  }
 0xa9a   : > { %8239 = vmatprep.subr.bf16.mxu1 %v9047_v14  ;;  %v9140_v14 = vld [vmem:[#allocation12 + $0x100] ss:$8 sps:$4 sm:$0xff]  }
 0xa9d   : > { %8240 = vmatpush3.bf16.msra.mxu1 %v9048_v15  ;;  %v9142_v15 = vld [vmem:[#allocation12 + $0x104] ss:$8 sps:$4 sm:$0xff]  }
 0xa9e   : > { %8443 = vmatprep.subr.bf16.mxu1 %v9414_v8 }
 0xb40   : > { %v8192_v43 = vpop.f32.mrf.mxu1 }
 0xb42   : > { %v8193_v46 = vpop.f32.mrf.mxu1 }
 0xb43   : > { %v8194_v48 = vadd.f32 %v8193_v46, %v8192_v43  ;;  %v9060_v43 = vld [vmem:[#allocation10 + $0x1a0] sm:$0xff]   ;;  %v9064_v46 = vld [vmem:[#allocation10 + $0x158] sm:$0xff]  }
 0xb44   : > { %v8195_v50 = vpop.f32.mrf.mxu1 }
 0xb45   : > { %v5594_v51 = vmul.f32 %v8194_v48, %v5593_v45  ;;  %v9062_v45 = vld [vmem:[#allocation10 + $0x120] sm:$0xff]   ;;  %v9063_v48 = vld [vmem:[#allocation10 + $0x198] sm:$0xff]   ;;  %v9067_v50 = vld [vmem:[#allocation10 + $0x150] sm:$0xff]  }
 0xb46   : > { %v8196_v52 = vpop.f32.mrf.mxu1 }
 0xb47   : > { %v5599_v53 = vadd.f32 %v5598_v49, %v5594_v51  ;;  %v9065_v49 = vld [vmem:[#allocation10 + $0x118] sm:$0xff]   ;;  %v9066_v51 = vld [vmem:[#allocation10 + $0x190] sm:$0xff]  }
 0xb48   : > { %v9068_v52 = vld [vmem:[#allocation10 + $0x110] sm:$0xff]  }
 0xb49   : > { %v5600_v55 = vmax.f32 %v5599_v53, 0.0  ;;  %v9070_v53 = vld [vmem:[#allocation10 + $0x148] sm:$0xff]  }
 0xb4b   : > { %v5601_v57 = vpack.c.bf16 %v5600_v55, %v5600_v55  ;;  %v9069_v55 = vld [vmem:[#allocation10 + $0x188] sm:$0xff]  }
 0xb4d   : > { %8472 = vmatprep.subr.msk.bf16.mxu0 %vm3204_vm3, %v5601_v57  ;;  %v5640_v59 = vsel %vm3204_vm3, %v5601_v57, 0  ;;  %v9071_v57 = vld [vmem:[#allocation10 + $0x108] sm:$0xff]  }
 0xb4e   : > { %8434 = vmatpush3.bf16.msra.mxu0 %v5640_v59  ;;  %v9072_v59 = vld [vmem:[#allocation10 + $0x180] sm:$0xff]  }
 0xb4f   : > { %8203 = vmatprep.subr.bf16.mxu0 %v9021_v58  ;;  %v9073_v58 = vld [vmem:[#allocation10 + $0x140] sm:$0xff]  }
 0xb51   : > { %8436 = vmatmul.mubr.msk.bf16.vlgmr.msra.gmra.mxu0 %vm3925_vm5, %v9016_v60  ;;  %v9074_v60 = vld [vmem:[#allocation10 + $0x100] sm:$0xff]  }
 0xb52   : > { %8439 = vmatprep.mubr.msk.bf16.mxu0 %vm3925_vm5, %v9017_v61  ;;  %8204 = vmatpush3.bf16.msra.mxu0 %v9022_v62 }
 0xb53   : > { %8205 = vmatprep.subr.bf16.mxu0 %v9025_v63  ;;  %v9075_v63 = vld [vmem:[%s10341_s1] sm:$0xff]  }
 0xb56   : > { %8206 = vmatpush3.bf16.msra.mxu0 %v9026_v0  ;;  %v9098_v0 = vld [vmem:[#allocation12 + $0x170] ss:$8 sps:$4 sm:$0xff]  }
 0xb57   : > { %8207 = vmatprep.subr.bf16.mxu0 %v9029_v1  ;;  %v9100_v1 = vld [vmem:[#allocation12 + $0x174] ss:$8 sps:$4 sm:$0xff]  }
 0xb59   : > { %8440 = vmatmul.mubr.msk.bf16.gmra.mxu0 %vm3925_vm5, %v9018_v2  ;;  %v9106_v2 = vld [vmem:[#allocation12 + $0x164] ss:$8 sps:$4 sm:$0xff]  }
 0xb5a   : > { %8208 = vmatpush3.bf16.msra.mxu0 %v9030_v3  ;;  %v9110_v3 = vld [vmem:[#allocation12 + $0x150] ss:$8 sps:$4 sm:$0xff]  }
 0xb5b   : > { %8209 = vmatprep.subr.bf16.mxu0 %v9033_v4  ;;  %v9112_v4 = vld [vmem:[#allocation12 + $0x154] ss:$8 sps:$4 sm:$0xff]  }
 0xb5e   : > { %8210 = vmatpush3.bf16.msra.mxu0 %v9034_v5  ;;  %v9116_v5 = vld [vmem:[#allocation12 + $0x140] ss:$8 sps:$4 sm:$0xff]  }
 0xb5f   : > { %8211 = vmatprep.subr.bf16.mxu0 %v9037_v6  ;;  %v9118_v6 = vld [vmem:[#allocation12 + $0x144] ss:$8 sps:$4 sm:$0xff]  }
 0xb62   : > { %8212 = vmatpush3.bf16.msra.mxu0 %v9038_v7  ;;  %v9122_v7 = vld [vmem:[#allocation12 + $0x130] ss:$8 sps:$4 sm:$0xff]  }
 0xb63   : > { %8213 = vmatprep.subr.bf16.mxu0 %v9041_v9  ;;  %v9124_v9 = vld [vmem:[#allocation12 + $0x134] ss:$8 sps:$4 sm:$0xff]  }
 0xb66   : > { %8214 = vmatpush3.bf16.msra.mxu0 %v9042_v10  ;;  %v9128_v10 = vld [vmem:[#allocation12 + $0x120] ss:$8 sps:$4 sm:$0xff]  }
 0xb67   : > { %8215 = vmatprep.subr.bf16.mxu0 %v9045_v12  ;;  %v9134_v12 = vld [vmem:[#allocation12 + $0x110] ss:$8 sps:$4 sm:$0xff]  }
 0xb6a   : > { %8216 = vmatpush3.bf16.msra.mxu0 %v9046_v13  ;;  %v9136_v13 = vld [vmem:[#allocation12 + $0x114] ss:$8 sps:$4 sm:$0xff]  }
 0xb6b   : > { %8217 = vmatprep.subr.bf16.mxu0 %v9049_v16 }
 0xb6e   : > { %8218 = vmatpush3.bf16.msra.mxu0 %v9050_v17 }
 0xb6f   : > { %8247 = vmatprep.subr.bf16.mxu0 %v9052_v18 }
 0xc11   : > { %v8437_v19 = vpop.f32.mrf.mxu0 }
 0xc12   : > { %v5708_v25 = vpack.c.bf16 %v8437_v19, %v8437_v19 }
 0xc13   : > { %v5676_v21 = vpop.f32.mrf.mxu0 }
 0xc14   : > { %v5706_v31 = vpack.c.bf16 %v5676_v21, %v5676_v21 }
 0xc15   : > { %v8438_v22 = vpop.f32.mrf.mxu0 }
 0xc16   : > { %v5709_v23 = vpack.c.bf16 %v8438_v22, %v8438_v22 }
 0xc17   : > { %v5679_v29 = vpop.f32.mrf.mxu0 }
 0xc18   : > { %v5707_v30 = vpack.c.bf16 %v5679_v29, %v5679_v29  ;;  %6233 = vmatprep.mubr.bf16.mxu1 %v5709_v23 }
 0xc19   : > { %6234 = vmatmul.mubr.bf16.vlgmr.msra.gmra.mxu1 %v5708_v25  ;;  %v8441_v33 = vpop.f32.mrf.mxu0 }
 0xc1a   : > { %8444 = vmatpush3.bf16.msra.mxu1 %v9051_v24  ;;  %6193 = vmatprep.mubr.bf16.mxu0 %v5707_v30  ;;  %v5712_v61 = vpack.c.bf16 %v8441_v33, %v8441_v33  ;;  %v6321_v33 = vld [vmem:[%s10289_s25] sm:$0x3] }
 0xc1b   : > { %6194 = vmatmul.mubr.bf16.vlgmr.msra.gmra.mxu0 %v5706_v31  ;;  %8445 = vmatprep.subr.bf16.mxu1 %v9414_v8  ;;  %v5692_v28 = vpop.f32.mrf.mxu0 }
 0xc1c   : > { %8248 = vmatpush3.bf16.msra.mxu0 %v9053_v26  ;;  %8459 = vmatprep.mubr.msk.bf16.mxu1 %vm9415_vm4, %v9414_v8  ;;  %v5710_v62 = vpack.c.bf16 %v5692_v28, %v5692_v28 }
 0xc1d   : > { %8249 = vmatprep.subr.bf16.mxu0 %v9055_v32  ;;  %v8442_v36 = vpop.f32.mrf.mxu0 }
 0xc1e   : > { %8446 = vmatpush3.bf16.msra.mxu1 %v9054_v27 }
 0xc1f   : > { %8447 = vmatprep.subr.bf16.mxu1 %v9414_v8  ;;  %v5695_v38 = vpop.f32.mrf.mxu0 }
 0xc20   : > { %8250 = vmatpush3.bf16.msra.mxu0 %v9056_v34  ;;  %v5711_v40 = vpack.c.bf16 %v5695_v38, %v5695_v38  ;;  %v6325_v38 = vrot.slane %v6321_v33, %v9790_v44 }
 0xc21   : > { %8251 = vmatprep.subr.bf16.mxu0 %v9058_v35 }
 0xc22   : > { %8448 = vmatpush3.bf16.msra.mxu1 %v9057_v37  ;;  %6273 = vmatprep.mubr.bf16.mxu0 %v5711_v40 }
 0xc23   : > { %8449 = vmatprep.subr.bf16.mxu1 %v9414_v8 }
 0xc24   : > { %8252 = vmatpush3.bf16.msra.mxu0 %v9059_v39 }
 0xc25   : > { %8253 = vmatprep.subr.bf16.mxu0 %v9061_v42  ;;  %v6330_v42 = vrot.slane %v6321_v33, %v9801_v56 }
 0xc26   : > { %8450 = vmatpush3.bf16.msra.mxu1 %v9060_v43 }
 0xc27   : > { %8451 = vmatprep.subr.bf16.mxu1 %v9414_v8 }
 0xc28   : > { %8254 = vmatpush3.bf16.msra.mxu0 %v9062_v45 }
 0xc29   : > { %8255 = vmatprep.subr.bf16.mxu0 %v9064_v46 }
 0xc2a   : > { %8452 = vmatpush3.bf16.msra.mxu1 %v9063_v48 }
 0xc2b   : > { %8453 = vmatprep.subr.bf16.mxu1 %v9414_v8 }
 0xc2c   : > { %8256 = vmatpush3.bf16.msra.mxu0 %v9065_v49  ;;  %v9079_v49 = vld [vmem:[#allocation12 + $0x74] ss:$8 sps:$4 sm:$0xff]  }
 0xc2d   : > { %8257 = vmatprep.subr.bf16.mxu0 %v9067_v50 }
 0xc2e   : > { %8454 = vmatpush3.bf16.msra.mxu1 %v9066_v51  ;;  %v9076_v51 = vld [vmem:[%s10341_s1 + $0x8] ss:$0 sps:$4 sm:$0xff]  }
 0xc2f   : > { %8455 = vmatprep.subr.bf16.mxu1 %v9414_v8 }
 0xc30   : > { %8258 = vmatpush3.bf16.msra.mxu0 %v9068_v52  ;;  %v9077_v52 = vld [vmem:[#allocation12 + $0x70] ss:$8 sps:$4 sm:$0xff]  }
 0xc31   : > { %8259 = vmatprep.subr.bf16.mxu0 %v9070_v53  ;;  %v9082_v53 = vld [vmem:[#allocation12 + $0x64] ss:$8 sps:$4 sm:$0xff]  }
 0xc32   : > { %8456 = vmatpush3.bf16.msra.mxu1 %v9069_v55  ;;  %v9080_v55 = vld [vmem:[#allocation12 + $0x60] ss:$8 sps:$4 sm:$0xff]  }
 0xc33   : > { %8457 = vmatprep.subr.bf16.mxu1 %v9414_v8  ;;  %v9104_v8 = vld [vmem:[#allocation12 + $0x160] ss:$8 sps:$4 sm:$0xff]  }
 0xc34   : > { %8260 = vmatpush3.bf16.msra.mxu0 %v9071_v57  ;;  %v9085_v57 = vld [vmem:[#allocation12 + $0x54] ss:$8 sps:$4 sm:$0xff]  }
 0xc35   : > { %8261 = vmatprep.subr.bf16.mxu0 %v9073_v58  ;;  %v9083_v58 = vld [vmem:[#allocation12 + $0x50] ss:$8 sps:$4 sm:$0xff]  }
 0xc36   : > { %8458 = vmatpush3.bf16.msra.mxu1 %v9072_v59  ;;  %v9088_v59 = vld [vmem:[#allocation12 + $0x44] ss:$8 sps:$4 sm:$0xff]  }
 0xc37   : > { %6734 = vmatprep.subr.bf16.mxu1 %v9100_v1  ;;  %v9097_v1 = vld [vmem:[#allocation12 + $0x14] ss:$8 sps:$4 sm:$0xff]  }
 0xc38   : > { %8262 = vmatpush3.bf16.msra.mxu0 %v9074_v60  ;;  %v9086_v60 = vld [vmem:[#allocation12 + $0x40] ss:$8 sps:$4 sm:$0xff]  }
 0xc39   : > { %8460 = vmatmul.mubr.bf16.vlgmr.msra.gmra.mxu1 %v5712_v61  ;;  %v9091_v61 = vld [vmem:[#allocation12 + $0x34] ss:$8 sps:$4 sm:$0xff]  }
 0xc3a   : > { %6766 = vmatprep.mubr.bf16.mxu1 %v9413_v20  ;;  %6735 = vmatpush1.bf16.msra.mxu1 %v9098_v0  ;;  %v9092_v0 = vld [vmem:[#allocation12 + $0x20] ss:$8 sps:$4 sm:$0xff]  }
 0xc3b   : > { %6274 = vmatmul.mubr.bf16.vlgmr.msra.gmra.mxu0 %v5710_v62  ;;  %6736 = vmatprep.subr.bf16.mxu1 %v9106_v2  ;;  %v9089_v62 = vld [vmem:[#allocation12 + $0x30] ss:$8 sps:$4 sm:$0xff]   ;;  %v9103_v2 = vld [vmem:[#allocation12 + $0x4] ss:$8 sps:$4 sm:$0xff]  }
 0xc3c   : > { %8465 = vmatprep.mubr.msk.bf16.mxu0 %vm3925_vm5, %v9075_v63  ;;  %v9094_v63 = vld [vmem:[#allocation12 + $0x24] ss:$8 sps:$4 sm:$0xff]  }
 0xc3e   : > { %6737 = vmatpush1.bf16.msra.mxu1 %v9104_v8  ;;  %v9095_v8 = vld [vmem:[#allocation12 + $0x10] ss:$8 sps:$4 sm:$0xff]  }
 0xc3f   : > { %6738 = vmatprep.subr.bf16.mxu1 %v9112_v4  ;;  %v9109_v4 = vld [vmem:[#allocation12 + $0xf4] ss:$8 sps:$4 sm:$0xff]  }
 0xc42   : > { %6739 = vmatpush1.bf16.msra.mxu1 %v9110_v3  ;;  %v9101_v3 = vld [vmem:[#allocation12] ss:$8 sps:$4 sm:$0xff]  }
 0xc43   : > { %6740 = vmatprep.subr.bf16.mxu1 %v9118_v6  ;;  %v9115_v6 = vld [vmem:[#allocation12 + $0xe4] ss:$8 sps:$4 sm:$0xff]  }
 0xc46   : > { %6741 = vmatpush1.bf16.msra.mxu1 %v9116_v5  ;;  %v9107_v5 = vld [vmem:[#allocation12 + $0xf0] ss:$8 sps:$4 sm:$0xff]  }
 0xc47   : > { %6742 = vmatprep.subr.bf16.mxu1 %v9124_v9  ;;  %v9121_v9 = vld [vmem:[#allocation12 + $0xd4] ss:$8 sps:$4 sm:$0xff]  }
 0xc4a   : > { %6743 = vmatpush1.bf16.msra.mxu1 %v9122_v7  ;;  %v9113_v7 = vld [vmem:[#allocation12 + $0xe0] ss:$8 sps:$4 sm:$0xff]  }
 0xc4b   : > { %6744 = vmatprep.subr.bf16.mxu1 %v9130_v11  ;;  %v9127_v11 = vld [vmem:[#allocation12 + $0xc4] ss:$8 sps:$4 sm:$0xff]  }
 0xc4e   : > { %6745 = vmatpush1.bf16.msra.mxu1 %v9128_v10  ;;  %v9119_v10 = vld [vmem:[#allocation12 + $0xd0] ss:$8 sps:$4 sm:$0xff]  }
 0xc4f   : > { %6746 = vmatprep.subr.bf16.mxu1 %v9136_v13  ;;  %v9133_v13 = vld [vmem:[#allocation12 + $0xb4] ss:$8 sps:$4 sm:$0xff]  }
 0xc52   : > { %6747 = vmatpush1.bf16.msra.mxu1 %v9134_v12  ;;  %v9125_v12 = vld [vmem:[#allocation12 + $0xc0] ss:$8 sps:$4 sm:$0xff]  }
 0xc53   : > { %6748 = vmatprep.subr.bf16.mxu1 %v9142_v15  ;;  %v9139_v15 = vld [vmem:[#allocation12 + $0xa4] ss:$8 sps:$4 sm:$0xff]  }
 0xc56   : > { %6749 = vmatpush1.bf16.msra.mxu1 %v9140_v14  ;;  %v9131_v14 = vld [vmem:[#allocation12 + $0xb0] ss:$8 sps:$4 sm:$0xff]  }
 0xcd9   : > { %v8241_v16 = vpop.f32.mrf.mxu1 }
 0xcdb   : > { %v8219_v17 = vpop.f32.mrf.mxu0  ;;  %v8242_v18 = vpop.f32.mrf.mxu1 }
 0xcdc   : > { %v8243_v31 = vadd.f32 %v8242_v18, %v8241_v16  ;;  %v9137_v16 = vld [vmem:[#allocation12 + $0xa0] ss:$8 sps:$4 sm:$0xff]   ;;  %v9143_v18 = vld [vmem:[#allocation12 + $0x90] ss:$8 sps:$4 sm:$0xff]  }
 0xcdd   : > { %v8220_v19 = vpop.f32.mrf.mxu0  ;;  %v8244_v21 = vpop.f32.mrf.mxu1 }
 0xcde   : > { %v8221_v29 = vadd.f32 %v8220_v19, %v8219_v17  ;;  %v9145_v17 = vld [vmem:[#allocation12 + $0x94] ss:$8 sps:$4 sm:$0xff]   ;;  %v9148_v19 = vld [vmem:[#allocation12 + $0x84] ss:$8 sps:$4 sm:$0xff]   ;;  %v9146_v21 = vld [vmem:[#allocation12 + $0x80] ss:$8 sps:$4 sm:$0xff]  }
 0xcdf   : > { %v8222_v22 = vpop.f32.mrf.mxu0  ;;  %v8245_v23 = vpop.f32.mrf.mxu1 }
 0xce0   : > { %v6236_v28 = vadd.f32 %v8243_v31, %v8221_v29  ;;  %v6775_v31 = vld [vmem:[%s10290_s26] sm:$0xf] }
 0xce1   : > { %v8223_v24 = vpop.f32.mrf.mxu0 }
 0xcf9   : > { %v6315_v25 = vpop.f32.mrf.mxu1 }
 0xcfb   : > { %v8263_v30 = vpop.f32.mrf.mxu0  ;;  %v8461_v26 = vpop.f32.mrf.mxu1 }
 0xcfd   : > { %v8264_v32 = vpop.f32.mrf.mxu0  ;;  %v6318_v27 = vpop.f32.mrf.mxu1 }
 0xcfe   : > { %v8265_v34 = vadd.f32 %v8264_v32, %v8263_v30  ;;  %v6780_v27 = vrot.slane %v6775_v31, %v9790_v44 }
 0xcff   : > { %v8266_v35 = vpop.f32.mrf.mxu0  ;;  %v8462_v36 = vpop.f32.mrf.mxu1 }
 0xd00   : > { %v6276_v37 = vadd.f32 %v8265_v34, %v6236_v28  ;;  %v6800_v34 = vrot.slane %v6775_v31, %v9801_v56  ;;  %v6784_v35 = vrot.slane %v6775_v31, %v1999_v47  ;;  %v6790_v36 = vrot.slane %v6780_v27, %v9790_v44 }
 0xd01   : > { %v8267_v39 = vpop.f32.mrf.mxu0 }
 0xd02   : > { %v6316_v40 = vadd.f32 %v6315_v25, %v6276_v37  ;;  %v6804_v37 = vrot.slane %v6775_v31, %v2025_v54 }
 0xd04   : > { %v6326_v43 = vmul.f32 %v6325_v38, %v6316_v40  ;;  %v6810_v40 = vrot.slane %v6800_v34, %v9801_v56 }
 0xd06   : > { %v6331_v45 = vadd.f32 %v6330_v42, %v6326_v43  ;;  %v6794_v42 = vrot.slane %v6784_v35, %v9790_v44 }
 0xd08   : > { %v6332_v46 = vmax.f32 %v6331_v45, 0.0 }
 0xd0a   : > { %v6333_v48 = vpack.c.bf16 %v6332_v46, %v6332_v46 }
 0xd0c   : > { %8473 = vmatprep.subr.msk.bf16.mxu0 %vm3204_vm3, %v6333_v48  ;;  %v6352_v50 = vsel %vm3204_vm3, %v6333_v48, 0  ;;  %v6814_v48 = vrot.slane %v6804_v37, %v9801_v56 }
 0xd0d   : > { %8464 = vmatpush3.bf16.msra.mxu0 %v6352_v50 }
 0xd0e   : > { %6693 = vmatprep.subr.bf16.mxu0 %v9079_v49 }
 0xd10   : > { %8466 = vmatmul.mubr.msk.bf16.vlgmr.msra.gmra.mxu0 %vm3925_vm5, %v9076_v51 }
 0xd11   : > { %6694 = vmatpush1.bf16.msra.mxu0 %v9077_v52 }
 0xd12   : > { %6695 = vmatprep.subr.bf16.mxu0 %v9082_v53 }
 0xd15   : > { %6696 = vmatpush1.bf16.msra.mxu0 %v9080_v55 }
 0xd16   : > { %6697 = vmatprep.subr.bf16.mxu0 %v9085_v57  ;;  %v9149_v57 = vld [vmem:[#allocation13 + $0x78] sm:$0xff]  }
 0xd19   : > { %6698 = vmatpush1.bf16.msra.mxu0 %v9083_v58 }
 0xd1a   : > { %6699 = vmatprep.subr.bf16.mxu0 %v9088_v59  ;;  %v6821_v59 = vld [vmem:[%s10342_s11] sm:$0xf] }
 0xd1d   : > { %6700 = vmatpush1.bf16.msra.mxu0 %v9086_v60  ;;  %v9150_v60 = vld [vmem:[#allocation13 + $0x38] sm:$0xff]  }
 0xd1e   : > { %6701 = vmatprep.subr.bf16.mxu0 %v9091_v61  ;;  %v9151_v61 = vld [vmem:[#allocation13 + $0x70] sm:$0xff]  }
 0xd21   : > { %6702 = vmatpush1.bf16.msra.mxu0 %v9089_v62  ;;  %v9152_v62 = vld [vmem:[#allocation13 + $0x30] sm:$0xff]  }
 0xd22   : > { %6703 = vmatprep.subr.bf16.mxu0 %v9094_v63  ;;  %v9153_v63 = vld [vmem:[#allocation13 + $0x68] sm:$0xff]  }
 0xd25   : > { %6704 = vmatpush1.bf16.msra.mxu0 %v9092_v0  ;;  %v9154_v0 = vld [vmem:[#allocation13 + $0x28] sm:$0xff]  }
 0xd26   : > { %6705 = vmatprep.subr.bf16.mxu0 %v9097_v1  ;;  %v9155_v1 = vld [vmem:[#allocation13 + $0x60] sm:$0xff]  }
 0xd29   : > { %6706 = vmatpush1.bf16.msra.mxu0 %v9095_v8  ;;  %v9156_v8 = vld [vmem:[#allocation13 + $0x20] sm:$0xff]  }
 0xd2a   : > { %6707 = vmatprep.subr.bf16.mxu0 %v9103_v2  ;;  %v9157_v2 = vld [vmem:[#allocation13 + $0x58] sm:$0xff]  }
 0xd2d   : > { %6708 = vmatpush1.bf16.msra.mxu0 %v9101_v3  ;;  %v9158_v3 = vld [vmem:[#allocation13 + $0x18] sm:$0xff]  }
 0xd2e   : > { %6709 = vmatprep.subr.bf16.mxu0 %v9109_v4  ;;  %v9159_v4 = vld [vmem:[#allocation13 + $0x50] sm:$0xff]  }
 0xd31   : > { %6710 = vmatpush2.bf16.msra.mxu0 %v9107_v5  ;;  %v9160_v5 = vld [vmem:[#allocation13 + $0x10] sm:$0xff]  }
 0xd32   : > { %6711 = vmatprep.subr.bf16.mxu0 %v9115_v6  ;;  %v9161_v6 = vld [vmem:[#allocation13 + $0x48] sm:$0xff]  }
 0xd35   : > { %6712 = vmatpush2.bf16.msra.mxu0 %v9113_v7  ;;  %v9162_v7 = vld [vmem:[#allocation13 + $0x8] sm:$0xff]  }
 0xd36   : > { %6713 = vmatprep.subr.bf16.mxu0 %v9121_v9  ;;  %v9163_v9 = vld [vmem:[#allocation13 + $0x40] sm:$0xff]  }
 0xd39   : > { %6714 = vmatpush2.bf16.msra.mxu0 %v9119_v10  ;;  %v9164_v10 = vld [vmem:[#allocation13] sm:$0xff]  }
 0xd3a   : > { %6715 = vmatprep.subr.bf16.mxu0 %v9127_v11 }
 0xd3d   : > { %6716 = vmatpush2.bf16.msra.mxu0 %v9125_v12 }
 0xd3e   : > { %6717 = vmatprep.subr.bf16.mxu0 %v9133_v13 }
 0xd41   : > { %6718 = vmatpush2.bf16.msra.mxu0 %v9131_v14 }
 0xd42   : > { %6719 = vmatprep.subr.bf16.mxu0 %v9139_v15 }
 0xd45   : > { %6720 = vmatpush2.bf16.msra.mxu0 %v9137_v16 }
 0xd46   : > { %6721 = vmatprep.subr.bf16.mxu0 %v9145_v17  ;;  %v7042_v17 = vld [vmem:[%s10291_s27] sm:$0x3] }
 0xd49   : > { %6722 = vmatpush2.bf16.msra.mxu0 %v9143_v18 }
 0xd4a   : > { %6723 = vmatprep.subr.bf16.mxu0 %v9148_v19  ;;  %v7046_v19 = vrot.slane %v7042_v17, %v9790_v44 }
 0xd4d   : > { %6724 = vmatpush2.bf16.msra.mxu0 %v9146_v21 }
 0xdd0   : > { %v8467_v22 = vpop.f32.mrf.mxu0 }
 0xdd1   : > { %v6404_v23 = vpack.c.bf16 %v8467_v22, %v8467_v22 }
 0xdd2   : > { %v6388_v24 = vpop.f32.mrf.mxu0 }
 0xdd3   : > { %6767 = vmatmul.mubr.bf16.vlgmr.msra.gmra.mxu1 %v6404_v23  ;;  %v6402_v26 = vpack.c.bf16 %v6388_v24, %v6388_v24  ;;  %v7051_v23 = vrot.slane %v7042_v17, %v9801_v56 }
 0xdd4   : > { %v8468_v25 = vpop.f32.mrf.mxu0  ;;  %6863 = vmatprep.mubr.bf16.mxu1 %v9413_v20 }
 0xdd6   : > { %v6391_v29 = vpop.f32.mrf.mxu0 }
 0xdd7   : > { %v6403_v30 = vpack.c.bf16 %v6391_v29, %v6391_v29 }
 0xdd9   : > { %6725 = vmatprep.mubr.bf16.mxu0 %v6403_v30 }
 0xdda   : > { %6726 = vmatmul.mubr.bf16.vlgmr.msra.gmra.mxu0 %v6402_v26 }
 0xe93   : > { %v6768_v32 = vpop.f32.mrf.mxu1 }
 0xe95   : > { %v6770_v33 = vpop.f32.mrf.mxu1 }
 0xe97   : > { %v6772_v28 = vpop.f32.mrf.mxu1 }
 0xe99   : > { %v6773_v20 = vpop.f32.mrf.mxu1 }
 0xe9a   : > { %v6727_v38 = vpop.f32.mrf.mxu0 }
 0xe9b   : > { %v6769_v39 = vadd.f32 %v6768_v32, %v6727_v38 }
 0xe9c   : > { %v6729_v43 = vpop.f32.mrf.mxu0 }
 0xe9d   : > { %v6795_v45 = vmul.f32 %v6790_v36, %v6769_v39  ;;  %v6771_v46 = vadd.f32 %v6770_v33, %v6729_v43 }
 0xe9e   : > { %v6731_v49 = vpop.f32.mrf.mxu0 }
 0xe9f   : > { %v6815_v50 = vadd.f32 %v6810_v40, %v6795_v45  ;;  %v6796_v47 = vmul.f32 %v6794_v42, %v6771_v46 }
 0xea0   : > { %v6732_v51 = vpop.f32.mrf.mxu0 }
 0xea1   : > { %v6817_v52 = vmax.f32 %v6815_v50, 0.0  ;;  %v6816_v53 = vadd.f32 %v6814_v48, %v6796_v47 }
 0xea3   : > { %v6818_v55 = vmax.f32 %v6816_v53, 0.0  ;;  %v6819_v41 = vpack.c.bf16 %v6817_v52, %v6817_v52 }
 0xea5   : > { %v6820_v54 = vpack.c.bf16 %v6818_v55, %v6818_v55  ;;  %v6826_v58 = vsel %vm3204_vm3, %v6819_v41, 0 }
 0xea7   : > { %7756 = vmatprep.subr.msk.bf16.mxu1 %vm3204_vm3, %v6820_v54 }
 0xea8   : > { %6846 = vmatpush1.bf16.msra.mxu1 %v6826_v58 }
 0xea9   : > { %8281 = vmatprep.subr.bf16.mxu1 %v9149_v57 }
 0xeab   : > { %7757 = vmatmul.mubr.msk.bf16.vlgmr.msra.gmra.mxu1 %vm3925_vm5, %v6821_v59 }
 0xeac   : > { %8282 = vmatpush3.bf16.msra.mxu1 %v9150_v60 }
 0xead   : > { %8283 = vmatprep.subr.bf16.mxu1 %v9151_v61 }
 0xeb0   : > { %8284 = vmatpush3.bf16.msra.mxu1 %v9152_v62 }
 0xeb1   : > { %8285 = vmatprep.subr.bf16.mxu1 %v9153_v63 }
 0xeb4   : > { %8286 = vmatpush3.bf16.msra.mxu1 %v9154_v0 }
 0xeb5   : > { %8287 = vmatprep.subr.bf16.mxu1 %v9155_v1 }
 0xeb8   : > { %8288 = vmatpush3.bf16.msra.mxu1 %v9156_v8 }
 0xeb9   : > { %8289 = vmatprep.subr.bf16.mxu1 %v9157_v2 }
 0xebc   : > { %8290 = vmatpush3.bf16.msra.mxu1 %v9158_v3 }
 0xebd   : > { %8291 = vmatprep.subr.bf16.mxu1 %v9159_v4 }
 0xec0   : > { %8292 = vmatpush3.bf16.msra.mxu1 %v9160_v5 }
 0xec1   : > { %8293 = vmatprep.subr.bf16.mxu1 %v9161_v6 }
 0xec4   : > { %8294 = vmatpush3.bf16.msra.mxu1 %v9162_v7 }
 0xec5   : > { %8295 = vmatprep.subr.bf16.mxu1 %v9163_v9 }
 0xec8   : > { %8296 = vmatpush3.bf16.msra.mxu1 %v9164_v10 }
 0xf6b   : > { %v6865_v11 = vpop.f32.mrf.mxu1 }
 0xf6c   : > { %v6872_v14 = vpack.c.bf16 %v6865_v11, %v6865_v11 }
 0xf6d   : > { %v6867_v12 = vpop.f32.mrf.mxu1 }
 0xf6e   : > { %v6873_v13 = vpack.c.bf16 %v6867_v12, %v6867_v12 }
 0xf6f   : > { %v6869_v15 = vpop.f32.mrf.mxu1 }
 0xf70   : > { %7034 = vmatprep.mubr.bf16.mxu1 %v6873_v13 }
 0xf71   : > { %7035 = vmatmul.mubr.bf16.vlgmr.msra.gmra.mxu1 %v6872_v14  ;;  %v6870_v16 = vpop.f32.mrf.mxu1 }
0x1031   : > { %v8297_v18 = vpop.f32.mrf.mxu1 }
0x1033   : > { %v8298_v21 = vpop.f32.mrf.mxu1 }
0x1034   : > { %v8299_v22 = vadd.f32 %v8298_v21, %v8297_v18 }
0x1035   : > { %v8300_v24 = vpop.f32.mrf.mxu1 }
0x1036   : > { %v7047_v25 = vmul.f32 %v8299_v22, %v7046_v19 }
0x1037   : > { %v8301_v29 = vpop.f32.mrf.mxu1 }
0x1038   : > { %v7052_v30 = vadd.f32 %v7051_v23, %v7047_v25 }
0x103a   : > { %7053 = vst [vmem:[%s960_s29] sm:$0xff] %v7052_v30 }
0x103b PF: > { %s10343_s11 = sld [smem:[#allocation20_spill]] }
0x1041   : > { %s43_s8 = sadd.s32 1, %s10343_s11  }
0x1042   : > { %p40_p2 = scmp.ge.s32.totalorder %s43_s8, 4  }
0x1044   :  { %42 = sbr.rel (!%p40_p2) target bundleno = 20 (0x14), region = 195 }
0x1049   :  { %7073 = vsyncpa [#allocation3], 1 }
0x104a   :  { %7075 = vsyncpa [#allocation3 + $0x1], 1 }
0x104b   :  { %7076 = vsyncpa [#allocation5], 1 }
0x104c   :  { %7077 = vsyncpa [#allocation8], 1 }
0x104d   :  { %7078 = vsyncpa [#allocation11], 1 }
0x104e   :  { %7079 = vsyncpa [#allocation14], 1 }

</bundles_post_ra>
